<compile_context>
chip_gen: v7x
topology: tpu7x:2x2x1
jax: 0.10.0
libtpu: 0.0.40
codegen_flags: <defaults>
</compile_context>

<pallas_src>
import jax
import jax.numpy as jnp
import numpy as np
from jax.experimental import pallas as pl
from jax.experimental.pallas import tpu as pltpu


MATMUL_DTYPE = jnp.bfloat16   # MXU-native on v5e/v6e/v7x; accumulation stays f32


# ------------------------------ fused kernel ------------------------------- #

def _make_fused_kernel(N, H1, W1, H2, W2, H3, W3, C1, C2):
    """Builds the fused conv1+conv2+conv3+pool+fc kernel for static shapes."""
    KH2 = KW2 = 4          # conv2 kernel (stride 2, pad 1)
    KH3 = KW3 = 3          # conv3 kernel (stride 1, pad 1)
    inv_p = 1.0 / float(H3 * W3)

    def kernel(a1_ref, w1_ref, b1_ref, w2_ref, b2_ref, w3_ref, b3_ref,
               wf_ref, bf_ref, o_ref, y1p_ref, y2p_ref, a2_ref, a3_ref):
        f32 = jnp.float32

        # ---- conv1 as one GEMM + bias + ReLU (rows ordered (n, h, w)) ------
        h1 = jnp.dot(a1_ref[...].astype(MATMUL_DTYPE), w1_ref[...],
                     preferred_element_type=f32) + b1_ref[...]
        h1 = jnp.maximum(h1, 0.0)                       # (N*H1*W1, C1) f32

        # ---- scatter conv1 output into a zero-padded NHWC VMEM buffer -----
        y1p_ref[...] = jnp.zeros((N, H1 + 2, W1 + 2, C1), f32)
        for n in range(N):
            for h in range(H1):
                r = (n * H1 + h) * W1
                y1p_ref[n, 1 + h, 1:1 + W1, :] = h1[r:r + W1, :]

        # conv2's padded output buffer: zero the borders before use
        y2p_ref[...] = jnp.zeros((N, H2 + 2, W2 + 2, C2), f32)

        # ---- in-kernel im2col for conv2 (k=4, s=2, p=1) --------------------
        # a2[n, ho, wo, (di,dj,c)] = y1p[n, 2*ho+di, 2*wo+dj, c]
        for ho in range(H2):
            for di in range(KH2):
                row = y1p_ref[:, 2 * ho + di, :, :]     # (N, W1+2, C1)
                for dj in range(KW2):
                    taps = [row[:, dj + 2 * w:dj + 2 * w + 1, :]
                            for w in range(W2)]
                    c0 = (di * KW2 + dj) * C1
                    a2_ref[:, ho, :, c0:c0 + C1] = jnp.concatenate(taps, axis=1)

        # ---- conv2 GEMMs (per sample / output row) + bias + ReLU -----------
        w2 = w2_ref[...]
        b2 = b2_ref[...]
        for n in range(N):
            for ho in range(H2):
                patches = a2_ref[n, ho, :, :].astype(MATMUL_DTYPE)   # (W2, 16*C1)
                r2 = jnp.dot(patches, w2, preferred_element_type=f32) + b2
                y2p_ref[n, 1 + ho, 1:1 + W2, :] = jnp.maximum(r2, 0.0)

        # ---- in-kernel im2col for conv3 (k=3, s=1, p=1): 9 tap copies ------
        for di in range(KH3):
            for dj in range(KW3):
                c0 = (di * KW3 + dj) * C2
                a3_ref[:, :, :, c0:c0 + C2] = y2p_ref[:, di:di + H3, dj:dj + W3, :]

        # ---- conv3 GEMMs + bias + ReLU, pooled sum accumulated on the fly --
        w3 = w3_ref[...]
        b3 = b3_ref[...]
        pooled_rows = []
        for n in range(N):
            acc = jnp.zeros((W3, C2), f32)
            for ho in range(H3):
                patches = a3_ref[n, ho, :, :].astype(MATMUL_DTYPE)   # (W3, 9*C2)
                r3 = jnp.dot(patches, w3, preferred_element_type=f32) + b3
                acc = acc + jnp.maximum(r3, 0.0)
            # AdaptiveAvgPool2d((1,1)): mean over the H3*W3 positions.
            # 1/P scale is a single VPU multiply on (1, C2).
            pooled_rows.append(jnp.sum(acc, axis=0, keepdims=True) * inv_p)
        pooled = jnp.concatenate(pooled_rows, axis=0)                # (N, C2)

        # ---- final Linear + ReLU (output lane dim padded to 128) -----------
        out = jnp.dot(pooled.astype(MATMUL_DTYPE), wf_ref[...],
                      preferred_element_type=f32) + bf_ref[...]
        o_ref[...] = jnp.maximum(out, 0.0)

    return kernel


# ------------------------------- JAX glue ---------------------------------- #

def im2col_conv1(x_nhwc, kh, kw, stride):
    """Conv1 im2col (pad=0).  Feature order (i, j, c) matches weight packing."""
    N, H, W, C = x_nhwc.shape
    Ho = (H - kh) // stride + 1
    Wo = (W - kw) // stride + 1
    cols = []
    for i in range(kh):
        for j in range(kw):
            cols.append(x_nhwc[:, i:i + stride * Ho:stride,
                               j:j + stride * Wo:stride, :])
    patches = jnp.concatenate(cols, axis=-1)            # (N, Ho, Wo, kh*kw*C)
    return patches.reshape(N * Ho * Wo, kh * kw * C), Ho, Wo


def cnn_feature_extractor(params, x, output_dim=128):
    """x: (N, C, H, W) float32 -> (N, output_dim) features."""
    N = x.shape[0]
    xh = jnp.transpose(x, (0, 2, 3, 1))                 # single NCHW->NHWC hop
    a1, H1, W1 = im2col_conv1(xh, 8, 8, 4)              # (N*H1*W1, 64*Cin)

    C1 = params["w1"].shape[1]                          # 32
    C2 = params["w2"].shape[1]                          # 64
    K2 = params["w2"].shape[0]                          # 16 * C1
    K3 = params["w3"].shape[0]                          # 9 * C2
    out_pad = params["wf"].shape[1]

    H2 = (H1 + 2 - 4) // 2 + 1
    W2 = (W1 + 2 - 4) // 2 + 1
    H3, W3 = H2, W2                                     # conv3 k3/s1/p1 keeps size

    kernel = _make_fused_kernel(N, H1, W1, H2, W2, H3, W3, C1, C2)
    vmem = pl.BlockSpec(memory_space=pltpu.MemorySpace.VMEM)
    out = pl.pallas_call(
        kernel,
        out_shape=jax.ShapeDtypeStruct((N, out_pad), jnp.float32),
        in_specs=[vmem] * 9,
        out_specs=vmem,
        scratch_shapes=[
            pltpu.VMEM((N, H1 + 2, W1 + 2, C1), jnp.float32),   # padded y1
            pltpu.VMEM((N, H2 + 2, W2 + 2, C2), jnp.float32),   # padded y2
            pltpu.VMEM((N, H2, W2, K2), jnp.float32),           # conv2 im2col
            pltpu.VMEM((N, H3, W3, K3), jnp.float32),           # conv3 im2col
        ],
    )(a1, params["w1"], params["b1"], params["w2"], params["b2"],
      params["w3"], params["b3"], params["wf"], params["bf"])

    if out_pad != output_dim:
        out = out[:, :output_dim]
    return out


# --------------------------- parameter handling ----------------------------- #

def xavier_uniform(key, shape, fan_in, fan_out):
    bound = float(np.sqrt(6.0 / (fan_in + fan_out)))
    return jax.random.uniform(key, shape, jnp.float32, -bound, bound)


def init_raw_params(key, input_channels=1, output_dim=128):
    """Torch-layout parameters (OIHW conv weights, (out, in) Linear weight)."""
    k1, k2, k3, k4, k5 = jax.random.split(key, 5)
    p = {}
    p["w1"] = xavier_uniform(k1, (32, input_channels, 8, 8),
                             input_channels * 64, 32 * 64)
    p["w2"] = xavier_uniform(k2, (64, 32, 4, 4), 32 * 16, 64 * 16)
    p["w3"] = xavier_uniform(k3, (64, 64, 3, 3), 64 * 9, 64 * 9)
    p["wf"] = xavier_uniform(k4, (output_dim, 64), 64, output_dim)
    # The torch module zero-inits biases; small random values here exercise the
    # bias-add path in the correctness check (forward semantics are identical).
    kb1, kb2, kb3, kb4 = jax.random.split(k5, 4)
    p["b1"] = 0.1 * jax.random.normal(kb1, (32,), jnp.float32)
    p["b2"] = 0.1 * jax.random.normal(kb2, (64,), jnp.float32)
    p["b3"] = 0.1 * jax.random.normal(kb3, (64,), jnp.float32)
    p["bf"] = 0.1 * jax.random.normal(kb4, (output_dim,), jnp.float32)
    return p


def _pack_conv_weight(w_oihw):
    """OIHW -> (kh*kw*Cin, Cout) bf16, row order (i, j, cin).  Real Cin (no pad)."""
    Cout, Cin, kh, kw = w_oihw.shape
    w = jnp.transpose(w_oihw, (2, 3, 1, 0))             # (kh, kw, Cin, Cout)
    return w.reshape(kh * kw * Cin, Cout).astype(MATMUL_DTYPE)


def prepare_params(raw):
    """One-time layout packing + bf16 cast (hoisted out of the forward path)."""
    out_dim = raw["wf"].shape[0]
    out_pad = ((out_dim + 127) // 128) * 128
    wf = jnp.pad(raw["wf"].T, ((0, 0), (0, out_pad - out_dim)))   # (64, out_pad)
    return {
        "w1": _pack_conv_weight(raw["w1"]),
        "b1": raw["b1"].reshape(1, -1).astype(jnp.float32),
        "w2": _pack_conv_weight(raw["w2"]),
        "b2": raw["b2"].reshape(1, -1).astype(jnp.float32),
        "w3": _pack_conv_weight(raw["w3"]),
        "b3": raw["b3"].reshape(1, -1).astype(jnp.float32),
        "wf": wf.astype(MATMUL_DTYPE),
        "bf": jnp.pad(raw["bf"], (0, out_pad - out_dim))
                 .reshape(1, out_pad).astype(jnp.float32),
    }


# ------------------------------ reference ----------------------------------- #

def reference_forward(raw, x):
    """Pure-JAX f32 reference (lax.conv on the torch-layout weights)."""
    dn = ("NCHW", "OIHW", "NCHW")
    y = jax.lax.conv_general_dilated(x, raw["w1"], (4, 4), "VALID",
                                     dimension_numbers=dn)
    y = jax.nn.relu(y + raw["b1"][None, :, None, None])
    y = jax.lax.conv_general_dilated(y, raw["w2"], (2, 2), ((1, 1), (1, 1)),
                                     dimension_numbers=dn)
    y = jax.nn.relu(y + raw["b2"][None, :, None, None])
    y = jax.lax.conv_general_dilated(y, raw["w3"], (1, 1), ((1, 1), (1, 1)),
                                     dimension_numbers=dn)
    y = jax.nn.relu(y + raw["b3"][None, :, None, None])
    y = jnp.mean(y, axis=(2, 3))
    return jax.nn.relu(y @ raw["wf"].T + raw["bf"])


if __name__ == "__main__":
    key = jax.random.PRNGKey(0)
    pkey, xkey = jax.random.split(key)
    raw = init_raw_params(pkey, input_channels=1, output_dim=128)
    params = prepare_params(raw)

    # small input consistent with the module: batch=2, channels=1, 32x32 image
    x = jax.random.normal(xkey, (2, 1, 32, 32), jnp.float32)

    fwd = jax.jit(cnn_feature_extractor)
    out = jax.block_until_ready(fwd(params, x))
    assert out.shape == (2, 128), out.shape

    ref = jax.block_until_ready(reference_forward(raw, x))
    # bf16 MXU operands (f32 accumulation) -> looser tolerance than pure f32.
    np.testing.assert_allclose(np.asarray(out), np.asarray(ref),
                               rtol=2e-2, atol=2e-2)

    print("KERNEL_OK")
</pallas_src>

<mosaic_0001>
module attributes {stable_mosaic.version = 11 : i64} {
  func.func @kernel(%arg0: memref<98x64xf32, #tpu.memory_space<vmem>>, %arg1: memref<64x32xbf16, #tpu.memory_space<vmem>>, %arg2: memref<1x32xf32, #tpu.memory_space<vmem>>, %arg3: memref<512x64xbf16, #tpu.memory_space<vmem>>, %arg4: memref<1x64xf32, #tpu.memory_space<vmem>>, %arg5: memref<576x64xbf16, #tpu.memory_space<vmem>>, %arg6: memref<1x64xf32, #tpu.memory_space<vmem>>, %arg7: memref<64x128xbf16, #tpu.memory_space<vmem>>, %arg8: memref<1x128xf32, #tpu.memory_space<vmem>>, %arg9: memref<2x128xf32, #tpu.memory_space<vmem>>, %arg10: memref<2x9x9x32xf32, #tpu.memory_space<vmem>>, %arg11: memref<2x5x5x64xf32, #tpu.memory_space<vmem>>, %arg12: memref<2x3x3x512xf32, #tpu.memory_space<vmem>>, %arg13: memref<2x3x3x576xf32, #tpu.memory_space<vmem>>) attributes {dimension_semantics = [], scalar_prefetch = 0 : i64, scratch_operands = 4 : i64, tpu.core_type = #tpu.core_type<tc>} {
    %c0 = arith.constant 0 : index
    %c0_0 = arith.constant 0 : index
    %0 = vector.load %arg0[%c0, %c0_0] : memref<98x64xf32, #tpu.memory_space<vmem>>, vector<98x64xf32>
    %1 = arith.truncf %0 : vector<98x64xf32> to vector<98x64xbf16>
    %c0_1 = arith.constant 0 : index
    %c0_2 = arith.constant 0 : index
    %2 = vector.load %arg1[%c0_1, %c0_2] : memref<64x32xbf16, #tpu.memory_space<vmem>>, vector<64x32xbf16>
    %cst = arith.constant dense<0.000000e+00> : vector<98x32xf32>
    %3 = tpu.matmul %1, %2, %cst {dimension_numbers = #tpu.dot_dimension_numbers<[1], [0], [0], [1], [0, 0, 1, 1], [], []>} : vector<98x64xbf16>, vector<64x32xbf16>, vector<98x32xf32> -> vector<98x32xf32>
    %c0_3 = arith.constant 0 : index
    %c0_4 = arith.constant 0 : index
    %4 = vector.load %arg2[%c0_3, %c0_4] : memref<1x32xf32, #tpu.memory_space<vmem>>, vector<1x32xf32>
    %5 = vector.broadcast %4 : vector<1x32xf32> to vector<98x32xf32>
    %6 = arith.addf %3, %5 : vector<98x32xf32>
    %cst_5 = arith.constant 0.000000e+00 : f32
    %7 = vector.broadcast %cst_5 : f32 to vector<98x32xf32>
    %8 = arith.maximumf %6, %7 : vector<98x32xf32>
    %cst_6 = arith.constant 0.000000e+00 : f32
    %9 = vector.broadcast %cst_6 : f32 to vector<2x9x9x32xf32>
    %c0_7 = arith.constant 0 : index
    %c0_8 = arith.constant 0 : index
    %c0_9 = arith.constant 0 : index
    %c0_10 = arith.constant 0 : index
    %10 = vector.load %arg10[%c0_7, %c0_8, %c0_9, %c0_10] : memref<2x9x9x32xf32, #tpu.memory_space<vmem>>, vector<2x9x9x32xf32>
    tpu.vector_store %arg10[%c0_7, %c0_8, %c0_9, %c0_10], %9 {strides = array<i32>} : memref<2x9x9x32xf32, #tpu.memory_space<vmem>>, vector<2x9x9x32xf32>,
    %11 = vector.extract_strided_slice %8 {offsets = [0, 0], sizes = [7, 32], strides = [1, 1]} : vector<98x32xf32> to vector<7x32xf32>
    %c0_11 = arith.constant 0 : index
    %c1 = arith.constant 1 : index
    %c1_12 = arith.constant 1 : index
    %c0_13 = arith.constant 0 : index
    %12 = vector.load %arg10[%c0_11, %c1, %c1_12, %c0_13] : memref<2x9x9x32xf32, #tpu.memory_space<vmem>>, vector<1x1x7x32xf32>
    %13 = vector.shape_cast %12 : vector<1x1x7x32xf32> to vector<7x32xf32>
    %14 = vector.shape_cast %11 : vector<7x32xf32> to vector<1x1x7x32xf32>
    tpu.vector_store %arg10[%c0_11, %c1, %c1_12, %c0_13], %14 {strides = array<i32>} : memref<2x9x9x32xf32, #tpu.memory_space<vmem>>, vector<1x1x7x32xf32>,
    %15 = vector.extract_strided_slice %8 {offsets = [7, 0], sizes = [7, 32], strides = [1, 1]} : vector<98x32xf32> to vector<7x32xf32>
    %c0_14 = arith.constant 0 : index
    %c2 = arith.constant 2 : index
    %c1_15 = arith.constant 1 : index
    %c0_16 = arith.constant 0 : index
    %16 = vector.load %arg10[%c0_14, %c2, %c1_15, %c0_16] : memref<2x9x9x32xf32, #tpu.memory_space<vmem>>, vector<1x1x7x32xf32>
    %17 = vector.shape_cast %16 : vector<1x1x7x32xf32> to vector<7x32xf32>
    %18 = vector.shape_cast %15 : vector<7x32xf32> to vector<1x1x7x32xf32>
    tpu.vector_store %arg10[%c0_14, %c2, %c1_15, %c0_16], %18 {strides = array<i32>} : memref<2x9x9x32xf32, #tpu.memory_space<vmem>>, vector<1x1x7x32xf32>,
    %19 = vector.extract_strided_slice %8 {offsets = [14, 0], sizes = [7, 32], strides = [1, 1]} : vector<98x32xf32> to vector<7x32xf32>
    %c0_17 = arith.constant 0 : index
    %c3 = arith.constant 3 : index
    %c1_18 = arith.constant 1 : index
    %c0_19 = arith.constant 0 : index
    %20 = vector.load %arg10[%c0_17, %c3, %c1_18, %c0_19] : memref<2x9x9x32xf32, #tpu.memory_space<vmem>>, vector<1x1x7x32xf32>
    %21 = vector.shape_cast %20 : vector<1x1x7x32xf32> to vector<7x32xf32>
    %22 = vector.shape_cast %19 : vector<7x32xf32> to vector<1x1x7x32xf32>
    tpu.vector_store %arg10[%c0_17, %c3, %c1_18, %c0_19], %22 {strides = array<i32>} : memref<2x9x9x32xf32, #tpu.memory_space<vmem>>, vector<1x1x7x32xf32>,
    %23 = vector.extract_strided_slice %8 {offsets = [21, 0], sizes = [7, 32], strides = [1, 1]} : vector<98x32xf32> to vector<7x32xf32>
    %c0_20 = arith.constant 0 : index
    %c4 = arith.constant 4 : index
    %c1_21 = arith.constant 1 : index
    %c0_22 = arith.constant 0 : index
    %24 = vector.load %arg10[%c0_20, %c4, %c1_21, %c0_22] : memref<2x9x9x32xf32, #tpu.memory_space<vmem>>, vector<1x1x7x32xf32>
    %25 = vector.shape_cast %24 : vector<1x1x7x32xf32> to vector<7x32xf32>
    %26 = vector.shape_cast %23 : vector<7x32xf32> to vector<1x1x7x32xf32>
    tpu.vector_store %arg10[%c0_20, %c4, %c1_21, %c0_22], %26 {strides = array<i32>} : memref<2x9x9x32xf32, #tpu.memory_space<vmem>>, vector<1x1x7x32xf32>,
    %27 = vector.extract_strided_slice %8 {offsets = [28, 0], sizes = [7, 32], strides = [1, 1]} : vector<98x32xf32> to vector<7x32xf32>
    %c0_23 = arith.constant 0 : index
    %c5 = arith.constant 5 : index
    %c1_24 = arith.constant 1 : index
    %c0_25 = arith.constant 0 : index
    %28 = vector.load %arg10[%c0_23, %c5, %c1_24, %c0_25] : memref<2x9x9x32xf32, #tpu.memory_space<vmem>>, vector<1x1x7x32xf32>
    %29 = vector.shape_cast %28 : vector<1x1x7x32xf32> to vector<7x32xf32>
    %30 = vector.shape_cast %27 : vector<7x32xf32> to vector<1x1x7x32xf32>
    tpu.vector_store %arg10[%c0_23, %c5, %c1_24, %c0_25], %30 {strides = array<i32>} : memref<2x9x9x32xf32, #tpu.memory_space<vmem>>, vector<1x1x7x32xf32>,
    %31 = vector.extract_strided_slice %8 {offsets = [35, 0], sizes = [7, 32], strides = [1, 1]} : vector<98x32xf32> to vector<7x32xf32>
    %c0_26 = arith.constant 0 : index
    %c6 = arith.constant 6 : index
    %c1_27 = arith.constant 1 : index
    %c0_28 = arith.constant 0 : index
    %32 = vector.load %arg10[%c0_26, %c6, %c1_27, %c0_28] : memref<2x9x9x32xf32, #tpu.memory_space<vmem>>, vector<1x1x7x32xf32>
    %33 = vector.shape_cast %32 : vector<1x1x7x32xf32> to vector<7x32xf32>
    %34 = vector.shape_cast %31 : vector<7x32xf32> to vector<1x1x7x32xf32>
    tpu.vector_store %arg10[%c0_26, %c6, %c1_27, %c0_28], %34 {strides = array<i32>} : memref<2x9x9x32xf32, #tpu.memory_space<vmem>>, vector<1x1x7x32xf32>,
    %35 = vector.extract_strided_slice %8 {offsets = [42, 0], sizes = [7, 32], strides = [1, 1]} : vector<98x32xf32> to vector<7x32xf32>
    %c0_29 = arith.constant 0 : index
    %c7 = arith.constant 7 : index
    %c1_30 = arith.constant 1 : index
    %c0_31 = arith.constant 0 : index
    %36 = vector.load %arg10[%c0_29, %c7, %c1_30, %c0_31] : memref<2x9x9x32xf32, #tpu.memory_space<vmem>>, vector<1x1x7x32xf32>
    %37 = vector.shape_cast %36 : vector<1x1x7x32xf32> to vector<7x32xf32>
    %38 = vector.shape_cast %35 : vector<7x32xf32> to vector<1x1x7x32xf32>
    tpu.vector_store %arg10[%c0_29, %c7, %c1_30, %c0_31], %38 {strides = array<i32>} : memref<2x9x9x32xf32, #tpu.memory_space<vmem>>, vector<1x1x7x32xf32>,
    %39 = vector.extract_strided_slice %8 {offsets = [49, 0], sizes = [7, 32], strides = [1, 1]} : vector<98x32xf32> to vector<7x32xf32>
    %c1_32 = arith.constant 1 : index
    %c1_33 = arith.constant 1 : index
    %c1_34 = arith.constant 1 : index
    %c0_35 = arith.constant 0 : index
    %40 = vector.load %arg10[%c1_32, %c1_33, %c1_34, %c0_35] : memref<2x9x9x32xf32, #tpu.memory_space<vmem>>, vector<1x1x7x32xf32>
    %41 = vector.shape_cast %40 : vector<1x1x7x32xf32> to vector<7x32xf32>
    %42 = vector.shape_cast %39 : vector<7x32xf32> to vector<1x1x7x32xf32>
    tpu.vector_store %arg10[%c1_32, %c1_33, %c1_34, %c0_35], %42 {strides = array<i32>} : memref<2x9x9x32xf32, #tpu.memory_space<vmem>>, vector<1x1x7x32xf32>,
    %43 = vector.extract_strided_slice %8 {offsets = [56, 0], sizes = [7, 32], strides = [1, 1]} : vector<98x32xf32> to vector<7x32xf32>
    %c1_36 = arith.constant 1 : index
    %c2_37 = arith.constant 2 : index
    %c1_38 = arith.constant 1 : index
    %c0_39 = arith.constant 0 : index
    %44 = vector.load %arg10[%c1_36, %c2_37, %c1_38, %c0_39] : memref<2x9x9x32xf32, #tpu.memory_space<vmem>>, vector<1x1x7x32xf32>
    %45 = vector.shape_cast %44 : vector<1x1x7x32xf32> to vector<7x32xf32>
    %46 = vector.shape_cast %43 : vector<7x32xf32> to vector<1x1x7x32xf32>
    tpu.vector_store %arg10[%c1_36, %c2_37, %c1_38, %c0_39], %46 {strides = array<i32>} : memref<2x9x9x32xf32, #tpu.memory_space<vmem>>, vector<1x1x7x32xf32>,
    %47 = vector.extract_strided_slice %8 {offsets = [63, 0], sizes = [7, 32], strides = [1, 1]} : vector<98x32xf32> to vector<7x32xf32>
    %c1_40 = arith.constant 1 : index
    %c3_41 = arith.constant 3 : index
    %c1_42 = arith.constant 1 : index
    %c0_43 = arith.constant 0 : index
    %48 = vector.load %arg10[%c1_40, %c3_41, %c1_42, %c0_43] : memref<2x9x9x32xf32, #tpu.memory_space<vmem>>, vector<1x1x7x32xf32>
    %49 = vector.shape_cast %48 : vector<1x1x7x32xf32> to vector<7x32xf32>
    %50 = vector.shape_cast %47 : vector<7x32xf32> to vector<1x1x7x32xf32>
    tpu.vector_store %arg10[%c1_40, %c3_41, %c1_42, %c0_43], %50 {strides = array<i32>} : memref<2x9x9x32xf32, #tpu.memory_space<vmem>>, vector<1x1x7x32xf32>,
    %51 = vector.extract_strided_slice %8 {offsets = [70, 0], sizes = [7, 32], strides = [1, 1]} : vector<98x32xf32> to vector<7x32xf32>
    %c1_44 = arith.constant 1 : index
    %c4_45 = arith.constant 4 : index
    %c1_46 = arith.constant 1 : index
    %c0_47 = arith.constant 0 : index
    %52 = vector.load %arg10[%c1_44, %c4_45, %c1_46, %c0_47] : memref<2x9x9x32xf32, #tpu.memory_space<vmem>>, vector<1x1x7x32xf32>
    %53 = vector.shape_cast %52 : vector<1x1x7x32xf32> to vector<7x32xf32>
    %54 = vector.shape_cast %51 : vector<7x32xf32> to vector<1x1x7x32xf32>
    tpu.vector_store %arg10[%c1_44, %c4_45, %c1_46, %c0_47], %54 {strides = array<i32>} : memref<2x9x9x32xf32, #tpu.memory_space<vmem>>, vector<1x1x7x32xf32>,
    %55 = vector.extract_strided_slice %8 {offsets = [77, 0], sizes = [7, 32], strides = [1, 1]} : vector<98x32xf32> to vector<7x32xf32>
    %c1_48 = arith.constant 1 : index
    %c5_49 = arith.constant 5 : index
    %c1_50 = arith.constant 1 : index
    %c0_51 = arith.constant 0 : index
    %56 = vector.load %arg10[%c1_48, %c5_49, %c1_50, %c0_51] : memref<2x9x9x32xf32, #tpu.memory_space<vmem>>, vector<1x1x7x32xf32>
    %57 = vector.shape_cast %56 : vector<1x1x7x32xf32> to vector<7x32xf32>
    %58 = vector.shape_cast %55 : vector<7x32xf32> to vector<1x1x7x32xf32>
    tpu.vector_store %arg10[%c1_48, %c5_49, %c1_50, %c0_51], %58 {strides = array<i32>} : memref<2x9x9x32xf32, #tpu.memory_space<vmem>>, vector<1x1x7x32xf32>,
    %59 = vector.extract_strided_slice %8 {offsets = [84, 0], sizes = [7, 32], strides = [1, 1]} : vector<98x32xf32> to vector<7x32xf32>
    %c1_52 = arith.constant 1 : index
    %c6_53 = arith.constant 6 : index
    %c1_54 = arith.constant 1 : index
    %c0_55 = arith.constant 0 : index
    %60 = vector.load %arg10[%c1_52, %c6_53, %c1_54, %c0_55] : memref<2x9x9x32xf32, #tpu.memory_space<vmem>>, vector<1x1x7x32xf32>
    %61 = vector.shape_cast %60 : vector<1x1x7x32xf32> to vector<7x32xf32>
    %62 = vector.shape_cast %59 : vector<7x32xf32> to vector<1x1x7x32xf32>
    tpu.vector_store %arg10[%c1_52, %c6_53, %c1_54, %c0_55], %62 {strides = array<i32>} : memref<2x9x9x32xf32, #tpu.memory_space<vmem>>, vector<1x1x7x32xf32>,
    %63 = vector.extract_strided_slice %8 {offsets = [91, 0], sizes = [7, 32], strides = [1, 1]} : vector<98x32xf32> to vector<7x32xf32>
    %c1_56 = arith.constant 1 : index
    %c7_57 = arith.constant 7 : index
    %c1_58 = arith.constant 1 : index
    %c0_59 = arith.constant 0 : index
    %64 = vector.load %arg10[%c1_56, %c7_57, %c1_58, %c0_59] : memref<2x9x9x32xf32, #tpu.memory_space<vmem>>, vector<1x1x7x32xf32>
    %65 = vector.shape_cast %64 : vector<1x1x7x32xf32> to vector<7x32xf32>
    %66 = vector.shape_cast %63 : vector<7x32xf32> to vector<1x1x7x32xf32>
    tpu.vector_store %arg10[%c1_56, %c7_57, %c1_58, %c0_59], %66 {strides = array<i32>} : memref<2x9x9x32xf32, #tpu.memory_space<vmem>>, vector<1x1x7x32xf32>,
    %cst_60 = arith.constant 0.000000e+00 : f32
    %67 = vector.broadcast %cst_60 : f32 to vector<2x5x5x64xf32>
    %c0_61 = arith.constant 0 : index
    %c0_62 = arith.constant 0 : index
    %c0_63 = arith.constant 0 : index
    %c0_64 = arith.constant 0 : index
    %68 = vector.load %arg11[%c0_61, %c0_62, %c0_63, %c0_64] : memref<2x5x5x64xf32, #tpu.memory_space<vmem>>, vector<2x5x5x64xf32>
    tpu.vector_store %arg11[%c0_61, %c0_62, %c0_63, %c0_64], %67 {strides = array<i32>} : memref<2x5x5x64xf32, #tpu.memory_space<vmem>>, vector<2x5x5x64xf32>,
    %c0_65 = arith.constant 0 : index
    %c0_66 = arith.constant 0 : index
    %c0_67 = arith.constant 0 : index
    %c0_68 = arith.constant 0 : index
    %69 = vector.load %arg10[%c0_65, %c0_66, %c0_67, %c0_68] : memref<2x9x9x32xf32, #tpu.memory_space<vmem>>, vector<2x1x9x32xf32>
    %70 = vector.shape_cast %69 : vector<2x1x9x32xf32> to vector<2x9x32xf32>
    %71 = vector.extract_strided_slice %70 {offsets = [0, 0, 0], sizes = [2, 1, 32], strides = [1, 1, 1]} : vector<2x9x32xf32> to vector<2x1x32xf32>
    %72 = vector.extract_strided_slice %70 {offsets = [0, 2, 0], sizes = [2, 1, 32], strides = [1, 1, 1]} : vector<2x9x32xf32> to vector<2x1x32xf32>
    %73 = vector.extract_strided_slice %70 {offsets = [0, 4, 0], sizes = [2, 1, 32], strides = [1, 1, 1]} : vector<2x9x32xf32> to vector<2x1x32xf32>
    %74 = tpu.concatenate %71, %72, %73 in 1 : vector<2x1x32xf32>, vector<2x1x32xf32>, vector<2x1x32xf32> -> vector<2x3x32xf32>
    %c0_69 = arith.constant 0 : index
    %c0_70 = arith.constant 0 : index
    %c0_71 = arith.constant 0 : index
    %c0_72 = arith.constant 0 : index
    %75 = vector.load %arg12[%c0_69, %c0_70, %c0_71, %c0_72] : memref<2x3x3x512xf32, #tpu.memory_space<vmem>>, vector<2x1x3x32xf32>
    %76 = vector.shape_cast %75 : vector<2x1x3x32xf32> to vector<2x3x32xf32>
    %77 = vector.shape_cast %74 : vector<2x3x32xf32> to vector<2x1x3x32xf32>
    tpu.vector_store %arg12[%c0_69, %c0_70, %c0_71, %c0_72], %77 {strides = array<i32>} : memref<2x3x3x512xf32, #tpu.memory_space<vmem>>, vector<2x1x3x32xf32>,
    %78 = vector.extract_strided_slice %70 {offsets = [0, 1, 0], sizes = [2, 1, 32], strides = [1, 1, 1]} : vector<2x9x32xf32> to vector<2x1x32xf32>
    %79 = vector.extract_strided_slice %70 {offsets = [0, 3, 0], sizes = [2, 1, 32], strides = [1, 1, 1]} : vector<2x9x32xf32> to vector<2x1x32xf32>
    %80 = vector.extract_strided_slice %70 {offsets = [0, 5, 0], sizes = [2, 1, 32], strides = [1, 1, 1]} : vector<2x9x32xf32> to vector<2x1x32xf32>
    %81 = tpu.concatenate %78, %79, %80 in 1 : vector<2x1x32xf32>, vector<2x1x32xf32>, vector<2x1x32xf32> -> vector<2x3x32xf32>
    %c0_73 = arith.constant 0 : index
    %c0_74 = arith.constant 0 : index
    %c0_75 = arith.constant 0 : index
    %c32 = arith.constant 32 : index
    %82 = vector.load %arg12[%c0_73, %c0_74, %c0_75, %c32] : memref<2x3x3x512xf32, #tpu.memory_space<vmem>>, vector<2x1x3x32xf32>
    %83 = vector.shape_cast %82 : vector<2x1x3x32xf32> to vector<2x3x32xf32>
    %84 = vector.shape_cast %81 : vector<2x3x32xf32> to vector<2x1x3x32xf32>
    tpu.vector_store %arg12[%c0_73, %c0_74, %c0_75, %c32], %84 {strides = array<i32>} : memref<2x3x3x512xf32, #tpu.memory_space<vmem>>, vector<2x1x3x32xf32>,
    %85 = vector.extract_strided_slice %70 {offsets = [0, 2, 0], sizes = [2, 1, 32], strides = [1, 1, 1]} : vector<2x9x32xf32> to vector<2x1x32xf32>
    %86 = vector.extract_strided_slice %70 {offsets = [0, 4, 0], sizes = [2, 1, 32], strides = [1, 1, 1]} : vector<2x9x32xf32> to vector<2x1x32xf32>
    %87 = vector.extract_strided_slice %70 {offsets = [0, 6, 0], sizes = [2, 1, 32], strides = [1, 1, 1]} : vector<2x9x32xf32> to vector<2x1x32xf32>
    %88 = tpu.concatenate %85, %86, %87 in 1 : vector<2x1x32xf32>, vector<2x1x32xf32>, vector<2x1x32xf32> -> vector<2x3x32xf32>
    %c0_76 = arith.constant 0 : index
    %c0_77 = arith.constant 0 : index
    %c0_78 = arith.constant 0 : index
    %c64 = arith.constant 64 : index
    %89 = vector.load %arg12[%c0_76, %c0_77, %c0_78, %c64] : memref<2x3x3x512xf32, #tpu.memory_space<vmem>>, vector<2x1x3x32xf32>
    %90 = vector.shape_cast %89 : vector<2x1x3x32xf32> to vector<2x3x32xf32>
    %91 = vector.shape_cast %88 : vector<2x3x32xf32> to vector<2x1x3x32xf32>
    tpu.vector_store %arg12[%c0_76, %c0_77, %c0_78, %c64], %91 {strides = array<i32>} : memref<2x3x3x512xf32, #tpu.memory_space<vmem>>, vector<2x1x3x32xf32>,
    %92 = vector.extract_strided_slice %70 {offsets = [0, 3, 0], sizes = [2, 1, 32], strides = [1, 1, 1]} : vector<2x9x32xf32> to vector<2x1x32xf32>
    %93 = vector.extract_strided_slice %70 {offsets = [0, 5, 0], sizes = [2, 1, 32], strides = [1, 1, 1]} : vector<2x9x32xf32> to vector<2x1x32xf32>
    %94 = vector.extract_strided_slice %70 {offsets = [0, 7, 0], sizes = [2, 1, 32], strides = [1, 1, 1]} : vector<2x9x32xf32> to vector<2x1x32xf32>
    %95 = tpu.concatenate %92, %93, %94 in 1 : vector<2x1x32xf32>, vector<2x1x32xf32>, vector<2x1x32xf32> -> vector<2x3x32xf32>
    %c0_79 = arith.constant 0 : index
    %c0_80 = arith.constant 0 : index
    %c0_81 = arith.constant 0 : index
    %c96 = arith.constant 96 : index
    %96 = vector.load %arg12[%c0_79, %c0_80, %c0_81, %c96] : memref<2x3x3x512xf32, #tpu.memory_space<vmem>>, vector<2x1x3x32xf32>
    %97 = vector.shape_cast %96 : vector<2x1x3x32xf32> to vector<2x3x32xf32>
    %98 = vector.shape_cast %95 : vector<2x3x32xf32> to vector<2x1x3x32xf32>
    tpu.vector_store %arg12[%c0_79, %c0_80, %c0_81, %c96], %98 {strides = array<i32>} : memref<2x3x3x512xf32, #tpu.memory_space<vmem>>, vector<2x1x3x32xf32>,
    %c0_82 = arith.constant 0 : index
    %c1_83 = arith.constant 1 : index
    %c0_84 = arith.constant 0 : index
    %c0_85 = arith.constant 0 : index
    %99 = vector.load %arg10[%c0_82, %c1_83, %c0_84, %c0_85] : memref<2x9x9x32xf32, #tpu.memory_space<vmem>>, vector<2x1x9x32xf32>
    %100 = vector.shape_cast %99 : vector<2x1x9x32xf32> to vector<2x9x32xf32>
    %101 = vector.extract_strided_slice %100 {offsets = [0, 0, 0], sizes = [2, 1, 32], strides = [1, 1, 1]} : vector<2x9x32xf32> to vector<2x1x32xf32>
    %102 = vector.extract_strided_slice %100 {offsets = [0, 2, 0], sizes = [2, 1, 32], strides = [1, 1, 1]} : vector<2x9x32xf32> to vector<2x1x32xf32>
    %103 = vector.extract_strided_slice %100 {offsets = [0, 4, 0], sizes = [2, 1, 32], strides = [1, 1, 1]} : vector<2x9x32xf32> to vector<2x1x32xf32>
    %104 = tpu.concatenate %101, %102, %103 in 1 : vector<2x1x32xf32>, vector<2x1x32xf32>, vector<2x1x32xf32> -> vector<2x3x32xf32>
    %c0_86 = arith.constant 0 : index
    %c0_87 = arith.constant 0 : index
    %c0_88 = arith.constant 0 : index
    %c128 = arith.constant 128 : index
    %105 = vector.load %arg12[%c0_86, %c0_87, %c0_88, %c128] : memref<2x3x3x512xf32, #tpu.memory_space<vmem>>, vector<2x1x3x32xf32>
    %106 = vector.shape_cast %105 : vector<2x1x3x32xf32> to vector<2x3x32xf32>
    %107 = vector.shape_cast %104 : vector<2x3x32xf32> to vector<2x1x3x32xf32>
    tpu.vector_store %arg12[%c0_86, %c0_87, %c0_88, %c128], %107 {strides = array<i32>} : memref<2x3x3x512xf32, #tpu.memory_space<vmem>>, vector<2x1x3x32xf32>,
    %108 = vector.extract_strided_slice %100 {offsets = [0, 1, 0], sizes = [2, 1, 32], strides = [1, 1, 1]} : vector<2x9x32xf32> to vector<2x1x32xf32>
    %109 = vector.extract_strided_slice %100 {offsets = [0, 3, 0], sizes = [2, 1, 32], strides = [1, 1, 1]} : vector<2x9x32xf32> to vector<2x1x32xf32>
    %110 = vector.extract_strided_slice %100 {offsets = [0, 5, 0], sizes = [2, 1, 32], strides = [1, 1, 1]} : vector<2x9x32xf32> to vector<2x1x32xf32>
    %111 = tpu.concatenate %108, %109, %110 in 1 : vector<2x1x32xf32>, vector<2x1x32xf32>, vector<2x1x32xf32> -> vector<2x3x32xf32>
    %c0_89 = arith.constant 0 : index
    %c0_90 = arith.constant 0 : index
    %c0_91 = arith.constant 0 : index
    %c160 = arith.constant 160 : index
    %112 = vector.load %arg12[%c0_89, %c0_90, %c0_91, %c160] : memref<2x3x3x512xf32, #tpu.memory_space<vmem>>, vector<2x1x3x32xf32>
    %113 = vector.shape_cast %112 : vector<2x1x3x32xf32> to vector<2x3x32xf32>
    %114 = vector.shape_cast %111 : vector<2x3x32xf32> to vector<2x1x3x32xf32>
    tpu.vector_store %arg12[%c0_89, %c0_90, %c0_91, %c160], %114 {strides = array<i32>} : memref<2x3x3x512xf32, #tpu.memory_space<vmem>>, vector<2x1x3x32xf32>,
    %115 = vector.extract_strided_slice %100 {offsets = [0, 2, 0], sizes = [2, 1, 32], strides = [1, 1, 1]} : vector<2x9x32xf32> to vector<2x1x32xf32>
    %116 = vector.extract_strided_slice %100 {offsets = [0, 4, 0], sizes = [2, 1, 32], strides = [1, 1, 1]} : vector<2x9x32xf32> to vector<2x1x32xf32>
    %117 = vector.extract_strided_slice %100 {offsets = [0, 6, 0], sizes = [2, 1, 32], strides = [1, 1, 1]} : vector<2x9x32xf32> to vector<2x1x32xf32>
    %118 = tpu.concatenate %115, %116, %117 in 1 : vector<2x1x32xf32>, vector<2x1x32xf32>, vector<2x1x32xf32> -> vector<2x3x32xf32>
    %c0_92 = arith.constant 0 : index
    %c0_93 = arith.constant 0 : index
    %c0_94 = arith.constant 0 : index
    %c192 = arith.constant 192 : index
    %119 = vector.load %arg12[%c0_92, %c0_93, %c0_94, %c192] : memref<2x3x3x512xf32, #tpu.memory_space<vmem>>, vector<2x1x3x32xf32>
    %120 = vector.shape_cast %119 : vector<2x1x3x32xf32> to vector<2x3x32xf32>
    %121 = vector.shape_cast %118 : vector<2x3x32xf32> to vector<2x1x3x32xf32>
    tpu.vector_store %arg12[%c0_92, %c0_93, %c0_94, %c192], %121 {strides = array<i32>} : memref<2x3x3x512xf32, #tpu.memory_space<vmem>>, vector<2x1x3x32xf32>,
    %122 = vector.extract_strided_slice %100 {offsets = [0, 3, 0], sizes = [2, 1, 32], strides = [1, 1, 1]} : vector<2x9x32xf32> to vector<2x1x32xf32>
    %123 = vector.extract_strided_slice %100 {offsets = [0, 5, 0], sizes = [2, 1, 32], strides = [1, 1, 1]} : vector<2x9x32xf32> to vector<2x1x32xf32>
    %124 = vector.extract_strided_slice %100 {offsets = [0, 7, 0], sizes = [2, 1, 32], strides = [1, 1, 1]} : vector<2x9x32xf32> to vector<2x1x32xf32>
    %125 = tpu.concatenate %122, %123, %124 in 1 : vector<2x1x32xf32>, vector<2x1x32xf32>, vector<2x1x32xf32> -> vector<2x3x32xf32>
    %c0_95 = arith.constant 0 : index
    %c0_96 = arith.constant 0 : index
    %c0_97 = arith.constant 0 : index
    %c224 = arith.constant 224 : index
    %126 = vector.load %arg12[%c0_95, %c0_96, %c0_97, %c224] : memref<2x3x3x512xf32, #tpu.memory_space<vmem>>, vector<2x1x3x32xf32>
    %127 = vector.shape_cast %126 : vector<2x1x3x32xf32> to vector<2x3x32xf32>
    %128 = vector.shape_cast %125 : vector<2x3x32xf32> to vector<2x1x3x32xf32>
    tpu.vector_store %arg12[%c0_95, %c0_96, %c0_97, %c224], %128 {strides = array<i32>} : memref<2x3x3x512xf32, #tpu.memory_space<vmem>>, vector<2x1x3x32xf32>,
    %c0_98 = arith.constant 0 : index
    %c2_99 = arith.constant 2 : index
    %c0_100 = arith.constant 0 : index
    %c0_101 = arith.constant 0 : index
    %129 = vector.load %arg10[%c0_98, %c2_99, %c0_100, %c0_101] : memref<2x9x9x32xf32, #tpu.memory_space<vmem>>, vector<2x1x9x32xf32>
    %130 = vector.shape_cast %129 : vector<2x1x9x32xf32> to vector<2x9x32xf32>
    %131 = vector.extract_strided_slice %130 {offsets = [0, 0, 0], sizes = [2, 1, 32], strides = [1, 1, 1]} : vector<2x9x32xf32> to vector<2x1x32xf32>
    %132 = vector.extract_strided_slice %130 {offsets = [0, 2, 0], sizes = [2, 1, 32], strides = [1, 1, 1]} : vector<2x9x32xf32> to vector<2x1x32xf32>
    %133 = vector.extract_strided_slice %130 {offsets = [0, 4, 0], sizes = [2, 1, 32], strides = [1, 1, 1]} : vector<2x9x32xf32> to vector<2x1x32xf32>
    %134 = tpu.concatenate %131, %132, %133 in 1 : vector<2x1x32xf32>, vector<2x1x32xf32>, vector<2x1x32xf32> -> vector<2x3x32xf32>
    %c0_102 = arith.constant 0 : index
    %c0_103 = arith.constant 0 : index
    %c0_104 = arith.constant 0 : index
    %c256 = arith.constant 256 : index
    %135 = vector.load %arg12[%c0_102, %c0_103, %c0_104, %c256] : memref<2x3x3x512xf32, #tpu.memory_space<vmem>>, vector<2x1x3x32xf32>
    %136 = vector.shape_cast %135 : vector<2x1x3x32xf32> to vector<2x3x32xf32>
    %137 = vector.shape_cast %134 : vector<2x3x32xf32> to vector<2x1x3x32xf32>
    tpu.vector_store %arg12[%c0_102, %c0_103, %c0_104, %c256], %137 {strides = array<i32>} : memref<2x3x3x512xf32, #tpu.memory_space<vmem>>, vector<2x1x3x32xf32>,
    %138 = vector.extract_strided_slice %130 {offsets = [0, 1, 0], sizes = [2, 1, 32], strides = [1, 1, 1]} : vector<2x9x32xf32> to vector<2x1x32xf32>
    %139 = vector.extract_strided_slice %130 {offsets = [0, 3, 0], sizes = [2, 1, 32], strides = [1, 1, 1]} : vector<2x9x32xf32> to vector<2x1x32xf32>
    %140 = vector.extract_strided_slice %130 {offsets = [0, 5, 0], sizes = [2, 1, 32], strides = [1, 1, 1]} : vector<2x9x32xf32> to vector<2x1x32xf32>
    %141 = tpu.concatenate %138, %139, %140 in 1 : vector<2x1x32xf32>, vector<2x1x32xf32>, vector<2x1x32xf32> -> vector<2x3x32xf32>
    %c0_105 = arith.constant 0 : index
    %c0_106 = arith.constant 0 : index
    %c0_107 = arith.constant 0 : index
    %c288 = arith.constant 288 : index
    %142 = vector.load %arg12[%c0_105, %c0_106, %c0_107, %c288] : memref<2x3x3x512xf32, #tpu.memory_space<vmem>>, vector<2x1x3x32xf32>
    %143 = vector.shape_cast %142 : vector<2x1x3x32xf32> to vector<2x3x32xf32>
    %144 = vector.shape_cast %141 : vector<2x3x32xf32> to vector<2x1x3x32xf32>
    tpu.vector_store %arg12[%c0_105, %c0_106, %c0_107, %c288], %144 {strides = array<i32>} : memref<2x3x3x512xf32, #tpu.memory_space<vmem>>, vector<2x1x3x32xf32>,
    %145 = vector.extract_strided_slice %130 {offsets = [0, 2, 0], sizes = [2, 1, 32], strides = [1, 1, 1]} : vector<2x9x32xf32> to vector<2x1x32xf32>
    %146 = vector.extract_strided_slice %130 {offsets = [0, 4, 0], sizes = [2, 1, 32], strides = [1, 1, 1]} : vector<2x9x32xf32> to vector<2x1x32xf32>
    %147 = vector.extract_strided_slice %130 {offsets = [0, 6, 0], sizes = [2, 1, 32], strides = [1, 1, 1]} : vector<2x9x32xf32> to vector<2x1x32xf32>
    %148 = tpu.concatenate %145, %146, %147 in 1 : vector<2x1x32xf32>, vector<2x1x32xf32>, vector<2x1x32xf32> -> vector<2x3x32xf32>
    %c0_108 = arith.constant 0 : index
    %c0_109 = arith.constant 0 : index
    %c0_110 = arith.constant 0 : index
    %c320 = arith.constant 320 : index
    %149 = vector.load %arg12[%c0_108, %c0_109, %c0_110, %c320] : memref<2x3x3x512xf32, #tpu.memory_space<vmem>>, vector<2x1x3x32xf32>
    %150 = vector.shape_cast %149 : vector<2x1x3x32xf32> to vector<2x3x32xf32>
    %151 = vector.shape_cast %148 : vector<2x3x32xf32> to vector<2x1x3x32xf32>
    tpu.vector_store %arg12[%c0_108, %c0_109, %c0_110, %c320], %151 {strides = array<i32>} : memref<2x3x3x512xf32, #tpu.memory_space<vmem>>, vector<2x1x3x32xf32>,
    %152 = vector.extract_strided_slice %130 {offsets = [0, 3, 0], sizes = [2, 1, 32], strides = [1, 1, 1]} : vector<2x9x32xf32> to vector<2x1x32xf32>
    %153 = vector.extract_strided_slice %130 {offsets = [0, 5, 0], sizes = [2, 1, 32], strides = [1, 1, 1]} : vector<2x9x32xf32> to vector<2x1x32xf32>
    %154 = vector.extract_strided_slice %130 {offsets = [0, 7, 0], sizes = [2, 1, 32], strides = [1, 1, 1]} : vector<2x9x32xf32> to vector<2x1x32xf32>
    %155 = tpu.concatenate %152, %153, %154 in 1 : vector<2x1x32xf32>, vector<2x1x32xf32>, vector<2x1x32xf32> -> vector<2x3x32xf32>
    %c0_111 = arith.constant 0 : index
    %c0_112 = arith.constant 0 : index
    %c0_113 = arith.constant 0 : index
    %c352 = arith.constant 352 : index
    %156 = vector.load %arg12[%c0_111, %c0_112, %c0_113, %c352] : memref<2x3x3x512xf32, #tpu.memory_space<vmem>>, vector<2x1x3x32xf32>
    %157 = vector.shape_cast %156 : vector<2x1x3x32xf32> to vector<2x3x32xf32>
    %158 = vector.shape_cast %155 : vector<2x3x32xf32> to vector<2x1x3x32xf32>
    tpu.vector_store %arg12[%c0_111, %c0_112, %c0_113, %c352], %158 {strides = array<i32>} : memref<2x3x3x512xf32, #tpu.memory_space<vmem>>, vector<2x1x3x32xf32>,
    %c0_114 = arith.constant 0 : index
    %c3_115 = arith.constant 3 : index
    %c0_116 = arith.constant 0 : index
    %c0_117 = arith.constant 0 : index
    %159 = vector.load %arg10[%c0_114, %c3_115, %c0_116, %c0_117] : memref<2x9x9x32xf32, #tpu.memory_space<vmem>>, vector<2x1x9x32xf32>
    %160 = vector.shape_cast %159 : vector<2x1x9x32xf32> to vector<2x9x32xf32>
    %161 = vector.extract_strided_slice %160 {offsets = [0, 0, 0], sizes = [2, 1, 32], strides = [1, 1, 1]} : vector<2x9x32xf32> to vector<2x1x32xf32>
    %162 = vector.extract_strided_slice %160 {offsets = [0, 2, 0], sizes = [2, 1, 32], strides = [1, 1, 1]} : vector<2x9x32xf32> to vector<2x1x32xf32>
    %163 = vector.extract_strided_slice %160 {offsets = [0, 4, 0], sizes = [2, 1, 32], strides = [1, 1, 1]} : vector<2x9x32xf32> to vector<2x1x32xf32>
    %164 = tpu.concatenate %161, %162, %163 in 1 : vector<2x1x32xf32>, vector<2x1x32xf32>, vector<2x1x32xf32> -> vector<2x3x32xf32>
    %c0_118 = arith.constant 0 : index
    %c0_119 = arith.constant 0 : index
    %c0_120 = arith.constant 0 : index
    %c384 = arith.constant 384 : index
    %165 = vector.load %arg12[%c0_118, %c0_119, %c0_120, %c384] : memref<2x3x3x512xf32, #tpu.memory_space<vmem>>, vector<2x1x3x32xf32>
    %166 = vector.shape_cast %165 : vector<2x1x3x32xf32> to vector<2x3x32xf32>
    %167 = vector.shape_cast %164 : vector<2x3x32xf32> to vector<2x1x3x32xf32>
    tpu.vector_store %arg12[%c0_118, %c0_119, %c0_120, %c384], %167 {strides = array<i32>} : memref<2x3x3x512xf32, #tpu.memory_space<vmem>>, vector<2x1x3x32xf32>,
    %168 = vector.extract_strided_slice %160 {offsets = [0, 1, 0], sizes = [2, 1, 32], strides = [1, 1, 1]} : vector<2x9x32xf32> to vector<2x1x32xf32>
    %169 = vector.extract_strided_slice %160 {offsets = [0, 3, 0], sizes = [2, 1, 32], strides = [1, 1, 1]} : vector<2x9x32xf32> to vector<2x1x32xf32>
    %170 = vector.extract_strided_slice %160 {offsets = [0, 5, 0], sizes = [2, 1, 32], strides = [1, 1, 1]} : vector<2x9x32xf32> to vector<2x1x32xf32>
    %171 = tpu.concatenate %168, %169, %170 in 1 : vector<2x1x32xf32>, vector<2x1x32xf32>, vector<2x1x32xf32> -> vector<2x3x32xf32>
    %c0_121 = arith.constant 0 : index
    %c0_122 = arith.constant 0 : index
    %c0_123 = arith.constant 0 : index
    %c416 = arith.constant 416 : index
    %172 = vector.load %arg12[%c0_121, %c0_122, %c0_123, %c416] : memref<2x3x3x512xf32, #tpu.memory_space<vmem>>, vector<2x1x3x32xf32>
    %173 = vector.shape_cast %172 : vector<2x1x3x32xf32> to vector<2x3x32xf32>
    %174 = vector.shape_cast %171 : vector<2x3x32xf32> to vector<2x1x3x32xf32>
    tpu.vector_store %arg12[%c0_121, %c0_122, %c0_123, %c416], %174 {strides = array<i32>} : memref<2x3x3x512xf32, #tpu.memory_space<vmem>>, vector<2x1x3x32xf32>,
    %175 = vector.extract_strided_slice %160 {offsets = [0, 2, 0], sizes = [2, 1, 32], strides = [1, 1, 1]} : vector<2x9x32xf32> to vector<2x1x32xf32>
    %176 = vector.extract_strided_slice %160 {offsets = [0, 4, 0], sizes = [2, 1, 32], strides = [1, 1, 1]} : vector<2x9x32xf32> to vector<2x1x32xf32>
    %177 = vector.extract_strided_slice %160 {offsets = [0, 6, 0], sizes = [2, 1, 32], strides = [1, 1, 1]} : vector<2x9x32xf32> to vector<2x1x32xf32>
    %178 = tpu.concatenate %175, %176, %177 in 1 : vector<2x1x32xf32>, vector<2x1x32xf32>, vector<2x1x32xf32> -> vector<2x3x32xf32>
    %c0_124 = arith.constant 0 : index
    %c0_125 = arith.constant 0 : index
    %c0_126 = arith.constant 0 : index
    %c448 = arith.constant 448 : index
    %179 = vector.load %arg12[%c0_124, %c0_125, %c0_126, %c448] : memref<2x3x3x512xf32, #tpu.memory_space<vmem>>, vector<2x1x3x32xf32>
    %180 = vector.shape_cast %179 : vector<2x1x3x32xf32> to vector<2x3x32xf32>
    %181 = vector.shape_cast %178 : vector<2x3x32xf32> to vector<2x1x3x32xf32>
    tpu.vector_store %arg12[%c0_124, %c0_125, %c0_126, %c448], %181 {strides = array<i32>} : memref<2x3x3x512xf32, #tpu.memory_space<vmem>>, vector<2x1x3x32xf32>,
    %182 = vector.extract_strided_slice %160 {offsets = [0, 3, 0], sizes = [2, 1, 32], strides = [1, 1, 1]} : vector<2x9x32xf32> to vector<2x1x32xf32>
    %183 = vector.extract_strided_slice %160 {offsets = [0, 5, 0], sizes = [2, 1, 32], strides = [1, 1, 1]} : vector<2x9x32xf32> to vector<2x1x32xf32>
    %184 = vector.extract_strided_slice %160 {offsets = [0, 7, 0], sizes = [2, 1, 32], strides = [1, 1, 1]} : vector<2x9x32xf32> to vector<2x1x32xf32>
    %185 = tpu.concatenate %182, %183, %184 in 1 : vector<2x1x32xf32>, vector<2x1x32xf32>, vector<2x1x32xf32> -> vector<2x3x32xf32>
    %c0_127 = arith.constant 0 : index
    %c0_128 = arith.constant 0 : index
    %c0_129 = arith.constant 0 : index
    %c480 = arith.constant 480 : index
    %186 = vector.load %arg12[%c0_127, %c0_128, %c0_129, %c480] : memref<2x3x3x512xf32, #tpu.memory_space<vmem>>, vector<2x1x3x32xf32>
    %187 = vector.shape_cast %186 : vector<2x1x3x32xf32> to vector<2x3x32xf32>
    %188 = vector.shape_cast %185 : vector<2x3x32xf32> to vector<2x1x3x32xf32>
    tpu.vector_store %arg12[%c0_127, %c0_128, %c0_129, %c480], %188 {strides = array<i32>} : memref<2x3x3x512xf32, #tpu.memory_space<vmem>>, vector<2x1x3x32xf32>,
    %c0_130 = arith.constant 0 : index
    %c2_131 = arith.constant 2 : index
    %c0_132 = arith.constant 0 : index
    %c0_133 = arith.constant 0 : index
    %189 = vector.load %arg10[%c0_130, %c2_131, %c0_132, %c0_133] : memref<2x9x9x32xf32, #tpu.memory_space<vmem>>, vector<2x1x9x32xf32>
    %190 = vector.shape_cast %189 : vector<2x1x9x32xf32> to vector<2x9x32xf32>
    %191 = vector.extract_strided_slice %190 {offsets = [0, 0, 0], sizes = [2, 1, 32], strides = [1, 1, 1]} : vector<2x9x32xf32> to vector<2x1x32xf32>
    %192 = vector.extract_strided_slice %190 {offsets = [0, 2, 0], sizes = [2, 1, 32], strides = [1, 1, 1]} : vector<2x9x32xf32> to vector<2x1x32xf32>
    %193 = vector.extract_strided_slice %190 {offsets = [0, 4, 0], sizes = [2, 1, 32], strides = [1, 1, 1]} : vector<2x9x32xf32> to vector<2x1x32xf32>
    %194 = tpu.concatenate %191, %192, %193 in 1 : vector<2x1x32xf32>, vector<2x1x32xf32>, vector<2x1x32xf32> -> vector<2x3x32xf32>
    %c0_134 = arith.constant 0 : index
    %c1_135 = arith.constant 1 : index
    %c0_136 = arith.constant 0 : index
    %c0_137 = arith.constant 0 : index
    %195 = vector.load %arg12[%c0_134, %c1_135, %c0_136, %c0_137] : memref<2x3x3x512xf32, #tpu.memory_space<vmem>>, vector<2x1x3x32xf32>
    %196 = vector.shape_cast %195 : vector<2x1x3x32xf32> to vector<2x3x32xf32>
    %197 = vector.shape_cast %194 : vector<2x3x32xf32> to vector<2x1x3x32xf32>
    tpu.vector_store %arg12[%c0_134, %c1_135, %c0_136, %c0_137], %197 {strides = array<i32>} : memref<2x3x3x512xf32, #tpu.memory_space<vmem>>, vector<2x1x3x32xf32>,
    %198 = vector.extract_strided_slice %190 {offsets = [0, 1, 0], sizes = [2, 1, 32], strides = [1, 1, 1]} : vector<2x9x32xf32> to vector<2x1x32xf32>
    %199 = vector.extract_strided_slice %190 {offsets = [0, 3, 0], sizes = [2, 1, 32], strides = [1, 1, 1]} : vector<2x9x32xf32> to vector<2x1x32xf32>
    %200 = vector.extract_strided_slice %190 {offsets = [0, 5, 0], sizes = [2, 1, 32], strides = [1, 1, 1]} : vector<2x9x32xf32> to vector<2x1x32xf32>
    %201 = tpu.concatenate %198, %199, %200 in 1 : vector<2x1x32xf32>, vector<2x1x32xf32>, vector<2x1x32xf32> -> vector<2x3x32xf32>
    %c0_138 = arith.constant 0 : index
    %c1_139 = arith.constant 1 : index
    %c0_140 = arith.constant 0 : index
    %c32_141 = arith.constant 32 : index
    %202 = vector.load %arg12[%c0_138, %c1_139, %c0_140, %c32_141] : memref<2x3x3x512xf32, #tpu.memory_space<vmem>>, vector<2x1x3x32xf32>
    %203 = vector.shape_cast %202 : vector<2x1x3x32xf32> to vector<2x3x32xf32>
    %204 = vector.shape_cast %201 : vector<2x3x32xf32> to vector<2x1x3x32xf32>
    tpu.vector_store %arg12[%c0_138, %c1_139, %c0_140, %c32_141], %204 {strides = array<i32>} : memref<2x3x3x512xf32, #tpu.memory_space<vmem>>, vector<2x1x3x32xf32>,
    %205 = vector.extract_strided_slice %190 {offsets = [0, 2, 0], sizes = [2, 1, 32], strides = [1, 1, 1]} : vector<2x9x32xf32> to vector<2x1x32xf32>
    %206 = vector.extract_strided_slice %190 {offsets = [0, 4, 0], sizes = [2, 1, 32], strides = [1, 1, 1]} : vector<2x9x32xf32> to vector<2x1x32xf32>
    %207 = vector.extract_strided_slice %190 {offsets = [0, 6, 0], sizes = [2, 1, 32], strides = [1, 1, 1]} : vector<2x9x32xf32> to vector<2x1x32xf32>
    %208 = tpu.concatenate %205, %206, %207 in 1 : vector<2x1x32xf32>, vector<2x1x32xf32>, vector<2x1x32xf32> -> vector<2x3x32xf32>
    %c0_142 = arith.constant 0 : index
    %c1_143 = arith.constant 1 : index
    %c0_144 = arith.constant 0 : index
    %c64_145 = arith.constant 64 : index
    %209 = vector.load %arg12[%c0_142, %c1_143, %c0_144, %c64_145] : memref<2x3x3x512xf32, #tpu.memory_space<vmem>>, vector<2x1x3x32xf32>
    %210 = vector.shape_cast %209 : vector<2x1x3x32xf32> to vector<2x3x32xf32>
    %211 = vector.shape_cast %208 : vector<2x3x32xf32> to vector<2x1x3x32xf32>
    tpu.vector_store %arg12[%c0_142, %c1_143, %c0_144, %c64_145], %211 {strides = array<i32>} : memref<2x3x3x512xf32, #tpu.memory_space<vmem>>, vector<2x1x3x32xf32>,
    %212 = vector.extract_strided_slice %190 {offsets = [0, 3, 0], sizes = [2, 1, 32], strides = [1, 1, 1]} : vector<2x9x32xf32> to vector<2x1x32xf32>
    %213 = vector.extract_strided_slice %190 {offsets = [0, 5, 0], sizes = [2, 1, 32], strides = [1, 1, 1]} : vector<2x9x32xf32> to vector<2x1x32xf32>
    %214 = vector.extract_strided_slice %190 {offsets = [0, 7, 0], sizes = [2, 1, 32], strides = [1, 1, 1]} : vector<2x9x32xf32> to vector<2x1x32xf32>
    %215 = tpu.concatenate %212, %213, %214 in 1 : vector<2x1x32xf32>, vector<2x1x32xf32>, vector<2x1x32xf32> -> vector<2x3x32xf32>
    %c0_146 = arith.constant 0 : index
    %c1_147 = arith.constant 1 : index
    %c0_148 = arith.constant 0 : index
    %c96_149 = arith.constant 96 : index
    %216 = vector.load %arg12[%c0_146, %c1_147, %c0_148, %c96_149] : memref<2x3x3x512xf32, #tpu.memory_space<vmem>>, vector<2x1x3x32xf32>
    %217 = vector.shape_cast %216 : vector<2x1x3x32xf32> to vector<2x3x32xf32>
    %218 = vector.shape_cast %215 : vector<2x3x32xf32> to vector<2x1x3x32xf32>
    tpu.vector_store %arg12[%c0_146, %c1_147, %c0_148, %c96_149], %218 {strides = array<i32>} : memref<2x3x3x512xf32, #tpu.memory_space<vmem>>, vector<2x1x3x32xf32>,
    %c0_150 = arith.constant 0 : index
    %c3_151 = arith.constant 3 : index
    %c0_152 = arith.constant 0 : index
    %c0_153 = arith.constant 0 : index
    %219 = vector.load %arg10[%c0_150, %c3_151, %c0_152, %c0_153] : memref<2x9x9x32xf32, #tpu.memory_space<vmem>>, vector<2x1x9x32xf32>
    %220 = vector.shape_cast %219 : vector<2x1x9x32xf32> to vector<2x9x32xf32>
    %221 = vector.extract_strided_slice %220 {offsets = [0, 0, 0], sizes = [2, 1, 32], strides = [1, 1, 1]} : vector<2x9x32xf32> to vector<2x1x32xf32>
    %222 = vector.extract_strided_slice %220 {offsets = [0, 2, 0], sizes = [2, 1, 32], strides = [1, 1, 1]} : vector<2x9x32xf32> to vector<2x1x32xf32>
    %223 = vector.extract_strided_slice %220 {offsets = [0, 4, 0], sizes = [2, 1, 32], strides = [1, 1, 1]} : vector<2x9x32xf32> to vector<2x1x32xf32>
    %224 = tpu.concatenate %221, %222, %223 in 1 : vector<2x1x32xf32>, vector<2x1x32xf32>, vector<2x1x32xf32> -> vector<2x3x32xf32>
    %c0_154 = arith.constant 0 : index
    %c1_155 = arith.constant 1 : index
    %c0_156 = arith.constant 0 : index
    %c128_157 = arith.constant 128 : index
    %225 = vector.load %arg12[%c0_154, %c1_155, %c0_156, %c128_157] : memref<2x3x3x512xf32, #tpu.memory_space<vmem>>, vector<2x1x3x32xf32>
    %226 = vector.shape_cast %225 : vector<2x1x3x32xf32> to vector<2x3x32xf32>
    %227 = vector.shape_cast %224 : vector<2x3x32xf32> to vector<2x1x3x32xf32>
    tpu.vector_store %arg12[%c0_154, %c1_155, %c0_156, %c128_157], %227 {strides = array<i32>} : memref<2x3x3x512xf32, #tpu.memory_space<vmem>>, vector<2x1x3x32xf32>,
    %228 = vector.extract_strided_slice %220 {offsets = [0, 1, 0], sizes = [2, 1, 32], strides = [1, 1, 1]} : vector<2x9x32xf32> to vector<2x1x32xf32>
    %229 = vector.extract_strided_slice %220 {offsets = [0, 3, 0], sizes = [2, 1, 32], strides = [1, 1, 1]} : vector<2x9x32xf32> to vector<2x1x32xf32>
    %230 = vector.extract_strided_slice %220 {offsets = [0, 5, 0], sizes = [2, 1, 32], strides = [1, 1, 1]} : vector<2x9x32xf32> to vector<2x1x32xf32>
    %231 = tpu.concatenate %228, %229, %230 in 1 : vector<2x1x32xf32>, vector<2x1x32xf32>, vector<2x1x32xf32> -> vector<2x3x32xf32>
    %c0_158 = arith.constant 0 : index
    %c1_159 = arith.constant 1 : index
    %c0_160 = arith.constant 0 : index
    %c160_161 = arith.constant 160 : index
    %232 = vector.load %arg12[%c0_158, %c1_159, %c0_160, %c160_161] : memref<2x3x3x512xf32, #tpu.memory_space<vmem>>, vector<2x1x3x32xf32>
    %233 = vector.shape_cast %232 : vector<2x1x3x32xf32> to vector<2x3x32xf32>
    %234 = vector.shape_cast %231 : vector<2x3x32xf32> to vector<2x1x3x32xf32>
    tpu.vector_store %arg12[%c0_158, %c1_159, %c0_160, %c160_161], %234 {strides = array<i32>} : memref<2x3x3x512xf32, #tpu.memory_space<vmem>>, vector<2x1x3x32xf32>,
    %235 = vector.extract_strided_slice %220 {offsets = [0, 2, 0], sizes = [2, 1, 32], strides = [1, 1, 1]} : vector<2x9x32xf32> to vector<2x1x32xf32>
    %236 = vector.extract_strided_slice %220 {offsets = [0, 4, 0], sizes = [2, 1, 32], strides = [1, 1, 1]} : vector<2x9x32xf32> to vector<2x1x32xf32>
    %237 = vector.extract_strided_slice %220 {offsets = [0, 6, 0], sizes = [2, 1, 32], strides = [1, 1, 1]} : vector<2x9x32xf32> to vector<2x1x32xf32>
    %238 = tpu.concatenate %235, %236, %237 in 1 : vector<2x1x32xf32>, vector<2x1x32xf32>, vector<2x1x32xf32> -> vector<2x3x32xf32>
    %c0_162 = arith.constant 0 : index
    %c1_163 = arith.constant 1 : index
    %c0_164 = arith.constant 0 : index
    %c192_165 = arith.constant 192 : index
    %239 = vector.load %arg12[%c0_162, %c1_163, %c0_164, %c192_165] : memref<2x3x3x512xf32, #tpu.memory_space<vmem>>, vector<2x1x3x32xf32>
    %240 = vector.shape_cast %239 : vector<2x1x3x32xf32> to vector<2x3x32xf32>
    %241 = vector.shape_cast %238 : vector<2x3x32xf32> to vector<2x1x3x32xf32>
    tpu.vector_store %arg12[%c0_162, %c1_163, %c0_164, %c192_165], %241 {strides = array<i32>} : memref<2x3x3x512xf32, #tpu.memory_space<vmem>>, vector<2x1x3x32xf32>,
    %242 = vector.extract_strided_slice %220 {offsets = [0, 3, 0], sizes = [2, 1, 32], strides = [1, 1, 1]} : vector<2x9x32xf32> to vector<2x1x32xf32>
    %243 = vector.extract_strided_slice %220 {offsets = [0, 5, 0], sizes = [2, 1, 32], strides = [1, 1, 1]} : vector<2x9x32xf32> to vector<2x1x32xf32>
    %244 = vector.extract_strided_slice %220 {offsets = [0, 7, 0], sizes = [2, 1, 32], strides = [1, 1, 1]} : vector<2x9x32xf32> to vector<2x1x32xf32>
    %245 = tpu.concatenate %242, %243, %244 in 1 : vector<2x1x32xf32>, vector<2x1x32xf32>, vector<2x1x32xf32> -> vector<2x3x32xf32>
    %c0_166 = arith.constant 0 : index
    %c1_167 = arith.constant 1 : index
    %c0_168 = arith.constant 0 : index
    %c224_169 = arith.constant 224 : index
    %246 = vector.load %arg12[%c0_166, %c1_167, %c0_168, %c224_169] : memref<2x3x3x512xf32, #tpu.memory_space<vmem>>, vector<2x1x3x32xf32>
    %247 = vector.shape_cast %246 : vector<2x1x3x32xf32> to vector<2x3x32xf32>
    %248 = vector.shape_cast %245 : vector<2x3x32xf32> to vector<2x1x3x32xf32>
    tpu.vector_store %arg12[%c0_166, %c1_167, %c0_168, %c224_169], %248 {strides = array<i32>} : memref<2x3x3x512xf32, #tpu.memory_space<vmem>>, vector<2x1x3x32xf32>,
    %c0_170 = arith.constant 0 : index
    %c4_171 = arith.constant 4 : index
    %c0_172 = arith.constant 0 : index
    %c0_173 = arith.constant 0 : index
    %249 = vector.load %arg10[%c0_170, %c4_171, %c0_172, %c0_173] : memref<2x9x9x32xf32, #tpu.memory_space<vmem>>, vector<2x1x9x32xf32>
    %250 = vector.shape_cast %249 : vector<2x1x9x32xf32> to vector<2x9x32xf32>
    %251 = vector.extract_strided_slice %250 {offsets = [0, 0, 0], sizes = [2, 1, 32], strides = [1, 1, 1]} : vector<2x9x32xf32> to vector<2x1x32xf32>
    %252 = vector.extract_strided_slice %250 {offsets = [0, 2, 0], sizes = [2, 1, 32], strides = [1, 1, 1]} : vector<2x9x32xf32> to vector<2x1x32xf32>
    %253 = vector.extract_strided_slice %250 {offsets = [0, 4, 0], sizes = [2, 1, 32], strides = [1, 1, 1]} : vector<2x9x32xf32> to vector<2x1x32xf32>
    %254 = tpu.concatenate %251, %252, %253 in 1 : vector<2x1x32xf32>, vector<2x1x32xf32>, vector<2x1x32xf32> -> vector<2x3x32xf32>
    %c0_174 = arith.constant 0 : index
    %c1_175 = arith.constant 1 : index
    %c0_176 = arith.constant 0 : index
    %c256_177 = arith.constant 256 : index
    %255 = vector.load %arg12[%c0_174, %c1_175, %c0_176, %c256_177] : memref<2x3x3x512xf32, #tpu.memory_space<vmem>>, vector<2x1x3x32xf32>
    %256 = vector.shape_cast %255 : vector<2x1x3x32xf32> to vector<2x3x32xf32>
    %257 = vector.shape_cast %254 : vector<2x3x32xf32> to vector<2x1x3x32xf32>
    tpu.vector_store %arg12[%c0_174, %c1_175, %c0_176, %c256_177], %257 {strides = array<i32>} : memref<2x3x3x512xf32, #tpu.memory_space<vmem>>, vector<2x1x3x32xf32>,
    %258 = vector.extract_strided_slice %250 {offsets = [0, 1, 0], sizes = [2, 1, 32], strides = [1, 1, 1]} : vector<2x9x32xf32> to vector<2x1x32xf32>
    %259 = vector.extract_strided_slice %250 {offsets = [0, 3, 0], sizes = [2, 1, 32], strides = [1, 1, 1]} : vector<2x9x32xf32> to vector<2x1x32xf32>
    %260 = vector.extract_strided_slice %250 {offsets = [0, 5, 0], sizes = [2, 1, 32], strides = [1, 1, 1]} : vector<2x9x32xf32> to vector<2x1x32xf32>
    %261 = tpu.concatenate %258, %259, %260 in 1 : vector<2x1x32xf32>, vector<2x1x32xf32>, vector<2x1x32xf32> -> vector<2x3x32xf32>
    %c0_178 = arith.constant 0 : index
    %c1_179 = arith.constant 1 : index
    %c0_180 = arith.constant 0 : index
    %c288_181 = arith.constant 288 : index
    %262 = vector.load %arg12[%c0_178, %c1_179, %c0_180, %c288_181] : memref<2x3x3x512xf32, #tpu.memory_space<vmem>>, vector<2x1x3x32xf32>
    %263 = vector.shape_cast %262 : vector<2x1x3x32xf32> to vector<2x3x32xf32>
    %264 = vector.shape_cast %261 : vector<2x3x32xf32> to vector<2x1x3x32xf32>
    tpu.vector_store %arg12[%c0_178, %c1_179, %c0_180, %c288_181], %264 {strides = array<i32>} : memref<2x3x3x512xf32, #tpu.memory_space<vmem>>, vector<2x1x3x32xf32>,
    %265 = vector.extract_strided_slice %250 {offsets = [0, 2, 0], sizes = [2, 1, 32], strides = [1, 1, 1]} : vector<2x9x32xf32> to vector<2x1x32xf32>
    %266 = vector.extract_strided_slice %250 {offsets = [0, 4, 0], sizes = [2, 1, 32], strides = [1, 1, 1]} : vector<2x9x32xf32> to vector<2x1x32xf32>
    %267 = vector.extract_strided_slice %250 {offsets = [0, 6, 0], sizes = [2, 1, 32], strides = [1, 1, 1]} : vector<2x9x32xf32> to vector<2x1x32xf32>
    %268 = tpu.concatenate %265, %266, %267 in 1 : vector<2x1x32xf32>, vector<2x1x32xf32>, vector<2x1x32xf32> -> vector<2x3x32xf32>
    %c0_182 = arith.constant 0 : index
    %c1_183 = arith.constant 1 : index
    %c0_184 = arith.constant 0 : index
    %c320_185 = arith.constant 320 : index
    %269 = vector.load %arg12[%c0_182, %c1_183, %c0_184, %c320_185] : memref<2x3x3x512xf32, #tpu.memory_space<vmem>>, vector<2x1x3x32xf32>
    %270 = vector.shape_cast %269 : vector<2x1x3x32xf32> to vector<2x3x32xf32>
    %271 = vector.shape_cast %268 : vector<2x3x32xf32> to vector<2x1x3x32xf32>
    tpu.vector_store %arg12[%c0_182, %c1_183, %c0_184, %c320_185], %271 {strides = array<i32>} : memref<2x3x3x512xf32, #tpu.memory_space<vmem>>, vector<2x1x3x32xf32>,
    %272 = vector.extract_strided_slice %250 {offsets = [0, 3, 0], sizes = [2, 1, 32], strides = [1, 1, 1]} : vector<2x9x32xf32> to vector<2x1x32xf32>
    %273 = vector.extract_strided_slice %250 {offsets = [0, 5, 0], sizes = [2, 1, 32], strides = [1, 1, 1]} : vector<2x9x32xf32> to vector<2x1x32xf32>
    %274 = vector.extract_strided_slice %250 {offsets = [0, 7, 0], sizes = [2, 1, 32], strides = [1, 1, 1]} : vector<2x9x32xf32> to vector<2x1x32xf32>
    %275 = tpu.concatenate %272, %273, %274 in 1 : vector<2x1x32xf32>, vector<2x1x32xf32>, vector<2x1x32xf32> -> vector<2x3x32xf32>
    %c0_186 = arith.constant 0 : index
    %c1_187 = arith.constant 1 : index
    %c0_188 = arith.constant 0 : index
    %c352_189 = arith.constant 352 : index
    %276 = vector.load %arg12[%c0_186, %c1_187, %c0_188, %c352_189] : memref<2x3x3x512xf32, #tpu.memory_space<vmem>>, vector<2x1x3x32xf32>
    %277 = vector.shape_cast %276 : vector<2x1x3x32xf32> to vector<2x3x32xf32>
    %278 = vector.shape_cast %275 : vector<2x3x32xf32> to vector<2x1x3x32xf32>
    tpu.vector_store %arg12[%c0_186, %c1_187, %c0_188, %c352_189], %278 {strides = array<i32>} : memref<2x3x3x512xf32, #tpu.memory_space<vmem>>, vector<2x1x3x32xf32>,
    %c0_190 = arith.constant 0 : index
    %c5_191 = arith.constant 5 : index
    %c0_192 = arith.constant 0 : index
    %c0_193 = arith.constant 0 : index
    %279 = vector.load %arg10[%c0_190, %c5_191, %c0_192, %c0_193] : memref<2x9x9x32xf32, #tpu.memory_space<vmem>>, vector<2x1x9x32xf32>
    %280 = vector.shape_cast %279 : vector<2x1x9x32xf32> to vector<2x9x32xf32>
    %281 = vector.extract_strided_slice %280 {offsets = [0, 0, 0], sizes = [2, 1, 32], strides = [1, 1, 1]} : vector<2x9x32xf32> to vector<2x1x32xf32>
    %282 = vector.extract_strided_slice %280 {offsets = [0, 2, 0], sizes = [2, 1, 32], strides = [1, 1, 1]} : vector<2x9x32xf32> to vector<2x1x32xf32>
    %283 = vector.extract_strided_slice %280 {offsets = [0, 4, 0], sizes = [2, 1, 32], strides = [1, 1, 1]} : vector<2x9x32xf32> to vector<2x1x32xf32>
    %284 = tpu.concatenate %281, %282, %283 in 1 : vector<2x1x32xf32>, vector<2x1x32xf32>, vector<2x1x32xf32> -> vector<2x3x32xf32>
    %c0_194 = arith.constant 0 : index
    %c1_195 = arith.constant 1 : index
    %c0_196 = arith.constant 0 : index
    %c384_197 = arith.constant 384 : index
    %285 = vector.load %arg12[%c0_194, %c1_195, %c0_196, %c384_197] : memref<2x3x3x512xf32, #tpu.memory_space<vmem>>, vector<2x1x3x32xf32>
    %286 = vector.shape_cast %285 : vector<2x1x3x32xf32> to vector<2x3x32xf32>
    %287 = vector.shape_cast %284 : vector<2x3x32xf32> to vector<2x1x3x32xf32>
    tpu.vector_store %arg12[%c0_194, %c1_195, %c0_196, %c384_197], %287 {strides = array<i32>} : memref<2x3x3x512xf32, #tpu.memory_space<vmem>>, vector<2x1x3x32xf32>,
    %288 = vector.extract_strided_slice %280 {offsets = [0, 1, 0], sizes = [2, 1, 32], strides = [1, 1, 1]} : vector<2x9x32xf32> to vector<2x1x32xf32>
    %289 = vector.extract_strided_slice %280 {offsets = [0, 3, 0], sizes = [2, 1, 32], strides = [1, 1, 1]} : vector<2x9x32xf32> to vector<2x1x32xf32>
    %290 = vector.extract_strided_slice %280 {offsets = [0, 5, 0], sizes = [2, 1, 32], strides = [1, 1, 1]} : vector<2x9x32xf32> to vector<2x1x32xf32>
    %291 = tpu.concatenate %288, %289, %290 in 1 : vector<2x1x32xf32>, vector<2x1x32xf32>, vector<2x1x32xf32> -> vector<2x3x32xf32>
    %c0_198 = arith.constant 0 : index
    %c1_199 = arith.constant 1 : index
    %c0_200 = arith.constant 0 : index
    %c416_201 = arith.constant 416 : index
    %292 = vector.load %arg12[%c0_198, %c1_199, %c0_200, %c416_201] : memref<2x3x3x512xf32, #tpu.memory_space<vmem>>, vector<2x1x3x32xf32>
    %293 = vector.shape_cast %292 : vector<2x1x3x32xf32> to vector<2x3x32xf32>
    %294 = vector.shape_cast %291 : vector<2x3x32xf32> to vector<2x1x3x32xf32>
    tpu.vector_store %arg12[%c0_198, %c1_199, %c0_200, %c416_201], %294 {strides = array<i32>} : memref<2x3x3x512xf32, #tpu.memory_space<vmem>>, vector<2x1x3x32xf32>,
    %295 = vector.extract_strided_slice %280 {offsets = [0, 2, 0], sizes = [2, 1, 32], strides = [1, 1, 1]} : vector<2x9x32xf32> to vector<2x1x32xf32>
    %296 = vector.extract_strided_slice %280 {offsets = [0, 4, 0], sizes = [2, 1, 32], strides = [1, 1, 1]} : vector<2x9x32xf32> to vector<2x1x32xf32>
    %297 = vector.extract_strided_slice %280 {offsets = [0, 6, 0], sizes = [2, 1, 32], strides = [1, 1, 1]} : vector<2x9x32xf32> to vector<2x1x32xf32>
    %298 = tpu.concatenate %295, %296, %297 in 1 : vector<2x1x32xf32>, vector<2x1x32xf32>, vector<2x1x32xf32> -> vector<2x3x32xf32>
    %c0_202 = arith.constant 0 : index
    %c1_203 = arith.constant 1 : index
    %c0_204 = arith.constant 0 : index
    %c448_205 = arith.constant 448 : index
    %299 = vector.load %arg12[%c0_202, %c1_203, %c0_204, %c448_205] : memref<2x3x3x512xf32, #tpu.memory_space<vmem>>, vector<2x1x3x32xf32>
    %300 = vector.shape_cast %299 : vector<2x1x3x32xf32> to vector<2x3x32xf32>
    %301 = vector.shape_cast %298 : vector<2x3x32xf32> to vector<2x1x3x32xf32>
    tpu.vector_store %arg12[%c0_202, %c1_203, %c0_204, %c448_205], %301 {strides = array<i32>} : memref<2x3x3x512xf32, #tpu.memory_space<vmem>>, vector<2x1x3x32xf32>,
    %302 = vector.extract_strided_slice %280 {offsets = [0, 3, 0], sizes = [2, 1, 32], strides = [1, 1, 1]} : vector<2x9x32xf32> to vector<2x1x32xf32>
    %303 = vector.extract_strided_slice %280 {offsets = [0, 5, 0], sizes = [2, 1, 32], strides = [1, 1, 1]} : vector<2x9x32xf32> to vector<2x1x32xf32>
    %304 = vector.extract_strided_slice %280 {offsets = [0, 7, 0], sizes = [2, 1, 32], strides = [1, 1, 1]} : vector<2x9x32xf32> to vector<2x1x32xf32>
    %305 = tpu.concatenate %302, %303, %304 in 1 : vector<2x1x32xf32>, vector<2x1x32xf32>, vector<2x1x32xf32> -> vector<2x3x32xf32>
    %c0_206 = arith.constant 0 : index
    %c1_207 = arith.constant 1 : index
    %c0_208 = arith.constant 0 : index
    %c480_209 = arith.constant 480 : index
    %306 = vector.load %arg12[%c0_206, %c1_207, %c0_208, %c480_209] : memref<2x3x3x512xf32, #tpu.memory_space<vmem>>, vector<2x1x3x32xf32>
    %307 = vector.shape_cast %306 : vector<2x1x3x32xf32> to vector<2x3x32xf32>
    %308 = vector.shape_cast %305 : vector<2x3x32xf32> to vector<2x1x3x32xf32>
    tpu.vector_store %arg12[%c0_206, %c1_207, %c0_208, %c480_209], %308 {strides = array<i32>} : memref<2x3x3x512xf32, #tpu.memory_space<vmem>>, vector<2x1x3x32xf32>,
    %c0_210 = arith.constant 0 : index
    %c4_211 = arith.constant 4 : index
    %c0_212 = arith.constant 0 : index
    %c0_213 = arith.constant 0 : index
    %309 = vector.load %arg10[%c0_210, %c4_211, %c0_212, %c0_213] : memref<2x9x9x32xf32, #tpu.memory_space<vmem>>, vector<2x1x9x32xf32>
    %310 = vector.shape_cast %309 : vector<2x1x9x32xf32> to vector<2x9x32xf32>
    %311 = vector.extract_strided_slice %310 {offsets = [0, 0, 0], sizes = [2, 1, 32], strides = [1, 1, 1]} : vector<2x9x32xf32> to vector<2x1x32xf32>
    %312 = vector.extract_strided_slice %310 {offsets = [0, 2, 0], sizes = [2, 1, 32], strides = [1, 1, 1]} : vector<2x9x32xf32> to vector<2x1x32xf32>
    %313 = vector.extract_strided_slice %310 {offsets = [0, 4, 0], sizes = [2, 1, 32], strides = [1, 1, 1]} : vector<2x9x32xf32> to vector<2x1x32xf32>
    %314 = tpu.concatenate %311, %312, %313 in 1 : vector<2x1x32xf32>, vector<2x1x32xf32>, vector<2x1x32xf32> -> vector<2x3x32xf32>
    %c0_214 = arith.constant 0 : index
    %c2_215 = arith.constant 2 : index
    %c0_216 = arith.constant 0 : index
    %c0_217 = arith.constant 0 : index
    %315 = vector.load %arg12[%c0_214, %c2_215, %c0_216, %c0_217] : memref<2x3x3x512xf32, #tpu.memory_space<vmem>>, vector<2x1x3x32xf32>
    %316 = vector.shape_cast %315 : vector<2x1x3x32xf32> to vector<2x3x32xf32>
    %317 = vector.shape_cast %314 : vector<2x3x32xf32> to vector<2x1x3x32xf32>
    tpu.vector_store %arg12[%c0_214, %c2_215, %c0_216, %c0_217], %317 {strides = array<i32>} : memref<2x3x3x512xf32, #tpu.memory_space<vmem>>, vector<2x1x3x32xf32>,
    %318 = vector.extract_strided_slice %310 {offsets = [0, 1, 0], sizes = [2, 1, 32], strides = [1, 1, 1]} : vector<2x9x32xf32> to vector<2x1x32xf32>
    %319 = vector.extract_strided_slice %310 {offsets = [0, 3, 0], sizes = [2, 1, 32], strides = [1, 1, 1]} : vector<2x9x32xf32> to vector<2x1x32xf32>
    %320 = vector.extract_strided_slice %310 {offsets = [0, 5, 0], sizes = [2, 1, 32], strides = [1, 1, 1]} : vector<2x9x32xf32> to vector<2x1x32xf32>
    %321 = tpu.concatenate %318, %319, %320 in 1 : vector<2x1x32xf32>, vector<2x1x32xf32>, vector<2x1x32xf32> -> vector<2x3x32xf32>
    %c0_218 = arith.constant 0 : index
    %c2_219 = arith.constant 2 : index
    %c0_220 = arith.constant 0 : index
    %c32_221 = arith.constant 32 : index
    %322 = vector.load %arg12[%c0_218, %c2_219, %c0_220, %c32_221] : memref<2x3x3x512xf32, #tpu.memory_space<vmem>>, vector<2x1x3x32xf32>
    %323 = vector.shape_cast %322 : vector<2x1x3x32xf32> to vector<2x3x32xf32>
    %324 = vector.shape_cast %321 : vector<2x3x32xf32> to vector<2x1x3x32xf32>
    tpu.vector_store %arg12[%c0_218, %c2_219, %c0_220, %c32_221], %324 {strides = array<i32>} : memref<2x3x3x512xf32, #tpu.memory_space<vmem>>, vector<2x1x3x32xf32>,
    %325 = vector.extract_strided_slice %310 {offsets = [0, 2, 0], sizes = [2, 1, 32], strides = [1, 1, 1]} : vector<2x9x32xf32> to vector<2x1x32xf32>
    %326 = vector.extract_strided_slice %310 {offsets = [0, 4, 0], sizes = [2, 1, 32], strides = [1, 1, 1]} : vector<2x9x32xf32> to vector<2x1x32xf32>
    %327 = vector.extract_strided_slice %310 {offsets = [0, 6, 0], sizes = [2, 1, 32], strides = [1, 1, 1]} : vector<2x9x32xf32> to vector<2x1x32xf32>
    %328 = tpu.concatenate %325, %326, %327 in 1 : vector<2x1x32xf32>, vector<2x1x32xf32>, vector<2x1x32xf32> -> vector<2x3x32xf32>
    %c0_222 = arith.constant 0 : index
    %c2_223 = arith.constant 2 : index
    %c0_224 = arith.constant 0 : index
    %c64_225 = arith.constant 64 : index
    %329 = vector.load %arg12[%c0_222, %c2_223, %c0_224, %c64_225] : memref<2x3x3x512xf32, #tpu.memory_space<vmem>>, vector<2x1x3x32xf32>
    %330 = vector.shape_cast %329 : vector<2x1x3x32xf32> to vector<2x3x32xf32>
    %331 = vector.shape_cast %328 : vector<2x3x32xf32> to vector<2x1x3x32xf32>
    tpu.vector_store %arg12[%c0_222, %c2_223, %c0_224, %c64_225], %331 {strides = array<i32>} : memref<2x3x3x512xf32, #tpu.memory_space<vmem>>, vector<2x1x3x32xf32>,
    %332 = vector.extract_strided_slice %310 {offsets = [0, 3, 0], sizes = [2, 1, 32], strides = [1, 1, 1]} : vector<2x9x32xf32> to vector<2x1x32xf32>
    %333 = vector.extract_strided_slice %310 {offsets = [0, 5, 0], sizes = [2, 1, 32], strides = [1, 1, 1]} : vector<2x9x32xf32> to vector<2x1x32xf32>
    %334 = vector.extract_strided_slice %310 {offsets = [0, 7, 0], sizes = [2, 1, 32], strides = [1, 1, 1]} : vector<2x9x32xf32> to vector<2x1x32xf32>
    %335 = tpu.concatenate %332, %333, %334 in 1 : vector<2x1x32xf32>, vector<2x1x32xf32>, vector<2x1x32xf32> -> vector<2x3x32xf32>
    %c0_226 = arith.constant 0 : index
    %c2_227 = arith.constant 2 : index
    %c0_228 = arith.constant 0 : index
    %c96_229 = arith.constant 96 : index
    %336 = vector.load %arg12[%c0_226, %c2_227, %c0_228, %c96_229] : memref<2x3x3x512xf32, #tpu.memory_space<vmem>>, vector<2x1x3x32xf32>
    %337 = vector.shape_cast %336 : vector<2x1x3x32xf32> to vector<2x3x32xf32>
    %338 = vector.shape_cast %335 : vector<2x3x32xf32> to vector<2x1x3x32xf32>
    tpu.vector_store %arg12[%c0_226, %c2_227, %c0_228, %c96_229], %338 {strides = array<i32>} : memref<2x3x3x512xf32, #tpu.memory_space<vmem>>, vector<2x1x3x32xf32>,
    %c0_230 = arith.constant 0 : index
    %c5_231 = arith.constant 5 : index
    %c0_232 = arith.constant 0 : index
    %c0_233 = arith.constant 0 : index
    %339 = vector.load %arg10[%c0_230, %c5_231, %c0_232, %c0_233] : memref<2x9x9x32xf32, #tpu.memory_space<vmem>>, vector<2x1x9x32xf32>
    %340 = vector.shape_cast %339 : vector<2x1x9x32xf32> to vector<2x9x32xf32>
    %341 = vector.extract_strided_slice %340 {offsets = [0, 0, 0], sizes = [2, 1, 32], strides = [1, 1, 1]} : vector<2x9x32xf32> to vector<2x1x32xf32>
    %342 = vector.extract_strided_slice %340 {offsets = [0, 2, 0], sizes = [2, 1, 32], strides = [1, 1, 1]} : vector<2x9x32xf32> to vector<2x1x32xf32>
    %343 = vector.extract_strided_slice %340 {offsets = [0, 4, 0], sizes = [2, 1, 32], strides = [1, 1, 1]} : vector<2x9x32xf32> to vector<2x1x32xf32>
    %344 = tpu.concatenate %341, %342, %343 in 1 : vector<2x1x32xf32>, vector<2x1x32xf32>, vector<2x1x32xf32> -> vector<2x3x32xf32>
    %c0_234 = arith.constant 0 : index
    %c2_235 = arith.constant 2 : index
    %c0_236 = arith.constant 0 : index
    %c128_237 = arith.constant 128 : index
    %345 = vector.load %arg12[%c0_234, %c2_235, %c0_236, %c128_237] : memref<2x3x3x512xf32, #tpu.memory_space<vmem>>, vector<2x1x3x32xf32>
    %346 = vector.shape_cast %345 : vector<2x1x3x32xf32> to vector<2x3x32xf32>
    %347 = vector.shape_cast %344 : vector<2x3x32xf32> to vector<2x1x3x32xf32>
    tpu.vector_store %arg12[%c0_234, %c2_235, %c0_236, %c128_237], %347 {strides = array<i32>} : memref<2x3x3x512xf32, #tpu.memory_space<vmem>>, vector<2x1x3x32xf32>,
    %348 = vector.extract_strided_slice %340 {offsets = [0, 1, 0], sizes = [2, 1, 32], strides = [1, 1, 1]} : vector<2x9x32xf32> to vector<2x1x32xf32>
    %349 = vector.extract_strided_slice %340 {offsets = [0, 3, 0], sizes = [2, 1, 32], strides = [1, 1, 1]} : vector<2x9x32xf32> to vector<2x1x32xf32>
    %350 = vector.extract_strided_slice %340 {offsets = [0, 5, 0], sizes = [2, 1, 32], strides = [1, 1, 1]} : vector<2x9x32xf32> to vector<2x1x32xf32>
    %351 = tpu.concatenate %348, %349, %350 in 1 : vector<2x1x32xf32>, vector<2x1x32xf32>, vector<2x1x32xf32> -> vector<2x3x32xf32>
    %c0_238 = arith.constant 0 : index
    %c2_239 = arith.constant 2 : index
    %c0_240 = arith.constant 0 : index
    %c160_241 = arith.constant 160 : index
    %352 = vector.load %arg12[%c0_238, %c2_239, %c0_240, %c160_241] : memref<2x3x3x512xf32, #tpu.memory_space<vmem>>, vector<2x1x3x32xf32>
    %353 = vector.shape_cast %352 : vector<2x1x3x32xf32> to vector<2x3x32xf32>
    %354 = vector.shape_cast %351 : vector<2x3x32xf32> to vector<2x1x3x32xf32>
    tpu.vector_store %arg12[%c0_238, %c2_239, %c0_240, %c160_241], %354 {strides = array<i32>} : memref<2x3x3x512xf32, #tpu.memory_space<vmem>>, vector<2x1x3x32xf32>,
    %355 = vector.extract_strided_slice %340 {offsets = [0, 2, 0], sizes = [2, 1, 32], strides = [1, 1, 1]} : vector<2x9x32xf32> to vector<2x1x32xf32>
    %356 = vector.extract_strided_slice %340 {offsets = [0, 4, 0], sizes = [2, 1, 32], strides = [1, 1, 1]} : vector<2x9x32xf32> to vector<2x1x32xf32>
    %357 = vector.extract_strided_slice %340 {offsets = [0, 6, 0], sizes = [2, 1, 32], strides = [1, 1, 1]} : vector<2x9x32xf32> to vector<2x1x32xf32>
    %358 = tpu.concatenate %355, %356, %357 in 1 : vector<2x1x32xf32>, vector<2x1x32xf32>, vector<2x1x32xf32> -> vector<2x3x32xf32>
    %c0_242 = arith.constant 0 : index
    %c2_243 = arith.constant 2 : index
    %c0_244 = arith.constant 0 : index
    %c192_245 = arith.constant 192 : index
    %359 = vector.load %arg12[%c0_242, %c2_243, %c0_244, %c192_245] : memref<2x3x3x512xf32, #tpu.memory_space<vmem>>, vector<2x1x3x32xf32>
    %360 = vector.shape_cast %359 : vector<2x1x3x32xf32> to vector<2x3x32xf32>
    %361 = vector.shape_cast %358 : vector<2x3x32xf32> to vector<2x1x3x32xf32>
    tpu.vector_store %arg12[%c0_242, %c2_243, %c0_244, %c192_245], %361 {strides = array<i32>} : memref<2x3x3x512xf32, #tpu.memory_space<vmem>>, vector<2x1x3x32xf32>,
    %362 = vector.extract_strided_slice %340 {offsets = [0, 3, 0], sizes = [2, 1, 32], strides = [1, 1, 1]} : vector<2x9x32xf32> to vector<2x1x32xf32>
    %363 = vector.extract_strided_slice %340 {offsets = [0, 5, 0], sizes = [2, 1, 32], strides = [1, 1, 1]} : vector<2x9x32xf32> to vector<2x1x32xf32>
    %364 = vector.extract_strided_slice %340 {offsets = [0, 7, 0], sizes = [2, 1, 32], strides = [1, 1, 1]} : vector<2x9x32xf32> to vector<2x1x32xf32>
    %365 = tpu.concatenate %362, %363, %364 in 1 : vector<2x1x32xf32>, vector<2x1x32xf32>, vector<2x1x32xf32> -> vector<2x3x32xf32>
    %c0_246 = arith.constant 0 : index
    %c2_247 = arith.constant 2 : index
    %c0_248 = arith.constant 0 : index
    %c224_249 = arith.constant 224 : index
    %366 = vector.load %arg12[%c0_246, %c2_247, %c0_248, %c224_249] : memref<2x3x3x512xf32, #tpu.memory_space<vmem>>, vector<2x1x3x32xf32>
    %367 = vector.shape_cast %366 : vector<2x1x3x32xf32> to vector<2x3x32xf32>
    %368 = vector.shape_cast %365 : vector<2x3x32xf32> to vector<2x1x3x32xf32>
    tpu.vector_store %arg12[%c0_246, %c2_247, %c0_248, %c224_249], %368 {strides = array<i32>} : memref<2x3x3x512xf32, #tpu.memory_space<vmem>>, vector<2x1x3x32xf32>,
    %c0_250 = arith.constant 0 : index
    %c6_251 = arith.constant 6 : index
    %c0_252 = arith.constant 0 : index
    %c0_253 = arith.constant 0 : index
    %369 = vector.load %arg10[%c0_250, %c6_251, %c0_252, %c0_253] : memref<2x9x9x32xf32, #tpu.memory_space<vmem>>, vector<2x1x9x32xf32>
    %370 = vector.shape_cast %369 : vector<2x1x9x32xf32> to vector<2x9x32xf32>
    %371 = vector.extract_strided_slice %370 {offsets = [0, 0, 0], sizes = [2, 1, 32], strides = [1, 1, 1]} : vector<2x9x32xf32> to vector<2x1x32xf32>
    %372 = vector.extract_strided_slice %370 {offsets = [0, 2, 0], sizes = [2, 1, 32], strides = [1, 1, 1]} : vector<2x9x32xf32> to vector<2x1x32xf32>
    %373 = vector.extract_strided_slice %370 {offsets = [0, 4, 0], sizes = [2, 1, 32], strides = [1, 1, 1]} : vector<2x9x32xf32> to vector<2x1x32xf32>
    %374 = tpu.concatenate %371, %372, %373 in 1 : vector<2x1x32xf32>, vector<2x1x32xf32>, vector<2x1x32xf32> -> vector<2x3x32xf32>
    %c0_254 = arith.constant 0 : index
    %c2_255 = arith.constant 2 : index
    %c0_256 = arith.constant 0 : index
    %c256_257 = arith.constant 256 : index
    %375 = vector.load %arg12[%c0_254, %c2_255, %c0_256, %c256_257] : memref<2x3x3x512xf32, #tpu.memory_space<vmem>>, vector<2x1x3x32xf32>
    %376 = vector.shape_cast %375 : vector<2x1x3x32xf32> to vector<2x3x32xf32>
    %377 = vector.shape_cast %374 : vector<2x3x32xf32> to vector<2x1x3x32xf32>
    tpu.vector_store %arg12[%c0_254, %c2_255, %c0_256, %c256_257], %377 {strides = array<i32>} : memref<2x3x3x512xf32, #tpu.memory_space<vmem>>, vector<2x1x3x32xf32>,
    %378 = vector.extract_strided_slice %370 {offsets = [0, 1, 0], sizes = [2, 1, 32], strides = [1, 1, 1]} : vector<2x9x32xf32> to vector<2x1x32xf32>
    %379 = vector.extract_strided_slice %370 {offsets = [0, 3, 0], sizes = [2, 1, 32], strides = [1, 1, 1]} : vector<2x9x32xf32> to vector<2x1x32xf32>
    %380 = vector.extract_strided_slice %370 {offsets = [0, 5, 0], sizes = [2, 1, 32], strides = [1, 1, 1]} : vector<2x9x32xf32> to vector<2x1x32xf32>
    %381 = tpu.concatenate %378, %379, %380 in 1 : vector<2x1x32xf32>, vector<2x1x32xf32>, vector<2x1x32xf32> -> vector<2x3x32xf32>
    %c0_258 = arith.constant 0 : index
    %c2_259 = arith.constant 2 : index
    %c0_260 = arith.constant 0 : index
    %c288_261 = arith.constant 288 : index
    %382 = vector.load %arg12[%c0_258, %c2_259, %c0_260, %c288_261] : memref<2x3x3x512xf32, #tpu.memory_space<vmem>>, vector<2x1x3x32xf32>
    %383 = vector.shape_cast %382 : vector<2x1x3x32xf32> to vector<2x3x32xf32>
    %384 = vector.shape_cast %381 : vector<2x3x32xf32> to vector<2x1x3x32xf32>
    tpu.vector_store %arg12[%c0_258, %c2_259, %c0_260, %c288_261], %384 {strides = array<i32>} : memref<2x3x3x512xf32, #tpu.memory_space<vmem>>, vector<2x1x3x32xf32>,
    %385 = vector.extract_strided_slice %370 {offsets = [0, 2, 0], sizes = [2, 1, 32], strides = [1, 1, 1]} : vector<2x9x32xf32> to vector<2x1x32xf32>
    %386 = vector.extract_strided_slice %370 {offsets = [0, 4, 0], sizes = [2, 1, 32], strides = [1, 1, 1]} : vector<2x9x32xf32> to vector<2x1x32xf32>
    %387 = vector.extract_strided_slice %370 {offsets = [0, 6, 0], sizes = [2, 1, 32], strides = [1, 1, 1]} : vector<2x9x32xf32> to vector<2x1x32xf32>
    %388 = tpu.concatenate %385, %386, %387 in 1 : vector<2x1x32xf32>, vector<2x1x32xf32>, vector<2x1x32xf32> -> vector<2x3x32xf32>
    %c0_262 = arith.constant 0 : index
    %c2_263 = arith.constant 2 : index
    %c0_264 = arith.constant 0 : index
    %c320_265 = arith.constant 320 : index
    %389 = vector.load %arg12[%c0_262, %c2_263, %c0_264, %c320_265] : memref<2x3x3x512xf32, #tpu.memory_space<vmem>>, vector<2x1x3x32xf32>
    %390 = vector.shape_cast %389 : vector<2x1x3x32xf32> to vector<2x3x32xf32>
    %391 = vector.shape_cast %388 : vector<2x3x32xf32> to vector<2x1x3x32xf32>
    tpu.vector_store %arg12[%c0_262, %c2_263, %c0_264, %c320_265], %391 {strides = array<i32>} : memref<2x3x3x512xf32, #tpu.memory_space<vmem>>, vector<2x1x3x32xf32>,
    %392 = vector.extract_strided_slice %370 {offsets = [0, 3, 0], sizes = [2, 1, 32], strides = [1, 1, 1]} : vector<2x9x32xf32> to vector<2x1x32xf32>
    %393 = vector.extract_strided_slice %370 {offsets = [0, 5, 0], sizes = [2, 1, 32], strides = [1, 1, 1]} : vector<2x9x32xf32> to vector<2x1x32xf32>
    %394 = vector.extract_strided_slice %370 {offsets = [0, 7, 0], sizes = [2, 1, 32], strides = [1, 1, 1]} : vector<2x9x32xf32> to vector<2x1x32xf32>
    %395 = tpu.concatenate %392, %393, %394 in 1 : vector<2x1x32xf32>, vector<2x1x32xf32>, vector<2x1x32xf32> -> vector<2x3x32xf32>
    %c0_266 = arith.constant 0 : index
    %c2_267 = arith.constant 2 : index
    %c0_268 = arith.constant 0 : index
    %c352_269 = arith.constant 352 : index
    %396 = vector.load %arg12[%c0_266, %c2_267, %c0_268, %c352_269] : memref<2x3x3x512xf32, #tpu.memory_space<vmem>>, vector<2x1x3x32xf32>
    %397 = vector.shape_cast %396 : vector<2x1x3x32xf32> to vector<2x3x32xf32>
    %398 = vector.shape_cast %395 : vector<2x3x32xf32> to vector<2x1x3x32xf32>
    tpu.vector_store %arg12[%c0_266, %c2_267, %c0_268, %c352_269], %398 {strides = array<i32>} : memref<2x3x3x512xf32, #tpu.memory_space<vmem>>, vector<2x1x3x32xf32>,
    %c0_270 = arith.constant 0 : index
    %c7_271 = arith.constant 7 : index
    %c0_272 = arith.constant 0 : index
    %c0_273 = arith.constant 0 : index
    %399 = vector.load %arg10[%c0_270, %c7_271, %c0_272, %c0_273] : memref<2x9x9x32xf32, #tpu.memory_space<vmem>>, vector<2x1x9x32xf32>
    %400 = vector.shape_cast %399 : vector<2x1x9x32xf32> to vector<2x9x32xf32>
    %401 = vector.extract_strided_slice %400 {offsets = [0, 0, 0], sizes = [2, 1, 32], strides = [1, 1, 1]} : vector<2x9x32xf32> to vector<2x1x32xf32>
    %402 = vector.extract_strided_slice %400 {offsets = [0, 2, 0], sizes = [2, 1, 32], strides = [1, 1, 1]} : vector<2x9x32xf32> to vector<2x1x32xf32>
    %403 = vector.extract_strided_slice %400 {offsets = [0, 4, 0], sizes = [2, 1, 32], strides = [1, 1, 1]} : vector<2x9x32xf32> to vector<2x1x32xf32>
    %404 = tpu.concatenate %401, %402, %403 in 1 : vector<2x1x32xf32>, vector<2x1x32xf32>, vector<2x1x32xf32> -> vector<2x3x32xf32>
    %c0_274 = arith.constant 0 : index
    %c2_275 = arith.constant 2 : index
    %c0_276 = arith.constant 0 : index
    %c384_277 = arith.constant 384 : index
    %405 = vector.load %arg12[%c0_274, %c2_275, %c0_276, %c384_277] : memref<2x3x3x512xf32, #tpu.memory_space<vmem>>, vector<2x1x3x32xf32>
    %406 = vector.shape_cast %405 : vector<2x1x3x32xf32> to vector<2x3x32xf32>
    %407 = vector.shape_cast %404 : vector<2x3x32xf32> to vector<2x1x3x32xf32>
    tpu.vector_store %arg12[%c0_274, %c2_275, %c0_276, %c384_277], %407 {strides = array<i32>} : memref<2x3x3x512xf32, #tpu.memory_space<vmem>>, vector<2x1x3x32xf32>,
    %408 = vector.extract_strided_slice %400 {offsets = [0, 1, 0], sizes = [2, 1, 32], strides = [1, 1, 1]} : vector<2x9x32xf32> to vector<2x1x32xf32>
    %409 = vector.extract_strided_slice %400 {offsets = [0, 3, 0], sizes = [2, 1, 32], strides = [1, 1, 1]} : vector<2x9x32xf32> to vector<2x1x32xf32>
    %410 = vector.extract_strided_slice %400 {offsets = [0, 5, 0], sizes = [2, 1, 32], strides = [1, 1, 1]} : vector<2x9x32xf32> to vector<2x1x32xf32>
    %411 = tpu.concatenate %408, %409, %410 in 1 : vector<2x1x32xf32>, vector<2x1x32xf32>, vector<2x1x32xf32> -> vector<2x3x32xf32>
    %c0_278 = arith.constant 0 : index
    %c2_279 = arith.constant 2 : index
    %c0_280 = arith.constant 0 : index
    %c416_281 = arith.constant 416 : index
    %412 = vector.load %arg12[%c0_278, %c2_279, %c0_280, %c416_281] : memref<2x3x3x512xf32, #tpu.memory_space<vmem>>, vector<2x1x3x32xf32>
    %413 = vector.shape_cast %412 : vector<2x1x3x32xf32> to vector<2x3x32xf32>
    %414 = vector.shape_cast %411 : vector<2x3x32xf32> to vector<2x1x3x32xf32>
    tpu.vector_store %arg12[%c0_278, %c2_279, %c0_280, %c416_281], %414 {strides = array<i32>} : memref<2x3x3x512xf32, #tpu.memory_space<vmem>>, vector<2x1x3x32xf32>,
    %415 = vector.extract_strided_slice %400 {offsets = [0, 2, 0], sizes = [2, 1, 32], strides = [1, 1, 1]} : vector<2x9x32xf32> to vector<2x1x32xf32>
    %416 = vector.extract_strided_slice %400 {offsets = [0, 4, 0], sizes = [2, 1, 32], strides = [1, 1, 1]} : vector<2x9x32xf32> to vector<2x1x32xf32>
    %417 = vector.extract_strided_slice %400 {offsets = [0, 6, 0], sizes = [2, 1, 32], strides = [1, 1, 1]} : vector<2x9x32xf32> to vector<2x1x32xf32>
    %418 = tpu.concatenate %415, %416, %417 in 1 : vector<2x1x32xf32>, vector<2x1x32xf32>, vector<2x1x32xf32> -> vector<2x3x32xf32>
    %c0_282 = arith.constant 0 : index
    %c2_283 = arith.constant 2 : index
    %c0_284 = arith.constant 0 : index
    %c448_285 = arith.constant 448 : index
    %419 = vector.load %arg12[%c0_282, %c2_283, %c0_284, %c448_285] : memref<2x3x3x512xf32, #tpu.memory_space<vmem>>, vector<2x1x3x32xf32>
    %420 = vector.shape_cast %419 : vector<2x1x3x32xf32> to vector<2x3x32xf32>
    %421 = vector.shape_cast %418 : vector<2x3x32xf32> to vector<2x1x3x32xf32>
    tpu.vector_store %arg12[%c0_282, %c2_283, %c0_284, %c448_285], %421 {strides = array<i32>} : memref<2x3x3x512xf32, #tpu.memory_space<vmem>>, vector<2x1x3x32xf32>,
    %422 = vector.extract_strided_slice %400 {offsets = [0, 3, 0], sizes = [2, 1, 32], strides = [1, 1, 1]} : vector<2x9x32xf32> to vector<2x1x32xf32>
    %423 = vector.extract_strided_slice %400 {offsets = [0, 5, 0], sizes = [2, 1, 32], strides = [1, 1, 1]} : vector<2x9x32xf32> to vector<2x1x32xf32>
    %424 = vector.extract_strided_slice %400 {offsets = [0, 7, 0], sizes = [2, 1, 32], strides = [1, 1, 1]} : vector<2x9x32xf32> to vector<2x1x32xf32>
    %425 = tpu.concatenate %422, %423, %424 in 1 : vector<2x1x32xf32>, vector<2x1x32xf32>, vector<2x1x32xf32> -> vector<2x3x32xf32>
    %c0_286 = arith.constant 0 : index
    %c2_287 = arith.constant 2 : index
    %c0_288 = arith.constant 0 : index
    %c480_289 = arith.constant 480 : index
    %426 = vector.load %arg12[%c0_286, %c2_287, %c0_288, %c480_289] : memref<2x3x3x512xf32, #tpu.memory_space<vmem>>, vector<2x1x3x32xf32>
    %427 = vector.shape_cast %426 : vector<2x1x3x32xf32> to vector<2x3x32xf32>
    %428 = vector.shape_cast %425 : vector<2x3x32xf32> to vector<2x1x3x32xf32>
    tpu.vector_store %arg12[%c0_286, %c2_287, %c0_288, %c480_289], %428 {strides = array<i32>} : memref<2x3x3x512xf32, #tpu.memory_space<vmem>>, vector<2x1x3x32xf32>,
    %c0_290 = arith.constant 0 : index
    %c0_291 = arith.constant 0 : index
    %429 = vector.load %arg3[%c0_290, %c0_291] : memref<512x64xbf16, #tpu.memory_space<vmem>>, vector<512x64xbf16>
    %c0_292 = arith.constant 0 : index
    %c0_293 = arith.constant 0 : index
    %430 = vector.load %arg4[%c0_292, %c0_293] : memref<1x64xf32, #tpu.memory_space<vmem>>, vector<1x64xf32>
    %c0_294 = arith.constant 0 : index
    %c0_295 = arith.constant 0 : index
    %c0_296 = arith.constant 0 : index
    %c0_297 = arith.constant 0 : index
    %431 = vector.load %arg12[%c0_294, %c0_295, %c0_296, %c0_297] : memref<2x3x3x512xf32, #tpu.memory_space<vmem>>, vector<1x1x3x512xf32>
    %432 = vector.shape_cast %431 : vector<1x1x3x512xf32> to vector<3x512xf32>
    %433 = arith.truncf %432 : vector<3x512xf32> to vector<3x512xbf16>
    %cst_298 = arith.constant dense<0.000000e+00> : vector<3x64xf32>
    %434 = tpu.matmul %433, %429, %cst_298 {dimension_numbers = #tpu.dot_dimension_numbers<[1], [0], [0], [1], [0, 0, 1, 1], [], []>} : vector<3x512xbf16>, vector<512x64xbf16>, vector<3x64xf32> -> vector<3x64xf32>
    %435 = vector.broadcast %430 : vector<1x64xf32> to vector<3x64xf32>
    %436 = arith.addf %434, %435 : vector<3x64xf32>
    %cst_299 = arith.constant 0.000000e+00 : f32
    %437 = vector.broadcast %cst_299 : f32 to vector<3x64xf32>
    %438 = arith.maximumf %436, %437 : vector<3x64xf32>
    %c0_300 = arith.constant 0 : index
    %c1_301 = arith.constant 1 : index
    %c1_302 = arith.constant 1 : index
    %c0_303 = arith.constant 0 : index
    %439 = vector.load %arg11[%c0_300, %c1_301, %c1_302, %c0_303] : memref<2x5x5x64xf32, #tpu.memory_space<vmem>>, vector<1x1x3x64xf32>
    %440 = vector.shape_cast %439 : vector<1x1x3x64xf32> to vector<3x64xf32>
    %441 = vector.shape_cast %438 : vector<3x64xf32> to vector<1x1x3x64xf32>
    tpu.vector_store %arg11[%c0_300, %c1_301, %c1_302, %c0_303], %441 {strides = array<i32>} : memref<2x5x5x64xf32, #tpu.memory_space<vmem>>, vector<1x1x3x64xf32>,
    %c0_304 = arith.constant 0 : index
    %c1_305 = arith.constant 1 : index
    %c0_306 = arith.constant 0 : index
    %c0_307 = arith.constant 0 : index
    %442 = vector.load %arg12[%c0_304, %c1_305, %c0_306, %c0_307] : memref<2x3x3x512xf32, #tpu.memory_space<vmem>>, vector<1x1x3x512xf32>
    %443 = vector.shape_cast %442 : vector<1x1x3x512xf32> to vector<3x512xf32>
    %444 = arith.truncf %443 : vector<3x512xf32> to vector<3x512xbf16>
    %cst_308 = arith.constant dense<0.000000e+00> : vector<3x64xf32>
    %445 = tpu.matmul %444, %429, %cst_308 {dimension_numbers = #tpu.dot_dimension_numbers<[1], [0], [0], [1], [0, 0, 1, 1], [], []>} : vector<3x512xbf16>, vector<512x64xbf16>, vector<3x64xf32> -> vector<3x64xf32>
    %446 = vector.broadcast %430 : vector<1x64xf32> to vector<3x64xf32>
    %447 = arith.addf %445, %446 : vector<3x64xf32>
    %cst_309 = arith.constant 0.000000e+00 : f32
    %448 = vector.broadcast %cst_309 : f32 to vector<3x64xf32>
    %449 = arith.maximumf %447, %448 : vector<3x64xf32>
    %c0_310 = arith.constant 0 : index
    %c2_311 = arith.constant 2 : index
    %c1_312 = arith.constant 1 : index
    %c0_313 = arith.constant 0 : index
    %450 = vector.load %arg11[%c0_310, %c2_311, %c1_312, %c0_313] : memref<2x5x5x64xf32, #tpu.memory_space<vmem>>, vector<1x1x3x64xf32>
    %451 = vector.shape_cast %450 : vector<1x1x3x64xf32> to vector<3x64xf32>
    %452 = vector.shape_cast %449 : vector<3x64xf32> to vector<1x1x3x64xf32>
    tpu.vector_store %arg11[%c0_310, %c2_311, %c1_312, %c0_313], %452 {strides = array<i32>} : memref<2x5x5x64xf32, #tpu.memory_space<vmem>>, vector<1x1x3x64xf32>,
    %c0_314 = arith.constant 0 : index
    %c2_315 = arith.constant 2 : index
    %c0_316 = arith.constant 0 : index
    %c0_317 = arith.constant 0 : index
    %453 = vector.load %arg12[%c0_314, %c2_315, %c0_316, %c0_317] : memref<2x3x3x512xf32, #tpu.memory_space<vmem>>, vector<1x1x3x512xf32>
    %454 = vector.shape_cast %453 : vector<1x1x3x512xf32> to vector<3x512xf32>
    %455 = arith.truncf %454 : vector<3x512xf32> to vector<3x512xbf16>
    %cst_318 = arith.constant dense<0.000000e+00> : vector<3x64xf32>
    %456 = tpu.matmul %455, %429, %cst_318 {dimension_numbers = #tpu.dot_dimension_numbers<[1], [0], [0], [1], [0, 0, 1, 1], [], []>} : vector<3x512xbf16>, vector<512x64xbf16>, vector<3x64xf32> -> vector<3x64xf32>
    %457 = vector.broadcast %430 : vector<1x64xf32> to vector<3x64xf32>
    %458 = arith.addf %456, %457 : vector<3x64xf32>
    %cst_319 = arith.constant 0.000000e+00 : f32
    %459 = vector.broadcast %cst_319 : f32 to vector<3x64xf32>
    %460 = arith.maximumf %458, %459 : vector<3x64xf32>
    %c0_320 = arith.constant 0 : index
    %c3_321 = arith.constant 3 : index
    %c1_322 = arith.constant 1 : index
    %c0_323 = arith.constant 0 : index
    %461 = vector.load %arg11[%c0_320, %c3_321, %c1_322, %c0_323] : memref<2x5x5x64xf32, #tpu.memory_space<vmem>>, vector<1x1x3x64xf32>
    %462 = vector.shape_cast %461 : vector<1x1x3x64xf32> to vector<3x64xf32>
    %463 = vector.shape_cast %460 : vector<3x64xf32> to vector<1x1x3x64xf32>
    tpu.vector_store %arg11[%c0_320, %c3_321, %c1_322, %c0_323], %463 {strides = array<i32>} : memref<2x5x5x64xf32, #tpu.memory_space<vmem>>, vector<1x1x3x64xf32>,
    %c1_324 = arith.constant 1 : index
    %c0_325 = arith.constant 0 : index
    %c0_326 = arith.constant 0 : index
    %c0_327 = arith.constant 0 : index
    %464 = vector.load %arg12[%c1_324, %c0_325, %c0_326, %c0_327] : memref<2x3x3x512xf32, #tpu.memory_space<vmem>>, vector<1x1x3x512xf32>
    %465 = vector.shape_cast %464 : vector<1x1x3x512xf32> to vector<3x512xf32>
    %466 = arith.truncf %465 : vector<3x512xf32> to vector<3x512xbf16>
    %cst_328 = arith.constant dense<0.000000e+00> : vector<3x64xf32>
    %467 = tpu.matmul %466, %429, %cst_328 {dimension_numbers = #tpu.dot_dimension_numbers<[1], [0], [0], [1], [0, 0, 1, 1], [], []>} : vector<3x512xbf16>, vector<512x64xbf16>, vector<3x64xf32> -> vector<3x64xf32>
    %468 = vector.broadcast %430 : vector<1x64xf32> to vector<3x64xf32>
    %469 = arith.addf %467, %468 : vector<3x64xf32>
    %cst_329 = arith.constant 0.000000e+00 : f32
    %470 = vector.broadcast %cst_329 : f32 to vector<3x64xf32>
    %471 = arith.maximumf %469, %470 : vector<3x64xf32>
    %c1_330 = arith.constant 1 : index
    %c1_331 = arith.constant 1 : index
    %c1_332 = arith.constant 1 : index
    %c0_333 = arith.constant 0 : index
    %472 = vector.load %arg11[%c1_330, %c1_331, %c1_332, %c0_333] : memref<2x5x5x64xf32, #tpu.memory_space<vmem>>, vector<1x1x3x64xf32>
    %473 = vector.shape_cast %472 : vector<1x1x3x64xf32> to vector<3x64xf32>
    %474 = vector.shape_cast %471 : vector<3x64xf32> to vector<1x1x3x64xf32>
    tpu.vector_store %arg11[%c1_330, %c1_331, %c1_332, %c0_333], %474 {strides = array<i32>} : memref<2x5x5x64xf32, #tpu.memory_space<vmem>>, vector<1x1x3x64xf32>,
    %c1_334 = arith.constant 1 : index
    %c1_335 = arith.constant 1 : index
    %c0_336 = arith.constant 0 : index
    %c0_337 = arith.constant 0 : index
    %475 = vector.load %arg12[%c1_334, %c1_335, %c0_336, %c0_337] : memref<2x3x3x512xf32, #tpu.memory_space<vmem>>, vector<1x1x3x512xf32>
    %476 = vector.shape_cast %475 : vector<1x1x3x512xf32> to vector<3x512xf32>
    %477 = arith.truncf %476 : vector<3x512xf32> to vector<3x512xbf16>
    %cst_338 = arith.constant dense<0.000000e+00> : vector<3x64xf32>
    %478 = tpu.matmul %477, %429, %cst_338 {dimension_numbers = #tpu.dot_dimension_numbers<[1], [0], [0], [1], [0, 0, 1, 1], [], []>} : vector<3x512xbf16>, vector<512x64xbf16>, vector<3x64xf32> -> vector<3x64xf32>
    %479 = vector.broadcast %430 : vector<1x64xf32> to vector<3x64xf32>
    %480 = arith.addf %478, %479 : vector<3x64xf32>
    %cst_339 = arith.constant 0.000000e+00 : f32
    %481 = vector.broadcast %cst_339 : f32 to vector<3x64xf32>
    %482 = arith.maximumf %480, %481 : vector<3x64xf32>
    %c1_340 = arith.constant 1 : index
    %c2_341 = arith.constant 2 : index
    %c1_342 = arith.constant 1 : index
    %c0_343 = arith.constant 0 : index
    %483 = vector.load %arg11[%c1_340, %c2_341, %c1_342, %c0_343] : memref<2x5x5x64xf32, #tpu.memory_space<vmem>>, vector<1x1x3x64xf32>
    %484 = vector.shape_cast %483 : vector<1x1x3x64xf32> to vector<3x64xf32>
    %485 = vector.shape_cast %482 : vector<3x64xf32> to vector<1x1x3x64xf32>
    tpu.vector_store %arg11[%c1_340, %c2_341, %c1_342, %c0_343], %485 {strides = array<i32>} : memref<2x5x5x64xf32, #tpu.memory_space<vmem>>, vector<1x1x3x64xf32>,
    %c1_344 = arith.constant 1 : index
    %c2_345 = arith.constant 2 : index
    %c0_346 = arith.constant 0 : index
    %c0_347 = arith.constant 0 : index
    %486 = vector.load %arg12[%c1_344, %c2_345, %c0_346, %c0_347] : memref<2x3x3x512xf32, #tpu.memory_space<vmem>>, vector<1x1x3x512xf32>
    %487 = vector.shape_cast %486 : vector<1x1x3x512xf32> to vector<3x512xf32>
    %488 = arith.truncf %487 : vector<3x512xf32> to vector<3x512xbf16>
    %cst_348 = arith.constant dense<0.000000e+00> : vector<3x64xf32>
    %489 = tpu.matmul %488, %429, %cst_348 {dimension_numbers = #tpu.dot_dimension_numbers<[1], [0], [0], [1], [0, 0, 1, 1], [], []>} : vector<3x512xbf16>, vector<512x64xbf16>, vector<3x64xf32> -> vector<3x64xf32>
    %490 = vector.broadcast %430 : vector<1x64xf32> to vector<3x64xf32>
    %491 = arith.addf %489, %490 : vector<3x64xf32>
    %cst_349 = arith.constant 0.000000e+00 : f32
    %492 = vector.broadcast %cst_349 : f32 to vector<3x64xf32>
    %493 = arith.maximumf %491, %492 : vector<3x64xf32>
    %c1_350 = arith.constant 1 : index
    %c3_351 = arith.constant 3 : index
    %c1_352 = arith.constant 1 : index
    %c0_353 = arith.constant 0 : index
    %494 = vector.load %arg11[%c1_350, %c3_351, %c1_352, %c0_353] : memref<2x5x5x64xf32, #tpu.memory_space<vmem>>, vector<1x1x3x64xf32>
    %495 = vector.shape_cast %494 : vector<1x1x3x64xf32> to vector<3x64xf32>
    %496 = vector.shape_cast %493 : vector<3x64xf32> to vector<1x1x3x64xf32>
    tpu.vector_store %arg11[%c1_350, %c3_351, %c1_352, %c0_353], %496 {strides = array<i32>} : memref<2x5x5x64xf32, #tpu.memory_space<vmem>>, vector<1x1x3x64xf32>,
    %c0_354 = arith.constant 0 : index
    %c0_355 = arith.constant 0 : index
    %c0_356 = arith.constant 0 : index
    %c0_357 = arith.constant 0 : index
    %497 = vector.load %arg11[%c0_354, %c0_355, %c0_356, %c0_357] : memref<2x5x5x64xf32, #tpu.memory_space<vmem>>, vector<2x3x3x64xf32>
    %c0_358 = arith.constant 0 : index
    %c0_359 = arith.constant 0 : index
    %c0_360 = arith.constant 0 : index
    %c0_361 = arith.constant 0 : index
    %498 = vector.load %arg13[%c0_358, %c0_359, %c0_360, %c0_361] : memref<2x3x3x576xf32, #tpu.memory_space<vmem>>, vector<2x3x3x64xf32>
    tpu.vector_store %arg13[%c0_358, %c0_359, %c0_360, %c0_361], %497 {strides = array<i32>} : memref<2x3x3x576xf32, #tpu.memory_space<vmem>>, vector<2x3x3x64xf32>,
    %c0_362 = arith.constant 0 : index
    %c0_363 = arith.constant 0 : index
    %c1_364 = arith.constant 1 : index
    %c0_365 = arith.constant 0 : index
    %499 = vector.load %arg11[%c0_362, %c0_363, %c1_364, %c0_365] : memref<2x5x5x64xf32, #tpu.memory_space<vmem>>, vector<2x3x3x64xf32>
    %c0_366 = arith.constant 0 : index
    %c0_367 = arith.constant 0 : index
    %c0_368 = arith.constant 0 : index
    %c64_369 = arith.constant 64 : index
    %500 = vector.load %arg13[%c0_366, %c0_367, %c0_368, %c64_369] : memref<2x3x3x576xf32, #tpu.memory_space<vmem>>, vector<2x3x3x64xf32>
    tpu.vector_store %arg13[%c0_366, %c0_367, %c0_368, %c64_369], %499 {strides = array<i32>} : memref<2x3x3x576xf32, #tpu.memory_space<vmem>>, vector<2x3x3x64xf32>,
    %c0_370 = arith.constant 0 : index
    %c0_371 = arith.constant 0 : index
    %c2_372 = arith.constant 2 : index
    %c0_373 = arith.constant 0 : index
    %501 = vector.load %arg11[%c0_370, %c0_371, %c2_372, %c0_373] : memref<2x5x5x64xf32, #tpu.memory_space<vmem>>, vector<2x3x3x64xf32>
    %c0_374 = arith.constant 0 : index
    %c0_375 = arith.constant 0 : index
    %c0_376 = arith.constant 0 : index
    %c128_377 = arith.constant 128 : index
    %502 = vector.load %arg13[%c0_374, %c0_375, %c0_376, %c128_377] : memref<2x3x3x576xf32, #tpu.memory_space<vmem>>, vector<2x3x3x64xf32>
    tpu.vector_store %arg13[%c0_374, %c0_375, %c0_376, %c128_377], %501 {strides = array<i32>} : memref<2x3x3x576xf32, #tpu.memory_space<vmem>>, vector<2x3x3x64xf32>,
    %c0_378 = arith.constant 0 : index
    %c1_379 = arith.constant 1 : index
    %c0_380 = arith.constant 0 : index
    %c0_381 = arith.constant 0 : index
    %503 = vector.load %arg11[%c0_378, %c1_379, %c0_380, %c0_381] : memref<2x5x5x64xf32, #tpu.memory_space<vmem>>, vector<2x3x3x64xf32>
    %c0_382 = arith.constant 0 : index
    %c0_383 = arith.constant 0 : index
    %c0_384 = arith.constant 0 : index
    %c192_385 = arith.constant 192 : index
    %504 = vector.load %arg13[%c0_382, %c0_383, %c0_384, %c192_385] : memref<2x3x3x576xf32, #tpu.memory_space<vmem>>, vector<2x3x3x64xf32>
    tpu.vector_store %arg13[%c0_382, %c0_383, %c0_384, %c192_385], %503 {strides = array<i32>} : memref<2x3x3x576xf32, #tpu.memory_space<vmem>>, vector<2x3x3x64xf32>,
    %c0_386 = arith.constant 0 : index
    %c1_387 = arith.constant 1 : index
    %c1_388 = arith.constant 1 : index
    %c0_389 = arith.constant 0 : index
    %505 = vector.load %arg11[%c0_386, %c1_387, %c1_388, %c0_389] : memref<2x5x5x64xf32, #tpu.memory_space<vmem>>, vector<2x3x3x64xf32>
    %c0_390 = arith.constant 0 : index
    %c0_391 = arith.constant 0 : index
    %c0_392 = arith.constant 0 : index
    %c256_393 = arith.constant 256 : index
    %506 = vector.load %arg13[%c0_390, %c0_391, %c0_392, %c256_393] : memref<2x3x3x576xf32, #tpu.memory_space<vmem>>, vector<2x3x3x64xf32>
    tpu.vector_store %arg13[%c0_390, %c0_391, %c0_392, %c256_393], %505 {strides = array<i32>} : memref<2x3x3x576xf32, #tpu.memory_space<vmem>>, vector<2x3x3x64xf32>,
    %c0_394 = arith.constant 0 : index
    %c1_395 = arith.constant 1 : index
    %c2_396 = arith.constant 2 : index
    %c0_397 = arith.constant 0 : index
    %507 = vector.load %arg11[%c0_394, %c1_395, %c2_396, %c0_397] : memref<2x5x5x64xf32, #tpu.memory_space<vmem>>, vector<2x3x3x64xf32>
    %c0_398 = arith.constant 0 : index
    %c0_399 = arith.constant 0 : index
    %c0_400 = arith.constant 0 : index
    %c320_401 = arith.constant 320 : index
    %508 = vector.load %arg13[%c0_398, %c0_399, %c0_400, %c320_401] : memref<2x3x3x576xf32, #tpu.memory_space<vmem>>, vector<2x3x3x64xf32>
    tpu.vector_store %arg13[%c0_398, %c0_399, %c0_400, %c320_401], %507 {strides = array<i32>} : memref<2x3x3x576xf32, #tpu.memory_space<vmem>>, vector<2x3x3x64xf32>,
    %c0_402 = arith.constant 0 : index
    %c2_403 = arith.constant 2 : index
    %c0_404 = arith.constant 0 : index
    %c0_405 = arith.constant 0 : index
    %509 = vector.load %arg11[%c0_402, %c2_403, %c0_404, %c0_405] : memref<2x5x5x64xf32, #tpu.memory_space<vmem>>, vector<2x3x3x64xf32>
    %c0_406 = arith.constant 0 : index
    %c0_407 = arith.constant 0 : index
    %c0_408 = arith.constant 0 : index
    %c384_409 = arith.constant 384 : index
    %510 = vector.load %arg13[%c0_406, %c0_407, %c0_408, %c384_409] : memref<2x3x3x576xf32, #tpu.memory_space<vmem>>, vector<2x3x3x64xf32>
    tpu.vector_store %arg13[%c0_406, %c0_407, %c0_408, %c384_409], %509 {strides = array<i32>} : memref<2x3x3x576xf32, #tpu.memory_space<vmem>>, vector<2x3x3x64xf32>,
    %c0_410 = arith.constant 0 : index
    %c2_411 = arith.constant 2 : index
    %c1_412 = arith.constant 1 : index
    %c0_413 = arith.constant 0 : index
    %511 = vector.load %arg11[%c0_410, %c2_411, %c1_412, %c0_413] : memref<2x5x5x64xf32, #tpu.memory_space<vmem>>, vector<2x3x3x64xf32>
    %c0_414 = arith.constant 0 : index
    %c0_415 = arith.constant 0 : index
    %c0_416 = arith.constant 0 : index
    %c448_417 = arith.constant 448 : index
    %512 = vector.load %arg13[%c0_414, %c0_415, %c0_416, %c448_417] : memref<2x3x3x576xf32, #tpu.memory_space<vmem>>, vector<2x3x3x64xf32>
    tpu.vector_store %arg13[%c0_414, %c0_415, %c0_416, %c448_417], %511 {strides = array<i32>} : memref<2x3x3x576xf32, #tpu.memory_space<vmem>>, vector<2x3x3x64xf32>,
    %c0_418 = arith.constant 0 : index
    %c2_419 = arith.constant 2 : index
    %c2_420 = arith.constant 2 : index
    %c0_421 = arith.constant 0 : index
    %513 = vector.load %arg11[%c0_418, %c2_419, %c2_420, %c0_421] : memref<2x5x5x64xf32, #tpu.memory_space<vmem>>, vector<2x3x3x64xf32>
    %c0_422 = arith.constant 0 : index
    %c0_423 = arith.constant 0 : index
    %c0_424 = arith.constant 0 : index
    %c512 = arith.constant 512 : index
    %514 = vector.load %arg13[%c0_422, %c0_423, %c0_424, %c512] : memref<2x3x3x576xf32, #tpu.memory_space<vmem>>, vector<2x3x3x64xf32>
    tpu.vector_store %arg13[%c0_422, %c0_423, %c0_424, %c512], %513 {strides = array<i32>} : memref<2x3x3x576xf32, #tpu.memory_space<vmem>>, vector<2x3x3x64xf32>,
    %c0_425 = arith.constant 0 : index
    %c0_426 = arith.constant 0 : index
    %515 = vector.load %arg5[%c0_425, %c0_426] : memref<576x64xbf16, #tpu.memory_space<vmem>>, vector<576x64xbf16>
    %c0_427 = arith.constant 0 : index
    %c0_428 = arith.constant 0 : index
    %516 = vector.load %arg6[%c0_427, %c0_428] : memref<1x64xf32, #tpu.memory_space<vmem>>, vector<1x64xf32>
    %cst_429 = arith.constant 0.000000e+00 : f32
    %517 = vector.broadcast %cst_429 : f32 to vector<3x64xf32>
    %c0_430 = arith.constant 0 : index
    %c0_431 = arith.constant 0 : index
    %c0_432 = arith.constant 0 : index
    %c0_433 = arith.constant 0 : index
    %518 = vector.load %arg13[%c0_430, %c0_431, %c0_432, %c0_433] : memref<2x3x3x576xf32, #tpu.memory_space<vmem>>, vector<1x1x3x576xf32>
    %519 = vector.shape_cast %518 : vector<1x1x3x576xf32> to vector<3x576xf32>
    %520 = arith.truncf %519 : vector<3x576xf32> to vector<3x576xbf16>
    %cst_434 = arith.constant dense<0.000000e+00> : vector<3x64xf32>
    %521 = tpu.matmul %520, %515, %cst_434 {dimension_numbers = #tpu.dot_dimension_numbers<[1], [0], [0], [1], [0, 0, 1, 1], [], []>} : vector<3x576xbf16>, vector<576x64xbf16>, vector<3x64xf32> -> vector<3x64xf32>
    %522 = vector.broadcast %516 : vector<1x64xf32> to vector<3x64xf32>
    %523 = arith.addf %521, %522 : vector<3x64xf32>
    %cst_435 = arith.constant 0.000000e+00 : f32
    %524 = vector.broadcast %cst_435 : f32 to vector<3x64xf32>
    %525 = arith.maximumf %523, %524 : vector<3x64xf32>
    %526 = arith.addf %517, %525 : vector<3x64xf32>
    %c0_436 = arith.constant 0 : index
    %c1_437 = arith.constant 1 : index
    %c0_438 = arith.constant 0 : index
    %c0_439 = arith.constant 0 : index
    %527 = vector.load %arg13[%c0_436, %c1_437, %c0_438, %c0_439] : memref<2x3x3x576xf32, #tpu.memory_space<vmem>>, vector<1x1x3x576xf32>
    %528 = vector.shape_cast %527 : vector<1x1x3x576xf32> to vector<3x576xf32>
    %529 = arith.truncf %528 : vector<3x576xf32> to vector<3x576xbf16>
    %cst_440 = arith.constant dense<0.000000e+00> : vector<3x64xf32>
    %530 = tpu.matmul %529, %515, %cst_440 {dimension_numbers = #tpu.dot_dimension_numbers<[1], [0], [0], [1], [0, 0, 1, 1], [], []>} : vector<3x576xbf16>, vector<576x64xbf16>, vector<3x64xf32> -> vector<3x64xf32>
    %531 = vector.broadcast %516 : vector<1x64xf32> to vector<3x64xf32>
    %532 = arith.addf %530, %531 : vector<3x64xf32>
    %cst_441 = arith.constant 0.000000e+00 : f32
    %533 = vector.broadcast %cst_441 : f32 to vector<3x64xf32>
    %534 = arith.maximumf %532, %533 : vector<3x64xf32>
    %535 = arith.addf %526, %534 : vector<3x64xf32>
    %c0_442 = arith.constant 0 : index
    %c2_443 = arith.constant 2 : index
    %c0_444 = arith.constant 0 : index
    %c0_445 = arith.constant 0 : index
    %536 = vector.load %arg13[%c0_442, %c2_443, %c0_444, %c0_445] : memref<2x3x3x576xf32, #tpu.memory_space<vmem>>, vector<1x1x3x576xf32>
    %537 = vector.shape_cast %536 : vector<1x1x3x576xf32> to vector<3x576xf32>
    %538 = arith.truncf %537 : vector<3x576xf32> to vector<3x576xbf16>
    %cst_446 = arith.constant dense<0.000000e+00> : vector<3x64xf32>
    %539 = tpu.matmul %538, %515, %cst_446 {dimension_numbers = #tpu.dot_dimension_numbers<[1], [0], [0], [1], [0, 0, 1, 1], [], []>} : vector<3x576xbf16>, vector<576x64xbf16>, vector<3x64xf32> -> vector<3x64xf32>
    %540 = vector.broadcast %516 : vector<1x64xf32> to vector<3x64xf32>
    %541 = arith.addf %539, %540 : vector<3x64xf32>
    %cst_447 = arith.constant 0.000000e+00 : f32
    %542 = vector.broadcast %cst_447 : f32 to vector<3x64xf32>
    %543 = arith.maximumf %541, %542 : vector<3x64xf32>
    %544 = arith.addf %535, %543 : vector<3x64xf32>
    %cst_448 = arith.constant dense<0.000000e+00> : vector<64xf32>
    %545 = vector.multi_reduction <add>, %544, %cst_448 [0] : vector<3x64xf32> to vector<64xf32>
    %546 = vector.shape_cast %545 : vector<64xf32> to vector<1x64xf32>
    %cst_449 = arith.constant 0.111111112 : f32
    %547 = vector.broadcast %cst_449 : f32 to vector<1x64xf32>
    %548 = arith.mulf %546, %547 : vector<1x64xf32>
    %cst_450 = arith.constant 0.000000e+00 : f32
    %549 = vector.broadcast %cst_450 : f32 to vector<3x64xf32>
    %c1_451 = arith.constant 1 : index
    %c0_452 = arith.constant 0 : index
    %c0_453 = arith.constant 0 : index
    %c0_454 = arith.constant 0 : index
    %550 = vector.load %arg13[%c1_451, %c0_452, %c0_453, %c0_454] : memref<2x3x3x576xf32, #tpu.memory_space<vmem>>, vector<1x1x3x576xf32>
    %551 = vector.shape_cast %550 : vector<1x1x3x576xf32> to vector<3x576xf32>
    %552 = arith.truncf %551 : vector<3x576xf32> to vector<3x576xbf16>
    %cst_455 = arith.constant dense<0.000000e+00> : vector<3x64xf32>
    %553 = tpu.matmul %552, %515, %cst_455 {dimension_numbers = #tpu.dot_dimension_numbers<[1], [0], [0], [1], [0, 0, 1, 1], [], []>} : vector<3x576xbf16>, vector<576x64xbf16>, vector<3x64xf32> -> vector<3x64xf32>
    %554 = vector.broadcast %516 : vector<1x64xf32> to vector<3x64xf32>
    %555 = arith.addf %553, %554 : vector<3x64xf32>
    %cst_456 = arith.constant 0.000000e+00 : f32
    %556 = vector.broadcast %cst_456 : f32 to vector<3x64xf32>
    %557 = arith.maximumf %555, %556 : vector<3x64xf32>
    %558 = arith.addf %549, %557 : vector<3x64xf32>
    %c1_457 = arith.constant 1 : index
    %c1_458 = arith.constant 1 : index
    %c0_459 = arith.constant 0 : index
    %c0_460 = arith.constant 0 : index
    %559 = vector.load %arg13[%c1_457, %c1_458, %c0_459, %c0_460] : memref<2x3x3x576xf32, #tpu.memory_space<vmem>>, vector<1x1x3x576xf32>
    %560 = vector.shape_cast %559 : vector<1x1x3x576xf32> to vector<3x576xf32>
    %561 = arith.truncf %560 : vector<3x576xf32> to vector<3x576xbf16>
    %cst_461 = arith.constant dense<0.000000e+00> : vector<3x64xf32>
    %562 = tpu.matmul %561, %515, %cst_461 {dimension_numbers = #tpu.dot_dimension_numbers<[1], [0], [0], [1], [0, 0, 1, 1], [], []>} : vector<3x576xbf16>, vector<576x64xbf16>, vector<3x64xf32> -> vector<3x64xf32>
    %563 = vector.broadcast %516 : vector<1x64xf32> to vector<3x64xf32>
    %564 = arith.addf %562, %563 : vector<3x64xf32>
    %cst_462 = arith.constant 0.000000e+00 : f32
    %565 = vector.broadcast %cst_462 : f32 to vector<3x64xf32>
    %566 = arith.maximumf %564, %565 : vector<3x64xf32>
    %567 = arith.addf %558, %566 : vector<3x64xf32>
    %c1_463 = arith.constant 1 : index
    %c2_464 = arith.constant 2 : index
    %c0_465 = arith.constant 0 : index
    %c0_466 = arith.constant 0 : index
    %568 = vector.load %arg13[%c1_463, %c2_464, %c0_465, %c0_466] : memref<2x3x3x576xf32, #tpu.memory_space<vmem>>, vector<1x1x3x576xf32>
    %569 = vector.shape_cast %568 : vector<1x1x3x576xf32> to vector<3x576xf32>
    %570 = arith.truncf %569 : vector<3x576xf32> to vector<3x576xbf16>
    %cst_467 = arith.constant dense<0.000000e+00> : vector<3x64xf32>
    %571 = tpu.matmul %570, %515, %cst_467 {dimension_numbers = #tpu.dot_dimension_numbers<[1], [0], [0], [1], [0, 0, 1, 1], [], []>} : vector<3x576xbf16>, vector<576x64xbf16>, vector<3x64xf32> -> vector<3x64xf32>
    %572 = vector.broadcast %516 : vector<1x64xf32> to vector<3x64xf32>
    %573 = arith.addf %571, %572 : vector<3x64xf32>
    %cst_468 = arith.constant 0.000000e+00 : f32
    %574 = vector.broadcast %cst_468 : f32 to vector<3x64xf32>
    %575 = arith.maximumf %573, %574 : vector<3x64xf32>
    %576 = arith.addf %567, %575 : vector<3x64xf32>
    %cst_469 = arith.constant dense<0.000000e+00> : vector<64xf32>
    %577 = vector.multi_reduction <add>, %576, %cst_469 [0] : vector<3x64xf32> to vector<64xf32>
    %578 = vector.shape_cast %577 : vector<64xf32> to vector<1x64xf32>
    %cst_470 = arith.constant 0.111111112 : f32
    %579 = vector.broadcast %cst_470 : f32 to vector<1x64xf32>
    %580 = arith.mulf %578, %579 : vector<1x64xf32>
    %581 = tpu.concatenate %548, %580 in 0 : vector<1x64xf32>, vector<1x64xf32> -> vector<2x64xf32>
    %582 = arith.truncf %581 : vector<2x64xf32> to vector<2x64xbf16>
    %c0_471 = arith.constant 0 : index
    %c0_472 = arith.constant 0 : index
    %583 = vector.load %arg7[%c0_471, %c0_472] : memref<64x128xbf16, #tpu.memory_space<vmem>>, vector<64x128xbf16>
    %cst_473 = arith.constant dense<0.000000e+00> : vector<2x128xf32>
    %584 = tpu.matmul %582, %583, %cst_473 {dimension_numbers = #tpu.dot_dimension_numbers<[1], [0], [0], [1], [0, 0, 1, 1], [], []>} : vector<2x64xbf16>, vector<64x128xbf16>, vector<2x128xf32> -> vector<2x128xf32>
    %c0_474 = arith.constant 0 : index
    %c0_475 = arith.constant 0 : index
    %585 = vector.load %arg8[%c0_474, %c0_475] : memref<1x128xf32, #tpu.memory_space<vmem>>, vector<1x128xf32>
    %586 = vector.broadcast %585 : vector<1x128xf32> to vector<2x128xf32>
    %587 = arith.addf %584, %586 : vector<2x128xf32>
    %cst_476 = arith.constant 0.000000e+00 : f32
    %588 = vector.broadcast %cst_476 : f32 to vector<2x128xf32>
    %589 = arith.maximumf %587, %588 : vector<2x128xf32>
    %c0_477 = arith.constant 0 : index
    %c0_478 = arith.constant 0 : index
    %590 = vector.load %arg9[%c0_477, %c0_478] : memref<2x128xf32, #tpu.memory_space<vmem>>, vector<2x128xf32>
    tpu.vector_store %arg9[%c0_477, %c0_478], %589 {strides = array<i32>} : memref<2x128xf32, #tpu.memory_space<vmem>>, vector<2x128xf32>,
    return
  }
}

</mosaic_0001>

<bundles_post_ra>
// kernel: cnn_feature_extractor.1
= control target key start
LH: loop header
LB: loop body
LE: loop exit
PB: predicated region body
PF: predicated region fallthrough
CT: control target
= control target key end

     0   :  { %v4431_v1 = vmov 0.0   ;;  %vm6250_vm0 = vmmov 0   ;;  %vm6249_vm1 = vcmask 523264   ;;  %s6239_s0 = inlined_call_operand.vmem [shape: f32[98,64], index: 0, kind: input, shape index: {}]   ;;  %s6240_s1 = inlined_call_operand.vmem [shape: bf16[64,32], index: 1, kind: input, shape index: {}]   ;;  %s6241_s2 = inlined_call_operand.vmem [shape: f32[1,32], index: 2, kind: input, shape index: {}]   ;;  %s6242_s3 = inlined_call_operand.vmem [shape: bf16[512,64], index: 3, kind: input, shape index: {}]   ;;  %s6243_s4 = inlined_call_operand.vmem [shape: f32[1,64], index: 4, kind: input, shape index: {}]   ;;  %s6244_s5 = inlined_call_operand.vmem [shape: bf16[576,64], index: 5, kind: input, shape index: {}]   ;;  %s6245_s6 = inlined_call_operand.vmem [shape: f32[1,64], index: 6, kind: input, shape index: {}]   ;;  %s6246_s7 = inlined_call_operand.vmem [shape: bf16[64,128], index: 7, kind: input, shape index: {}]   ;;  %s6247_s8 = inlined_call_operand.vmem [shape: f32[1,128], index: 8, kind: input, shape index: {}]   ;;  %s6248_s9 = inlined_call_operand.hbm [shape: f32[2,128], index: 9, kind: output, shape index: {}]  }
   0x1   :  { %v4274_v0 = vld [vmem:[%s6240_s1] sm:$0xff]   ;;  %4148 = vmatprep.subr.bf16.mxu0 %v4431_v1  ;;  %v4275_v2 = vld [vmem:[%s6240_s1 + $0x8] sm:$0xff]   ;;  %4156 = vmatprep.mubr.msk.bf16.mxu0 %vm6250_vm0, %v4431_v1  ;;  %v4276_v3 = vld [vmem:[%s6240_s1 + $0x10] sm:$0xff]  }
   0x2   :  { %4149 = vmatpush3.bf16.msra.mxu0 %v4274_v0  ;;  %v4277_v4 = vld [vmem:[%s6240_s1 + $0x18] sm:$0xff]   ;;  %v34_v5 = vld [vmem:[%s6239_s0] sm:$0xff]  ;;  %v35_v6 = vld [vmem:[%s6239_s0 + $0x8] sm:$0xff] }
   0x3   :  { %4150 = vmatprep.subr.bf16.mxu0 %v4431_v1  ;;  %v47_v7 = vpack.c.bf16 %v35_v6, %v34_v5  ;;  %v36_v8 = vld [vmem:[%s6239_s0 + $0x10] sm:$0xff]  ;;  %v37_v9 = vld [vmem:[%s6239_s0 + $0x18] sm:$0xff]  ;;  %v38_v11 = vld [vmem:[%s6239_s0 + $0x20] sm:$0xff] }
   0x4   :  { %v48_v10 = vpack.c.bf16 %v37_v9, %v36_v8  ;;  %v39_v12 = vld [vmem:[%s6239_s0 + $0x28] sm:$0xff]  ;;  %v40_v14 = vld [vmem:[%s6239_s0 + $0x30] sm:$0xff]  ;;  %v41_v15 = vld [vmem:[%s6239_s0 + $0x38] sm:$0xff] }
   0x5   :  { %v49_v13 = vpack.c.bf16 %v39_v12, %v38_v11  ;;  %v50_v16 = vpack.c.bf16 %v41_v15, %v40_v14  ;;  %v42_v17 = vld [vmem:[%s6239_s0 + $0x40] sm:$0xff]  ;;  %v43_v18 = vld [vmem:[%s6239_s0 + $0x48] sm:$0xff]  ;;  %v44_v20 = vld [vmem:[%s6239_s0 + $0x50] sm:$0xff] }
   0x6   :  { %4151 = vmatpush3.bf16.msra.mxu0 %v4275_v2  ;;  %v51_v19 = vpack.c.bf16 %v43_v18, %v42_v17  ;;  %v45_v21 = vld [vmem:[%s6239_s0 + $0x58] sm:$0xff] }
   0x7   :  { %4152 = vmatprep.subr.bf16.mxu0 %v4431_v1  ;;  %v52_v22 = vpack.c.bf16 %v45_v21, %v44_v20 }
   0xa   :  { %4153 = vmatpush3.bf16.msra.mxu0 %v4276_v3 }
   0xb   :  { %4154 = vmatprep.subr.bf16.mxu0 %v4431_v1 }
   0xe   :  { %4155 = vmatpush3.bf16.msra.mxu0 %v4277_v4 }
  0x11   :  { %4157 = vmatmul.mubr.msk.bf16.vlgmr.msra.gmra.mrb[0].mxu0 %vm6249_vm1, %v47_v7 }
  0x12   :  { %4160 = vmatprep.mubr.msk.bf16.mxu0 %vm6250_vm0, %v4431_v1 }
  0x19   :  { %4161 = vmatmul.mubr.msk.bf16.gmra.mrb[4].mxu0 %vm6249_vm1, %v48_v10 }
  0x1a   :  { %4164 = vmatprep.mubr.msk.bf16.mxu0 %vm6250_vm0, %v4431_v1 }
  0x21   :  { %4165 = vmatmul.mubr.msk.bf16.gmra.mrb[8].mxu0 %vm6249_vm1, %v49_v13 }
  0x22   :  { %4168 = vmatprep.mubr.msk.bf16.mxu0 %vm6250_vm0, %v4431_v1 }
  0x29   :  { %4169 = vmatmul.mubr.msk.bf16.gmra.mrb[12].mxu0 %vm6249_vm1, %v50_v16 }
  0x2a   :  { %4172 = vmatprep.mubr.msk.bf16.mxu0 %vm6250_vm0, %v4431_v1 }
  0x31   :  { %4173 = vmatmul.mubr.msk.bf16.gmra.mrb[16].mxu0 %vm6249_vm1, %v51_v19 }
  0x32   :  { %4176 = vmatprep.mubr.msk.bf16.mxu0 %vm6250_vm0, %v4431_v1 }
  0x33   :  { %14 = vsyncpa [#allocation7], 0  ;;  %v46_v23 = vld [vmem:[%s6239_s0 + $0x60] sm:$0x3]  ;;  %vm216_vm2 = vcmask 261120   ;;  %vm329_vm3 = vcmask 1040384  }
  0x34   :  { %v53_v24 = vpack.c.bf16 %v46_v23, %v46_v23  ;;  %220 = vst.msk [vmem:[#allocation2 + $0x10] sm:$0xff] %vm216_vm2, %v4431_v1  ;;  %222 = vst.msk [vmem:[#allocation2 + $0x20] sm:$0xff] %vm216_vm2, %v4431_v1  ;;  %vm332_vm4 = vcmask 1041408   ;;  %s4433_s0 = smov 32   ;;  %s4434_s21 = smov 64   ;;  %vm218_vm5 = vcmask 253952  }
  0x35   :  { %217 = vst.msk [vmem:[#allocation2] sm:$0xff] %vm216_vm2, %v4431_v1  ;;  %224 = vst.msk [vmem:[#allocation2 + $0x30] sm:$0xff] %vm216_vm2, %v4431_v1  ;;  %v4613_v35 = vld [vmem:[%s6242_s3 + $0x40] sm:$0xff]   ;;  %v4280_v37 = vld [vmem:[%s6242_s3 + $0x48] sm:$0xff]   ;;  %vm275_vm6 = vcmask 256000   ;;  %vm6253_vm7 = vcmask 518400  }
  0x36   :  { %226 = vst.msk [vmem:[#allocation2 + $0x40] sm:$0xff] %vm216_vm2, %v4431_v1  ;;  %228 = vst.msk [vmem:[#allocation2 + $0x50] sm:$0xff] %vm216_vm2, %v4431_v1  ;;  %v4279_v36 = vld [vmem:[%s6242_s3] sm:$0xff]   ;;  %3585 = vmatprep.subr.bf16.mxu1 %v4613_v35  ;;  %3629 = vmatprep.subr.bf16.mxu0 %v4613_v35  ;;  %v4281_v38 = vld [vmem:[%s6242_s3 + $0x8] sm:$0xff]   ;;  %vm6252_vm8 = vcmask 780800   ;;  %vm255_vm9 = vcmask 260096  }
  0x37   :  { %230 = vst.msk [vmem:[#allocation2 + $0x60] sm:$0xff] %vm216_vm2, %v4431_v1  ;;  %232 = vst.msk [vmem:[#allocation2 + $0x70] sm:$0xff] %vm216_vm2, %v4431_v1  ;;  %3586 = vmatpush3.bf16.msra.mxu1 %v4279_v36  ;;  %3630 = vmatpush3.bf16.msra.mxu0 %v4279_v36  ;;  %v4282_v39 = vld [vmem:[%s6242_s3 + $0x50] sm:$0xff]   ;;  %v4284_v43 = vld [vmem:[%s6242_s3 + $0x58] sm:$0xff]   ;;  %vm258_vm10 = vcmask 261127   ;;  %vm260_vm11 = vcmask 259072  }
  0x38   :  { %236 = vst.msk [vmem:[#allocation2 + $0x90] sm:$0xff] %vm216_vm2, %v4431_v1  ;;  %238 = vst.msk [vmem:[#allocation2 + $0xa0] sm:$0xff] %vm216_vm2, %v4431_v1  ;;  %3587 = vmatprep.subr.bf16.mxu1 %v4280_v37  ;;  %3631 = vmatprep.subr.bf16.mxu0 %v4280_v37  ;;  %v4283_v42 = vld [vmem:[%s6242_s3 + $0x10] sm:$0xff]   ;;  %v4285_v44 = vld [vmem:[%s6242_s3 + $0x18] sm:$0xff]   ;;  %vm263_vm12 = vcmask 261126   ;;  %vm265_vm13 = vcmask 258048  }
  0x39   :  { %4177 = vmatmul.mubr.msk.bf16.gmra.mrb[20].mxu0 %vm6249_vm1, %v52_v22  ;;  %240 = vst.msk [vmem:[#allocation2 + $0xb0] sm:$0xff] %vm216_vm2, %v4431_v1  ;;  %242 = vst.msk [vmem:[#allocation2 + $0xc0] sm:$0xff] %vm216_vm2, %v4431_v1  ;;  %v4645_v45 = vld [vmem:[%s6241_s2] ss:$0 sm:$0xff]  ;;  %v4288_v59 = vld [vmem:[%s6242_s3 + $0x68] sm:$0xff]   ;;  %vm268_vm14 = vcmask 261125  }
  0x3a   :  { %4180 = vmatprep.mubr.msk.bf16.mxu0 %vm6250_vm0, %v4431_v1  ;;  %244 = vst.msk [vmem:[#allocation2 + $0xd0] sm:$0xff] %vm216_vm2, %v4431_v1  ;;  %246 = vst.msk [vmem:[#allocation2 + $0xe0] sm:$0xff] %vm216_vm2, %v4431_v1  ;;  %v4286_v56 = vld [vmem:[%s6242_s3 + $0x60] sm:$0xff]   ;;  %v4289_v60 = vld [vmem:[%s6242_s3 + $0x28] sm:$0xff]   ;;  %vm270_vm15 = vcmask 257024   ;;  %vm280_vm0 = vcmask 254976  }
  0x3b   :  { %248 = vst.msk [vmem:[#allocation2 + $0xf0] sm:$0xff] %vm216_vm2, %v4431_v1  ;;  %250 = vst.msk [vmem:[#allocation2 + $0x100] sm:$0xff] %vm216_vm2, %v4431_v1  ;;  %3588 = vmatpush3.bf16.msra.mxu1 %v4281_v38  ;;  %3632 = vmatpush3.bf16.msra.mxu0 %v4281_v38  ;;  %v4287_v57 = vld [vmem:[%s6242_s3 + $0x20] sm:$0xff]   ;;  %vm273_vm2 = vcmask 261124   ;;  %v4290_v5 = vld [vmem:[%s6242_s3 + $0x70] sm:$0xff]   ;;  %s4435_s14 = smov 96  }
  0x3c   :  { %v4595_v25 = vld [vmem:[#allocation2] sm:$0xff]  ;;  %3589 = vmatprep.subr.bf16.mxu1 %v4282_v39  ;;  %3633 = vmatprep.subr.bf16.mxu0 %v4282_v39  ;;  %v4291_v6 = vld [vmem:[%s6242_s3 + $0x30] sm:$0xff]   ;;  %v4292_v21 = vld [vmem:[%s6242_s3 + $0x78] sm:$0xff]   ;;  %s4436_s20 = smov [#allocation6]  }
  0x3d   :  { %v321_v26 = vrot.slane %v4595_v25, 1  ;;  %v325_v27 = vrot.slane %v4595_v25, 2  ;;  %v337_v28 = vrot.slane %v4595_v25, 3  ;;  %v356_v30 = vrot.slane %v4595_v25, 4  ;;  %v4293_v22 = vld [vmem:[%s6242_s3 + $0x38] sm:$0xff]   ;;  %v4712_v39 = vld [vmem:[%s6242_s3 + $0xc0] sm:$0xff]  }
  0x3e   :  { %v375_v11 = vrot.slane %v4595_v25, 5  ;;  %s3472_s22 = sshll.u32 %s4436_s20, 4  ;;  %s3473_s22 = int_to_ptr.vmem [resolvable:$true] %s3472_s22 }
  0x3f   :  { %v341_v29 = vsel %vm329_vm3, %v321_v26, %v325_v27  ;;  %v360_v32 = vsel %vm329_vm3, %v325_v27, %v337_v28  ;;  %v4608_v34 = vsel %vm329_vm3, %v337_v28, %v356_v30  ;;  %v330_v40 = vsel %vm329_vm3, %v4595_v25, %v321_v26  ;;  %3590 = vmatpush3.bf16.msra.mxu1 %v4283_v42  ;;  %s4407_s23 = scalar_lea.vmem %s3473_s22, 32  ;;  %p4412_p1 = scmp.lt.s32.totalorder %s3473_s22, %s3473_s22 }
  0x40   :  { %v343_v31 = vsel %vm332_vm4, %v341_v29, %v337_v28  ;;  %v362_v33 = vsel %vm332_vm4, %v360_v32, %v356_v30  ;;  %v333_v41 = vsel %vm332_vm4, %v330_v40, %v325_v27  ;;  %3634 = vmatpush3.bf16.msra.mxu0 %v4283_v42  ;;  %3591 = vmatprep.subr.bf16.mxu1 %v4284_v43  ;;  %p4408_p0 = scmp.ne.s32.totalorder %s3473_s22, %s4407_s23  ;;  %p4413_p2 = scmp.lt.s32.totalorder %s4407_s23, %s4407_s23 }
  0x41   :  { %4181 = vmatmul.mubr.msk.bf16.gmra.mrb[24].mxu0 %vm6249_vm1, %v53_v24  ;;  %347 = vrot.lane.b32.xlu0 %v343_v31, %s4433_s0  ;;  %335 = vst.msk [vmem:[#allocation4] sm:$0x7] %vm275_vm6, %v333_v41  ;;  %v381_v27 = vsel %vm332_vm4, %v4608_v34, %v375_v11  ;;  %vm278_vm1 = vcmask 261123  }
  0x42   :  { %366 = vrot.lane.b32.xlu1 %v362_v33, %s4434_s21  ;;  %3635 = vmatprep.subr.bf16.mxu0 %v4284_v43  ;;  %p4414_p3 = por %p4413_p2, %p4412_p1 }
  0x43   :  { %3592 = vmatpush3.bf16.msra.mxu1 %v4285_v44 }
  0x44   :  { %3636 = vmatpush3.bf16.msra.mxu0 %v4285_v44  ;;  %3593 = vmatprep.subr.bf16.mxu1 %v4286_v56  ;;  %p4415_p4 = pnand %p4414_p3, %p4408_p0 }
  0x45   :  { %3637 = vmatprep.subr.bf16.mxu0 %v4286_v56 }
  0x47   :  { %3594 = vmatpush3.bf16.msra.mxu1 %v4287_v57 }
  0x48   :  { %3638 = vmatpush3.bf16.msra.mxu0 %v4287_v57  ;;  %3595 = vmatprep.subr.bf16.mxu1 %v4288_v59 }
  0x49   :  { %3639 = vmatprep.subr.bf16.mxu0 %v4288_v59 }
  0x4b   :  { %3596 = vmatpush3.bf16.msra.mxu1 %v4289_v60 }
  0x4c   :  { %3640 = vmatpush3.bf16.msra.mxu0 %v4289_v60  ;;  %3597 = vmatprep.subr.bf16.mxu1 %v4290_v5 }
  0x4d   :  { %3641 = vmatprep.subr.bf16.mxu0 %v4290_v5 }
  0x4f   :  { %3598 = vmatpush3.bf16.msra.mxu1 %v4291_v6 }
  0x50   :  { %3642 = vmatpush3.bf16.msra.mxu0 %v4291_v6  ;;  %3599 = vmatprep.subr.bf16.mxu1 %v4292_v21 }
  0x51   :  { %3643 = vmatprep.subr.bf16.mxu0 %v4292_v21 }
  0x53   :  { %3600 = vmatpush3.bf16.msra.mxu1 %v4293_v22 }
  0x54   :  { %3607 = vmatprep.subr.bf16.mxu1 %v4712_v39  ;;  %3644 = vmatpush3.bf16.msra.mxu0 %v4293_v22 }
  0x55   :  { %3673 = vmatprep.subr.bf16.mxu0 %v4613_v35 }
  0xb3   :  { %v348_v46 = vpop.permute.xlu0 %347 }
  0xb4   :  { %354 = vst.msk [vmem:[#allocation4] sm:$0x7] %vm6253_vm7, %v348_v46  ;;  %v367_v47 = vpop.permute.xlu1 %366  ;;  %vm287_vm7 = vcmask 261121  }
  0xb5   :  { %373 = vst.msk [vmem:[#allocation4] sm:$0x7] %vm6252_vm8, %v367_v47  ;;  %vm283_vm8 = vcmask 261122  }
  0xe4   :  { %v149_v48 = vpop.f32.mrb[0].mxu0 }
  0xe5   :  { %v150_v49 = vadd.f32 %v4645_v45, %v149_v48  ;;  %v4158_v50 = vpop.f32.mrb[1].mxu0 }
  0xe6   :  { %v152_v51 = vpop.f32.mrb[2].mxu0 }
  0xe7   :  { %v203_v52 = vmax.f32 %v150_v49, 0.0  ;;  %v153_v53 = vadd.f32 %v4645_v45, %v152_v51  ;;  %v4159_v54 = vpop.f32.mrb[3].mxu0 }
  0xe9   :  { %256 = vst.msk [vmem:[#allocation2 + $0x11] sm:$0x7f] %vm255_vm9, %v203_v52  ;;  %v204_v55 = vmax.f32 %v153_v53, 0.0 }
  0xea   :  { %259 = vst.msk [vmem:[#allocation2 + $0x1a] sm:$0x80] %vm258_vm10, %v203_v52 }
  0xeb   :  { %261 = vst.msk [vmem:[#allocation2 + $0x22] sm:$0x3f] %vm260_vm11, %v204_v55 }
  0xec   :  { %264 = vst.msk [vmem:[#allocation2 + $0x2b] sm:$0xc0] %vm263_vm12, %v204_v55  ;;  %v157_v58 = vpop.f32.mrb[4].mxu0 }
  0xed   :  { %v158_v61 = vadd.f32 %v4645_v45, %v157_v58  ;;  %v4162_v62 = vpop.f32.mrb[5].mxu0 }
  0xee   :  { %v160_v63 = vpop.f32.mrb[6].mxu0 }
  0xef   :  { %v205_v0 = vmax.f32 %v158_v61, 0.0  ;;  %v161_v2 = vadd.f32 %v4645_v45, %v160_v63  ;;  %v4163_v3 = vpop.f32.mrb[7].mxu0 }
  0xf0   :  { %v394_v4 = vld [vmem:[#allocation2 + $0x10] sm:$0xff] }
  0xf1   :  { %266 = vst.msk [vmem:[#allocation2 + $0x33] sm:$0x1f] %vm265_vm13, %v205_v0  ;;  %v402_v7 = vrot.slane %v394_v4, 2  ;;  %v412_v8 = vrot.slane %v394_v4, 3  ;;  %v430_v9 = vrot.slane %v394_v4, 4  ;;  %v398_v10 = vrot.slane %v394_v4, 1 }
  0xf2   :  { %269 = vst.msk [vmem:[#allocation2 + $0x3c] sm:$0xe0] %vm268_vm14, %v205_v0  ;;  %v206_v12 = vmax.f32 %v161_v2, 0.0  ;;  %v4678_v13 = vld [vmem:[#allocation2 + $0x20] sm:$0xff]  ;;  %v448_v19 = vrot.slane %v394_v4, 5 }
  0xf3   :  { %v434_v14 = vsel %vm329_vm3, %v402_v7, %v412_v8  ;;  %v416_v15 = vsel %vm329_vm3, %v398_v10, %v402_v7  ;;  %v470_v16 = vrot.slane %v4678_v13, 1  ;;  %v452_v23 = vsel %vm329_vm3, %v412_v8, %v430_v9 }
  0xf4   :  { %v436_v17 = vsel %vm332_vm4, %v434_v14, %v430_v9  ;;  %v418_v18 = vsel %vm332_vm4, %v416_v15, %v412_v8  ;;  %271 = vst.msk [vmem:[#allocation2 + $0x44] sm:$0xf] %vm270_vm15, %v206_v12  ;;  %v165_v20 = vpop.f32.mrb[8].mxu0  ;;  %v474_v24 = vrot.slane %v4678_v13, 2  ;;  %v406_v29 = vsel %vm329_vm3, %v394_v4, %v398_v10 }
  0xf5   :  { %274 = vst.msk [vmem:[#allocation2 + $0x4d] sm:$0xf0] %vm273_vm2, %v206_v12  ;;  %440 = vrot.lane.b32.xlu1 %v436_v17, %s4434_s21  ;;  %422 = vrot.lane.b32.xlu0 %v418_v18, %s4433_s0  ;;  %v166_v25 = vadd.f32 %v4645_v45, %v165_v20  ;;  %v4166_v26 = vpop.f32.mrb[9].mxu0  ;;  %v478_v32 = vsel %vm329_vm3, %v4678_v13, %v470_v16  ;;  %v484_v36 = vrot.slane %v4678_v13, 3  ;;  %v502_v48 = vrot.slane %v4678_v13, 4 }
  0xf6   :  { %v168_v28 = vpop.f32.mrb[10].mxu0  ;;  %v454_v33 = vsel %vm332_vm4, %v452_v23, %v448_v19  ;;  %v408_v38 = vsel %vm332_vm4, %v406_v29, %v402_v7  ;;  %v488_v40 = vsel %vm329_vm3, %v470_v16, %v474_v24  ;;  %v480_v46 = vsel %vm332_vm4, %v478_v32, %v474_v24 }
  0xf7   :  { %v207_v30 = vmax.f32 %v166_v25, 0.0  ;;  %v4167_v31 = vpop.f32.mrb[11].mxu0  ;;  %v169_v34 = vadd.f32 %v4645_v45, %v168_v28  ;;  %410 = vst.msk [vmem:[#allocation4 + $0x4] sm:$0x7] %vm275_vm6, %v408_v38  ;;  %482 = vst.msk [vmem:[#allocation4 + $0x8] sm:$0x7] %vm275_vm6, %v480_v46  ;;  %v490_v51 = vsel %vm332_vm4, %v488_v40, %v484_v36  ;;  %v506_v56 = vsel %vm329_vm3, %v474_v24, %v484_v36 }
  0xf8   :  { %v4705_v37 = vld [vmem:[#allocation2 + $0x30] sm:$0xff]  ;;  %627 = vst.msk [vmem:[#allocation4 + $0x10] sm:$0x7] %vm275_vm6, %v480_v46  ;;  %v520_v62 = vrot.slane %v4678_v13, 5  ;;  %v508_v3 = vsel %vm332_vm4, %v506_v56, %v502_v48  ;;  %v524_v8 = vsel %vm329_vm3, %v484_v36, %v502_v48 }
  0xf9   :  { %458 = vrot.lane.b32.xlu1 %v454_v33, %s4435_s14  ;;  %385 = vrot.lane.b32.xlu0 %v381_v27, %s4435_s14  ;;  %v542_v41 = vrot.slane %v4705_v37, 1  ;;  %v546_v42 = vrot.slane %v4705_v37, 2  ;;  %v556_v43 = vrot.slane %v4705_v37, 3  ;;  %276 = vst.msk [vmem:[#allocation2 + $0x55] sm:$0x7] %vm275_vm6, %v207_v30  ;;  %v208_v44 = vmax.f32 %v169_v34, 0.0 }
  0xfa   :  { %279 = vst.msk [vmem:[#allocation2 + $0x5e] sm:$0xf8] %vm278_vm1, %v207_v30  ;;  %v574_v53 = vrot.slane %v4705_v37, 4  ;;  %v592_v5 = vrot.slane %v4705_v37, 5  ;;  %v526_v15 = vsel %vm332_vm4, %v524_v8, %v520_v62 }
  0xfb   :  { %v560_v47 = vsel %vm329_vm3, %v542_v41, %v546_v42  ;;  %v4727_v49 = vld [vmem:[#allocation2 + $0x40] sm:$0xff]  ;;  %v550_v50 = vsel %vm329_vm3, %v4705_v37, %v542_v41  ;;  %281 = vst.msk [vmem:[#allocation2 + $0x66] sm:$0x3] %vm280_vm0, %v208_v44  ;;  %v578_v35 = vsel %vm329_vm3, %v546_v42, %v556_v43 }
  0xfc   :  { %v562_v52 = vsel %vm332_vm4, %v560_v47, %v556_v43  ;;  %v759_v54 = vrot.slane %v4727_v49, 1  ;;  %284 = vst.msk [vmem:[#allocation2 + $0x6f] sm:$0xfc] %vm283_vm8, %v208_v44  ;;  %v173_v55 = vpop.f32.mrb[12].mxu0  ;;  %v763_v59 = vrot.slane %v4727_v49, 2  ;;  %v552_v61 = vsel %vm332_vm4, %v550_v50, %v546_v42 }
  0xfd   :  { %494 = vrot.lane.b32.xlu0 %v490_v51, %s4433_s0  ;;  %566 = vrot.lane.b32.xlu1 %v562_v52, %s4433_s0  ;;  %v174_v57 = vadd.f32 %v4645_v45, %v173_v55  ;;  %v4170_v58 = vpop.f32.mrb[13].mxu0  ;;  %554 = vst.msk [vmem:[#allocation4 + $0xc] sm:$0x7] %vm275_vm6, %v552_v61  ;;  %699 = vst.msk [vmem:[#allocation4 + $0x14] sm:$0x7] %vm275_vm6, %v552_v61  ;;  %v580_v4 = vsel %vm332_vm4, %v578_v35, %v574_v53  ;;  %v773_v24 = vrot.slane %v4727_v49, 3 }
  0xfe   :  { %v176_v60 = vpop.f32.mrb[14].mxu0  ;;  %v767_v2 = vsel %vm329_vm3, %v4727_v49, %v759_v54  ;;  %v596_v9 = vsel %vm329_vm3, %v556_v43, %v574_v53  ;;  %v791_v28 = vrot.slane %v4727_v49, 4  ;;  %v777_v30 = vsel %vm329_vm3, %v759_v54, %v763_v59 }
  0xff   :  { %v209_v63 = vmax.f32 %v174_v57, 0.0  ;;  %v4171_v0 = vpop.f32.mrb[15].mxu0  ;;  %v177_v7 = vadd.f32 %v4645_v45, %v176_v60  ;;  %v769_v13 = vsel %vm332_vm4, %v767_v2, %v763_v59  ;;  %v598_v16 = vsel %vm332_vm4, %v596_v9, %v592_v5 }
 0x100   :  { %v4757_v6 = vld [vmem:[#allocation2 + $0x50] sm:$0xff]  ;;  %771 = vst.msk [vmem:[#allocation4 + $0x18] sm:$0x7] %vm275_vm6, %v769_v13  ;;  %916 = vst.msk [vmem:[#allocation4 + $0x20] sm:$0x7] %vm275_vm6, %v769_v13  ;;  %v795_v32 = vsel %vm329_vm3, %v763_v59, %v773_v24  ;;  %v809_v41 = vrot.slane %v4727_v49, 5  ;;  %v4811_v46 = vsel %vm332_vm4, %v777_v30, %v773_v24  ;;  %v813_v50 = vsel %vm329_vm3, %v773_v24, %v791_v28 }
 0x101   :  { %512 = vrot.lane.b32.xlu0 %v508_v3, %s4434_s21  ;;  %584 = vrot.lane.b32.xlu1 %v580_v4, %s4434_s21  ;;  %v831_v10 = vrot.slane %v4757_v6, 1  ;;  %285 = vst.msk [vmem:[#allocation2 + $0x77] sm:$0x1] %vm218_vm5, %v209_v63  ;;  %v835_v11 = vrot.slane %v4757_v6, 2  ;;  %v210_v12 = vmax.f32 %v177_v7, 0.0  ;;  %v845_v31 = vrot.slane %v4757_v6, 3 }
 0x102   :  { %288 = vst.msk [vmem:[#allocation2 + $0xa0] sm:$0xfe] %vm287_vm7, %v209_v63  ;;  %v4788_v25 = vld [vmem:[#allocation2 + $0x60] sm:$0xff]  ;;  %v4814_v47 = vsel %vm332_vm4, %v795_v32, %v791_v28  ;;  %v863_v48 = vrot.slane %v4757_v6, 4  ;;  %vm391_vm5 = vcmask 1043200  }
 0x103   :  { %v839_v14 = vsel %vm329_vm3, %v4757_v6, %v831_v10  ;;  %290 = vst.msk [vmem:[#allocation2 + $0xb1] sm:$0x7f] %vm255_vm9, %v210_v12  ;;  %v1048_v33 = vrot.slane %v4788_v25, 1  ;;  %v849_v37 = vsel %vm329_vm3, %v831_v10, %v835_v11  ;;  %v867_v54 = vsel %vm329_vm3, %v835_v11, %v845_v31 }
 0x104   :  { %292 = vst.msk [vmem:[#allocation2 + $0xba] sm:$0x80] %vm258_vm10, %v210_v12  ;;  %v181_v17 = vpop.f32.mrb[16].mxu0  ;;  %v841_v21 = vsel %vm332_vm4, %v839_v14, %v835_v11  ;;  %v4825_v53 = vsel %vm332_vm4, %v849_v37, %v845_v31  ;;  %v4834_v35 = vrot.slane %v4788_v25, 2 }
 0x105   :  { %530 = vrot.lane.b32.xlu0 %v526_v15, %s4435_s14  ;;  %602 = vrot.lane.b32.xlu1 %v598_v16, %s4435_s14  ;;  %v182_v18 = vadd.f32 %v4645_v45, %v181_v17  ;;  %v4174_v19 = vpop.f32.mrb[17].mxu0  ;;  %843 = vst.msk [vmem:[#allocation4 + $0x1c] sm:$0x7] %vm275_vm6, %v841_v21  ;;  %988 = vst.msk [vmem:[#allocation4 + $0x24] sm:$0x7] %vm275_vm6, %v841_v21  ;;  %v1056_v56 = vsel %vm329_vm3, %v4788_v25, %v1048_v33 }
 0x106   :  { %v184_v20 = vpop.f32.mrb[18].mxu0  ;;  %v1058_v5 = vsel %vm332_vm4, %v1056_v56, %v4834_v35  ;;  %v869_v17 = vsel %vm332_vm4, %v867_v54, %v863_v48  ;;  %v885_v19 = vsel %vm329_vm3, %v845_v31, %v863_v48 }
 0x107   :  { %v211_v22 = vmax.f32 %v182_v18, 0.0  ;;  %v4175_v23 = vpop.f32.mrb[19].mxu0  ;;  %v185_v26 = vadd.f32 %v4645_v45, %v184_v20  ;;  %1060 = vst.msk [vmem:[#allocation4 + $0x28] sm:$0x7] %vm275_vm6, %v1058_v5  ;;  %v881_v18 = vrot.slane %v4757_v6, 5 }
 0x108   :  { %v4801_v34 = vld [vmem:[#allocation2 + $0x70] sm:$0xff] }
 0x109   :  { %639 = vrot.lane.b32.xlu0 %v490_v51, %s4433_s0  ;;  %711 = vrot.lane.b32.xlu1 %v562_v52, %s4433_s0  ;;  %293 = vst.msk [vmem:[#allocation2 + $0xc2] sm:$0x3f] %vm260_vm11, %v211_v22  ;;  %v212_v38 = vmax.f32 %v185_v26, 0.0  ;;  %v4804_v42 = vld [vmem:[#allocation2 + $0xa0] sm:$0xff]  ;;  %v1120_v55 = vrot.slane %v4801_v34, 1  ;;  %v4837_v57 = vrot.slane %v4801_v34, 2  ;;  %v815_v26 = vsel %vm332_vm4, %v813_v50, %v809_v41 }
 0x10a   :  { %295 = vst.msk [vmem:[#allocation2 + $0xcb] sm:$0xc0] %vm263_vm12, %v211_v22  ;;  %v4818_v51 = vld [vmem:[#allocation2 + $0xb0] sm:$0xff]  ;;  %v399_v58 = vrot.slane %v4804_v42, 1  ;;  %v4841_v60 = vrot.slane %v4804_v42, 2  ;;  %v887_v30 = vsel %vm332_vm4, %v885_v19, %v881_v18 }
 0x10b   :  { %296 = vst.msk [vmem:[#allocation2 + $0xd3] sm:$0x1f] %vm265_vm13, %v212_v38  ;;  %v471_v61 = vrot.slane %v4818_v51, 1  ;;  %v4850_v2 = vrot.slane %v4818_v51, 2  ;;  %v1128_v8 = vsel %vm329_vm3, %v4801_v34, %v1120_v55 }
 0x10c   :  { %v189_v27 = vpop.f32.mrb[20].mxu0  ;;  %298 = vst.msk [vmem:[#allocation2 + $0xdc] sm:$0xe0] %vm268_vm14, %v212_v38  ;;  %v1130_v13 = vsel %vm332_vm4, %v1128_v8, %v4837_v57 }
 0x10d   :  { %657 = vrot.lane.b32.xlu0 %v508_v3, %s4434_s21  ;;  %729 = vrot.lane.b32.xlu1 %v580_v4, %s4434_s21  ;;  %v4178_v29 = vpop.f32.mrb[21].mxu0  ;;  %v190_v43 = vadd.f32 %v4645_v45, %v189_v27  ;;  %v479_v10 = vsel %vm329_vm3, %v4818_v51, %v471_v61  ;;  %1132 = vst.msk [vmem:[#allocation4 + $0x2c] sm:$0x7] %vm275_vm6, %v1130_v13  ;;  %v1134_v13 = vrot.slane %v4801_v34, 3 }
 0x10e   :  { %v192_v36 = vpop.f32.mrb[22].mxu0 }
 0x10f   :  { %v4179_v40 = vpop.f32.mrb[23].mxu0  ;;  %v193_v44 = vadd.f32 %v4645_v45, %v192_v36  ;;  %v213_v59 = vmax.f32 %v190_v43, 0.0 }
 0x110   :  { %v4820_v52 = vld [vmem:[#allocation2 + $0xc0] sm:$0xff] }
 0x111   :  { %675 = vrot.lane.b32.xlu0 %v526_v15, %s4435_s14  ;;  %747 = vrot.lane.b32.xlu1 %v598_v16, %s4435_s14  ;;  %v543_v62 = vrot.slane %v4820_v52, 1  ;;  %v214_v63 = vmax.f32 %v193_v44, 0.0  ;;  %v4853_v3 = vrot.slane %v4820_v52, 2  ;;  %299 = vst.msk [vmem:[#allocation2 + $0xe4] sm:$0xf] %vm270_vm15, %v213_v59  ;;  %v481_v16 = vsel %vm332_vm4, %v479_v10, %v4850_v2  ;;  %v4985_v10 = vld [vmem:[#allocation2 + $0x90] sm:$0xff] }
 0x112   :  { %301 = vst.msk [vmem:[#allocation2 + $0xed] sm:$0xf0] %vm273_vm2, %v213_v59  ;;  %v4888_v20 = vld [vmem:[#allocation2 + $0xd0] sm:$0xff]  ;;  %v322_v19 = vrot.slane %v4985_v10, 1 }
 0x113   :  { %302 = vst.msk [vmem:[#allocation2 + $0xf5] sm:$0x7] %vm275_vm6, %v214_v63  ;;  %v551_v11 = vsel %vm329_vm3, %v4820_v52, %v543_v62  ;;  %483 = vst.msk [vmem:[#allocation4 + $0x38] sm:$0x7] %vm275_vm6, %v481_v16  ;;  %v760_v6 = vrot.slane %v4888_v20, 1  ;;  %v764_v22 = vrot.slane %v4888_v20, 2 }
 0x114   :  { %v197_v0 = vpop.f32.mrb[24].mxu0  ;;  %304 = vst.msk [vmem:[#allocation2 + $0xfe] sm:$0xf8] %vm278_vm1, %v214_v63  ;;  %v553_v21 = vsel %vm332_vm4, %v551_v11, %v4853_v3  ;;  %v4902_v23 = vrot.slane %v4888_v20, 3  ;;  %v792_v24 = vrot.slane %v4888_v20, 4  ;;  %vm6255_vm1 = vcmask 780800  }
 0x115   :  { %783 = vrot.lane.b32.xlu0 %v4811_v46, %s4433_s0  ;;  %855 = vrot.lane.b32.xlu1 %v4825_v53, %s4433_s0  ;;  %v198_v4 = vadd.f32 %v4645_v45, %v197_v0  ;;  %v4182_v7 = vpop.f32.mrb[25].mxu0  ;;  %v407_v45 = vsel %vm329_vm3, %v4804_v42, %v399_v58  ;;  %628 = vst.msk [vmem:[#allocation4 + $0x40] sm:$0x7] %vm275_vm6, %v481_v16  ;;  %555 = vst.msk [vmem:[#allocation4 + $0x3c] sm:$0x7] %vm275_vm6, %v553_v21 }
 0x116   :  { %v200_v9 = vpop.f32.mrb[26].mxu0  ;;  %v409_v14 = vsel %vm332_vm4, %v407_v45, %v4841_v60  ;;  %700 = vst.msk [vmem:[#allocation4 + $0x44] sm:$0x7] %vm275_vm6, %v553_v21  ;;  %v778_v27 = vsel %vm329_vm3, %v760_v6, %v764_v22  ;;  %v796_v28 = vsel %vm329_vm3, %v764_v22, %v4902_v23  ;;  %v768_v29 = vsel %vm329_vm3, %v4888_v20, %v760_v6  ;;  %vm6258_vm8 = vmmov %vm6255_vm1 }
 0x117   :  { %v215_v12 = vmax.f32 %v198_v4, 0.0  ;;  %v4183_v15 = vpop.f32.mrb[27].mxu0  ;;  %411 = vst.msk [vmem:[#allocation4 + $0x34] sm:$0x7] %vm275_vm6, %v409_v14  ;;  %v4919_v31 = vsel %vm332_vm4, %v778_v27, %v4902_v23  ;;  %v4924_v49 = vsel %vm332_vm4, %v796_v28, %v792_v24  ;;  %v770_v32 = vsel %vm332_vm4, %v768_v29, %v764_v22  ;;  %vm6259_vm9 = vmmov %vm6255_vm1 }
 0x118   :  { %772 = vst.msk [vmem:[#allocation4 + $0x48] sm:$0x7] %vm275_vm6, %v770_v32  ;;  %917 = vst.msk [vmem:[#allocation4 + $0x50] sm:$0x7] %vm275_vm6, %v770_v32  ;;  %v4939_v43 = vld [vmem:[#allocation2 + $0xe0] sm:$0xff]  ;;  %v1062_v9 = vrot.slane %v4788_v25, 3  ;;  %v1066_v16 = vsel %vm329_vm3, %v1048_v33, %v4834_v35  ;;  %v331_v6 = vsel %vm329_vm3, %v4985_v10, %v322_v19  ;;  %v1156_v29 = vsel %vm329_vm3, %v4837_v57, %v1134_v13 }
 0x119   :  { %801 = vrot.lane.b32.xlu0 %v4814_v47, %s4434_s21  ;;  %873 = vrot.lane.b32.xlu1 %v869_v17, %s4434_s21  ;;  %305 = vst.msk [vmem:[#allocation2 + $0x106] sm:$0x3] %vm280_vm0, %v215_v12  ;;  %v4970_v7 = vrot.slane %v4939_v43, 2  ;;  %v326_v33 = vrot.slane %v4985_v10, 2  ;;  %v1080_v27 = vrot.slane %v4788_v25, 4  ;;  %v1152_v28 = vrot.slane %v4801_v34, 4  ;;  %vm6263_vm12 = vmmov %vm6255_vm1 }
 0x11a   :  { %v4929_v36 = vld [vmem:[#allocation2 + $0xf0] sm:$0xff]  ;;  %vm6254_vm0 = vcmask 518400   ;;  %vm6266_vm15 = vmmov %vm6255_vm1 }
 0x11b   :  { %v1049_v37 = vrot.slane %v4929_v36, 1  ;;  %v1053_v38 = vrot.slane %v4929_v36, 2  ;;  %v4936_v40 = vrot.slane %v4929_v36, 3  ;;  %v1081_v41 = vrot.slane %v4929_v36, 4  ;;  %vm6257_vm7 = vmmov %vm6254_vm0 }
 0x11c   :  { %v334_v22 = vsel %vm332_vm4, %v331_v6, %v326_v33  ;;  %v1158_v32 = vsel %vm332_vm4, %v1156_v29, %v1152_v28  ;;  %v503_v6 = vrot.slane %v4818_v51, 4  ;;  %v593_v29 = vrot.slane %v4820_v52, 5  ;;  %vm6260_vm10 = vmmov %vm6254_vm0 }
 0x11d   :  { %819 = vrot.lane.b32.xlu0 %v815_v26, %s4435_s14  ;;  %891 = vrot.lane.b32.xlu1 %v887_v30, %s4435_s14  ;;  %v1067_v44 = vsel %vm329_vm3, %v1049_v37, %v1053_v38  ;;  %v1085_v63 = vsel %vm329_vm3, %v1053_v38, %v4936_v40  ;;  %v1057_v12 = vsel %vm329_vm3, %v4929_v36, %v1049_v37  ;;  %v1098_v37 = vrot.slane %v4788_v25, 5  ;;  %vm6261_vm11 = vmmov %vm6254_vm0 }
 0x11e   :  { %v4950_v50 = vsel %vm332_vm4, %v1067_v44, %v4936_v40  ;;  %v4965_v4 = vsel %vm332_vm4, %v1085_v63, %v1081_v41  ;;  %336 = vst.msk [vmem:[#allocation4 + $0x30] sm:$0x7] %vm275_vm6, %v334_v22  ;;  %v1102_v44 = vsel %vm329_vm3, %v1062_v9, %v1080_v27  ;;  %v417_v25 = vsel %vm329_vm3, %v399_v58, %v4841_v60  ;;  %vm6264_vm13 = vmmov %vm6254_vm0 }
 0x11f   :  { %v575_v22 = vrot.slane %v4820_v52, 4  ;;  %vm6265_vm14 = vmmov %vm6254_vm0 }
 0x120   :  { %v4942_v48 = vld [vmem:[#allocation2 + $0x100] sm:$0xff]  ;;  %vm6267_vm2 = vmmov %vm6255_vm1 }
 0x121   :  { %928 = vrot.lane.b32.xlu0 %v4811_v46, %s4433_s0  ;;  %1000 = vrot.lane.b32.xlu1 %v4825_v53, %s4433_s0  ;;  %v1121_v54 = vrot.slane %v4942_v48, 1  ;;  %v1125_v56 = vrot.slane %v4942_v48, 2  ;;  %v4955_v59 = vrot.slane %v4942_v48, 3  ;;  %v1153_v0 = vrot.slane %v4942_v48, 4 }
 0x122   :  { %v832_v46 = vrot.slane %v4939_v43, 1 }
 0x123   :  { %v1139_v53 = vsel %vm329_vm3, %v1121_v54, %v1125_v56  ;;  %v1157_v5 = vsel %vm329_vm3, %v1125_v56, %v4955_v59  ;;  %v1129_v15 = vsel %vm329_vm3, %v4942_v48, %v1121_v54  ;;  %v1174_v54 = vsel %vm329_vm3, %v1134_v13, %v1152_v28 }
 0x124   :  { %v4974_v8 = vsel %vm332_vm4, %v1139_v53, %v4955_v59  ;;  %v4979_v45 = vsel %vm332_vm4, %v1157_v5, %v1153_v0  ;;  %v840_v11 = vsel %vm329_vm3, %v4939_v43, %v832_v46  ;;  %v1131_v18 = vsel %vm332_vm4, %v1129_v15, %v1125_v56 }
 0x125   :  { %946 = vrot.lane.b32.xlu0 %v4814_v47, %s4434_s21  ;;  %1018 = vrot.lane.b32.xlu1 %v869_v17, %s4434_s21  ;;  %v842_v14 = vsel %vm332_vm4, %v840_v11, %v4970_v7  ;;  %v1059_v47 = vsel %vm332_vm4, %v1057_v12, %v1053_v38  ;;  %v1138_v17 = vsel %vm329_vm3, %v1120_v55, %v4837_v57  ;;  %v1170_v38 = vrot.slane %v4801_v34, 5 }
 0x126   :  { %844 = vst.msk [vmem:[#allocation4 + $0x4c] sm:$0x7] %vm275_vm6, %v842_v14  ;;  %989 = vst.msk [vmem:[#allocation4 + $0x54] sm:$0x7] %vm275_vm6, %v842_v14  ;;  %v1068_v55 = vsel %vm332_vm4, %v1066_v16, %v1062_v9  ;;  %v1140_v21 = vsel %vm332_vm4, %v1138_v17, %v1134_v13  ;;  %v413_v57 = vrot.slane %v4804_v42, 3  ;;  %v342_v56 = vsel %vm329_vm3, %v322_v19, %v326_v33 }
 0x127   :  { %1061 = vst.msk [vmem:[#allocation4 + $0x58] sm:$0x7] %vm275_vm6, %v1059_v47  ;;  %1133 = vst.msk [vmem:[#allocation4 + $0x5c] sm:$0x7] %vm275_vm6, %v1131_v18  ;;  %v1104_v34 = vsel %vm332_vm4, %v1102_v44, %v1098_v37  ;;  %v1176_v63 = vsel %vm332_vm4, %v1174_v54, %v1170_v38  ;;  %v431_v11 = vrot.slane %v4804_v42, 4  ;;  %v376_v47 = vrot.slane %v4985_v10, 5 }
 0x128   :  { %v419_v5 = vsel %vm332_vm4, %v417_v25, %v413_v57  ;;  %v435_v58 = vsel %vm329_vm3, %v4841_v60, %v413_v57  ;;  %v449_v15 = vrot.slane %v4804_v42, 5  ;;  %v485_v19 = vrot.slane %v4818_v51, 3  ;;  %vm6256_vm6 = vmmov %vm6254_vm0 }
 0x129   :  { %964 = vrot.lane.b32.xlu0 %v815_v26, %s4435_s14  ;;  %1036 = vrot.lane.b32.xlu1 %v887_v30, %s4435_s14  ;;  %v1084_v26 = vsel %vm329_vm3, %v4834_v35, %v1062_v9  ;;  %v338_v35 = vrot.slane %v4985_v10, 3  ;;  %v357_v9 = vrot.slane %v4985_v10, 4  ;;  %v437_v14 = vsel %vm332_vm4, %v435_v58, %v431_v11 }
 0x12a   :  { %v1086_v30 = vsel %vm332_vm4, %v1084_v26, %v1080_v27  ;;  %v453_v17 = vsel %vm329_vm3, %v413_v57, %v431_v11  ;;  %v489_v42 = vsel %vm329_vm3, %v471_v61, %v4850_v2  ;;  %v561_v10 = vsel %vm329_vm3, %v543_v62, %v4853_v3  ;;  %v5158_v11 = vld [vmem:[%s6242_s3 + $0x80] sm:$0xff]  }
 0x12b   :  { %v344_v53 = vsel %vm332_vm4, %v342_v56, %v338_v35  ;;  %v361_v12 = vsel %vm329_vm3, %v326_v33, %v338_v35  ;;  %v380_v16 = vsel %vm329_vm3, %v338_v35, %v357_v9  ;;  %v455_v18 = vsel %vm332_vm4, %v453_v17, %v449_v15  ;;  %v5209_v17 = vld [vmem:[%s6242_s3 + $0xd8] sm:$0xff]  }
 0x12c   :  { %v363_v13 = vsel %vm332_vm4, %v361_v12, %v357_v9  ;;  %v382_v60 = vsel %vm332_vm4, %v380_v16, %v376_v47  ;;  %v557_v33 = vrot.slane %v4820_v52, 3  ;;  %v507_v61 = vsel %vm329_vm3, %v4850_v2, %v485_v19  ;;  %v5164_v47 = vld [vmem:[%s6242_s3 + $0xc8] sm:$0xff]  }
 0x12d   :  { %1072 = vrot.lane.b32.xlu0 %v1068_v55, %s4433_s0  ;;  %1144 = vrot.lane.b32.xlu1 %v1140_v21, %s4433_s0  ;;  %v491_v55 = vsel %vm332_vm4, %v489_v42, %v485_v19  ;;  %v509_v62 = vsel %vm332_vm4, %v507_v61, %v503_v6  ;;  %v521_v26 = vrot.slane %v4818_v51, 5  ;;  %v846_v51 = vrot.slane %v4939_v43, 3  ;;  %v5241_v61 = vld [vmem:[%s6242_s3 + $0xe8] sm:$0xff]  }
 0x12e   :  { %v563_v21 = vsel %vm332_vm4, %v561_v10, %v557_v33  ;;  %v579_v27 = vsel %vm329_vm3, %v4853_v3, %v557_v33  ;;  %v850_v52 = vsel %vm329_vm3, %v832_v46, %v4970_v7  ;;  %v864_v38 = vrot.slane %v4939_v43, 4 }
 0x12f   :  { %v581_v28 = vsel %vm332_vm4, %v579_v27, %v575_v22  ;;  %v852_v37 = vsel %vm332_vm4, %v850_v52, %v846_v51  ;;  %v868_v44 = vsel %vm329_vm3, %v4970_v7, %v846_v51  ;;  %v810_v46 = vrot.slane %v4888_v20, 5  ;;  %v5249_v27 = vld [vmem:[%s6242_s3 + $0xa8] sm:$0xff]  }
 0x130   :  { %v870_v54 = vsel %vm332_vm4, %v868_v44, %v864_v38  ;;  %v882_v35 = vrot.slane %v4939_v43, 5  ;;  %v814_v57 = vsel %vm329_vm3, %v4902_v23, %v792_v24  ;;  %v886_v56 = vsel %vm329_vm3, %v846_v51, %v864_v38  ;;  %v5277_v38 = vld [vmem:[%s6242_s3] sm:$0xff]   ;;  %v5283_v44 = vld [vmem:[%s6242_s3 + $0xb8] sm:$0xff]  }
 0x131   :  { %1090 = vrot.lane.b32.xlu0 %v1086_v30, %s4434_s21  ;;  %1162 = vrot.lane.b32.xlu1 %v1158_v32, %s4434_s21  ;;  %v525_v30 = vsel %vm329_vm3, %v485_v19, %v503_v6  ;;  %v597_v32 = vsel %vm329_vm3, %v557_v33, %v575_v22  ;;  %v816_v7 = vsel %vm332_vm4, %v814_v57, %v810_v46  ;;  %v1099_v12 = vrot.slane %v4929_v36, 5  ;;  %v5183_v36 = vld [vmem:[%s6242_s3 + $0x88] sm:$0xff]   ;;  %v5221_v33 = vld [vmem:[%s6242_s3 + $0x98] sm:$0xff]  }
 0x132   :  { %v527_v2 = vsel %vm332_vm4, %v525_v30, %v521_v26  ;;  %v599_v3 = vsel %vm332_vm4, %v597_v32, %v593_v29  ;;  %v888_v25 = vsel %vm332_vm4, %v886_v56, %v882_v35  ;;  %v1175_v15 = vsel %vm329_vm3, %v4955_v59, %v1153_v0  ;;  %v5192_v59 = vld [vmem:[%s6242_s3 + $0xd0] sm:$0xff]   ;;  %v5289_v35 = vld [vmem:[%s6242_s3 + $0x48] sm:$0xff]  }
 0x133   :  { %v5255_v26 = vld [vmem:[%s6242_s3 + $0xf0] sm:$0xff]   ;;  %v5298_v57 = vld [vmem:[%s6242_s3 + $0x8] sm:$0xff]  }
 0x135   :  { %1108 = vrot.lane.b32.xlu0 %v1104_v34, %s4435_s14  ;;  %1180 = vrot.lane.b32.xlu1 %v1176_v63, %s4435_s14 }
 0x139   :  { %349 = vrot.lane.b32.xlu0 %v344_v53, %s4433_s0  ;;  %424 = vrot.lane.b32.xlu1 %v419_v5, %s4433_s0 }
 0x13d   :  { %368 = vrot.lane.b32.xlu0 %v363_v13, %s4434_s21  ;;  %442 = vrot.lane.b32.xlu1 %v437_v14, %s4434_s21 }
 0x141   :  { %387 = vrot.lane.b32.xlu0 %v382_v60, %s4435_s14  ;;  %460 = vrot.lane.b32.xlu1 %v455_v18, %s4435_s14 }
 0x145   :  { %496 = vrot.lane.b32.xlu0 %v491_v55, %s4433_s0  ;;  %568 = vrot.lane.b32.xlu1 %v563_v21, %s4433_s0 }
 0x149   :  { %514 = vrot.lane.b32.xlu0 %v509_v62, %s4434_s21  ;;  %586 = vrot.lane.b32.xlu1 %v581_v28, %s4434_s21 }
 0x14d   :  { %532 = vrot.lane.b32.xlu0 %v527_v2, %s4435_s14  ;;  %604 = vrot.lane.b32.xlu1 %v599_v3, %s4435_s14 }
 0x151   :  { %641 = vrot.lane.b32.xlu0 %v491_v55, %s4433_s0  ;;  %713 = vrot.lane.b32.xlu1 %v563_v21, %s4433_s0  ;;  %v5227_v55 = vld [vmem:[%s6242_s3 + $0xe0] sm:$0xff]  }
 0x152   :  { %v5235_v21 = vld [vmem:[%s6242_s3 + $0xa0] sm:$0xff]  }
 0x155   :  { %659 = vrot.lane.b32.xlu0 %v509_v62, %s4434_s21  ;;  %731 = vrot.lane.b32.xlu1 %v581_v28, %s4434_s21 }
 0x159   :  { %677 = vrot.lane.b32.xlu0 %v527_v2, %s4435_s14  ;;  %749 = vrot.lane.b32.xlu1 %v599_v3, %s4435_s14  ;;  %v5263_v2 = vld [vmem:[%s6242_s3 + $0xb0] sm:$0xff]  }
 0x15d   :  { %785 = vrot.lane.b32.xlu0 %v4919_v31, %s4433_s0  ;;  %857 = vrot.lane.b32.xlu1 %v852_v37, %s4433_s0 }
 0x161   :  { %803 = vrot.lane.b32.xlu0 %v4924_v49, %s4434_s21  ;;  %875 = vrot.lane.b32.xlu1 %v870_v54, %s4434_s21 }
 0x165   :  { %821 = vrot.lane.b32.xlu0 %v816_v7, %s4435_s14  ;;  %893 = vrot.lane.b32.xlu1 %v888_v25, %s4435_s14 }
 0x167   :  { %v441_v43 = vpop.permute.xlu1 %440  ;;  %v423_v20 = vpop.permute.xlu0 %422 }
 0x168   :  { %428 = vst.msk [vmem:[#allocation4 + $0x4] sm:$0x7] %vm6254_vm0, %v423_v20 }
 0x169   :  { %446 = vst.msk [vmem:[#allocation4 + $0x4] sm:$0x7] %vm6255_vm1, %v441_v43  ;;  %930 = vrot.lane.b32.xlu0 %v4919_v31, %s4433_s0  ;;  %1002 = vrot.lane.b32.xlu1 %v852_v37, %s4433_s0  ;;  %v5269_v37 = vld [vmem:[%s6242_s3 + $0xf8] sm:$0xff]   ;;  %v5307_v43 = vld [vmem:[%s6242_s3 + $0x50] sm:$0xff]  }
 0x16b   :  { %v459_v23 = vpop.permute.xlu1 %458  ;;  %v386_v24 = vpop.permute.xlu0 %385 }
 0x16c   :  { %464 = vst.msk [vmem:[#allocation4 + $0x4] sm:$0x7] %vm391_vm5, %v459_v23  ;;  %392 = vst.msk [vmem:[#allocation4] sm:$0x7] %vm391_vm5, %v386_v24 }
 0x16d   :  { %948 = vrot.lane.b32.xlu0 %v4924_v49, %s4434_s21  ;;  %1020 = vrot.lane.b32.xlu1 %v870_v54, %s4434_s21 }
 0x16f   :  { %v495_v34 = vpop.permute.xlu0 %494  ;;  %v567_v63 = vpop.permute.xlu1 %566 }
 0x170   :  { %500 = vst.msk [vmem:[#allocation4 + $0x8] sm:$0x7] %vm6256_vm6, %v495_v34  ;;  %vm6269_vm6 = vmmov %vm6267_vm2 }
 0x171   :  { %572 = vst.msk [vmem:[#allocation4 + $0xc] sm:$0x7] %vm6257_vm7, %v567_v63  ;;  %966 = vrot.lane.b32.xlu0 %v816_v7, %s4435_s14  ;;  %1038 = vrot.lane.b32.xlu1 %v888_v25, %s4435_s14  ;;  %vm6270_vm7 = vmmov %vm6267_vm2 }
 0x173   :  { %v513_v31 = vpop.permute.xlu0 %512  ;;  %v585_v53 = vpop.permute.xlu1 %584  ;;  %v1253_v5 = vld [vmem:[#allocation4] sm:$0x77] }
 0x174   :  { %518 = vst.msk [vmem:[#allocation4 + $0x8] sm:$0x7] %vm6258_vm8, %v513_v31  ;;  %v1257_v49 = vcombine.high %v1253_v5, %v1253_v5  ;;  %v1261_v14 = vpack.c.bf16 %v1253_v5, %v1253_v5  ;;  %v5327_v31 = vld [vmem:[%s6242_s3 + $0x58] sm:$0xff]   ;;  %vm6271_vm8 = vmmov %vm6254_vm0 }
 0x175   :  { %590 = vst.msk [vmem:[#allocation4 + $0xc] sm:$0x7] %vm6259_vm9, %v585_v53  ;;  %1074 = vrot.lane.b32.xlu0 %v4950_v50, %s4433_s0  ;;  %1146 = vrot.lane.b32.xlu1 %v4974_v8, %s4433_s0  ;;  %v1103_v50 = vsel %vm329_vm3, %v4936_v40, %v1081_v41  ;;  %v1171_v8 = vrot.slane %v4942_v48, 5  ;;  %v5336_v53 = vld [vmem:[%s6242_s3 + $0x18] sm:$0xff]   ;;  %vm6272_vm9 = vmmov %vm6254_vm0 }
 0x176   :  { %v1262_v9 = vpack.c.bf16 %v1257_v49, %v1257_v49  ;;  %v1105_v40 = vsel %vm332_vm4, %v1103_v50, %v1099_v12  ;;  %v5352_v12 = vld [vmem:[%s6242_s3 + $0x20] sm:$0xff]  }
 0x177   :  { %v531_v58 = vpop.permute.xlu0 %530  ;;  %v603_v13 = vpop.permute.xlu1 %602  ;;  %v1177_v0 = vsel %vm332_vm4, %v1175_v15, %v1171_v8  ;;  %vm6262_vm4 = vmmov %vm6255_vm1  ;;  %v5368_v15 = vld [vmem:[%s6242_s3 + $0x28] sm:$0xff]  }
 0x178   :  { %536 = vst.msk [vmem:[#allocation4 + $0x8] sm:$0x7] %vm391_vm5, %v531_v58  ;;  %608 = vst.msk [vmem:[#allocation4 + $0xc] sm:$0x7] %vm391_vm5, %v603_v13  ;;  %1495 = vmatprep.mubr.bf16.mxu1 %v1262_v9  ;;  %v5343_v9 = vld [vmem:[%s6242_s3 + $0x60] sm:$0xff]  }
 0x179   :  { %1496 = vmatmul.mubr.bf16.vlgmr.msra.gmra.mrb[0].mxu1 %v1261_v14  ;;  %1092 = vrot.lane.b32.xlu0 %v4965_v4, %s4434_s21  ;;  %v5202_v4 = vld [vmem:[%s6242_s3 + $0x90] sm:$0xff]   ;;  %vm6268_vm1 = vmmov %vm6254_vm0  ;;  %v5359_v14 = vld [vmem:[%s6242_s3 + $0x68] sm:$0xff]  }
 0x17a   :  { %3608 = vmatpush3.bf16.msra.mxu1 %v5158_v11  ;;  %1164 = vrot.lane.b32.xlu1 %v4979_v45, %s4434_s21 }
 0x17b   :  { %v640_v41 = vpop.permute.xlu0 %639  ;;  %v712_v48 = vpop.permute.xlu1 %711  ;;  %3609 = vmatprep.subr.bf16.mxu1 %v5164_v47 }
 0x17c   :  { %645 = vst.msk [vmem:[#allocation4 + $0x10] sm:$0x7] %vm6260_vm10, %v640_v41  ;;  %vm6273_vm10 = vmmov %vm6267_vm2 }
 0x17d   :  { %717 = vst.msk [vmem:[#allocation4 + $0x14] sm:$0x7] %vm6261_vm11, %v712_v48  ;;  %1110 = vrot.lane.b32.xlu0 %v1105_v40, %s4435_s14  ;;  %vm6274_vm11 = vmmov %vm6267_vm2 }
 0x17e   :  { %3610 = vmatpush3.bf16.msra.mxu1 %v5183_v36  ;;  %1182 = vrot.lane.b32.xlu1 %v1177_v0, %s4435_s14  ;;  %v5375_v0 = vld [vmem:[%s6242_s3 + $0x70] sm:$0xff]  }
 0x17f   :  { %v658_v45 = vpop.permute.xlu0 %657  ;;  %v730_v16 = vpop.permute.xlu1 %729  ;;  %3611 = vmatprep.subr.bf16.mxu1 %v5192_v59  ;;  %v5211_v60 = vld [vmem:[#allocation4 + $0x8] sm:$0x77] }
 0x180   :  { %663 = vst.msk [vmem:[#allocation4 + $0x10] sm:$0x7] %vm6262_vm4, %v658_v45  ;;  %v1258_v18 = vcombine.high %v5211_v60, %v5211_v60  ;;  %v1263_v56 = vpack.c.bf16 %v5211_v60, %v5211_v60  ;;  %v5384_v45 = vld [vmem:[%s6242_s3 + $0x30] sm:$0xff]   ;;  %vm6275_vm4 = vmmov %vm6254_vm0 }
 0x181   :  { %735 = vst.msk [vmem:[#allocation4 + $0x14] sm:$0x7] %vm6263_vm12, %v730_v16  ;;  %vm6276_vm12 = vmmov %vm6254_vm0 }
 0x182   :  { %3612 = vmatpush3.bf16.msra.mxu1 %v5202_v4  ;;  %v1264_v19 = vpack.c.bf16 %v1258_v18, %v1258_v18  ;;  %v5391_v18 = vld [vmem:[%s6242_s3 + $0x78] sm:$0xff]  }
 0x183   :  { %v676_v42 = vpop.permute.xlu0 %675  ;;  %v748_v10 = vpop.permute.xlu1 %747  ;;  %3613 = vmatprep.subr.bf16.mxu1 %v5209_v17 }
 0x184   :  { %681 = vst.msk [vmem:[#allocation4 + $0x10] sm:$0x7] %vm391_vm5, %v676_v42  ;;  %753 = vst.msk [vmem:[#allocation4 + $0x14] sm:$0x7] %vm391_vm5, %v748_v10  ;;  %1535 = vmatprep.mubr.bf16.mxu1 %v1264_v19  ;;  %v5400_v19 = vld [vmem:[%s6242_s3 + $0x38] sm:$0xff]  }
 0x186   :  { %3614 = vmatpush3.bf16.msra.mxu1 %v5221_v33 }
 0x187   :  { %v784_v6 = vpop.permute.xlu0 %783  ;;  %v856_v22 = vpop.permute.xlu1 %855  ;;  %3615 = vmatprep.subr.bf16.mxu1 %v5227_v55 }
 0x188   :  { %789 = vst.msk [vmem:[#allocation4 + $0x18] sm:$0x7] %vm6264_vm13, %v784_v6  ;;  %vm6277_vm13 = vmmov %vm6267_vm2 }
 0x189   :  { %861 = vst.msk [vmem:[#allocation4 + $0x1c] sm:$0x7] %vm6265_vm14, %v856_v22  ;;  %v5407_v22 = vld [vmem:[%s6242_s3 + $0x40] sm:$0xff]   ;;  %vm6278_vm14 = vmmov %vm6267_vm2 }
 0x18a   :  { %3616 = vmatpush3.bf16.msra.mxu1 %v5235_v21 }
 0x18b   :  { %v802_v62 = vpop.permute.xlu0 %801  ;;  %v874_v28 = vpop.permute.xlu1 %873  ;;  %3617 = vmatprep.subr.bf16.mxu1 %v5241_v61  ;;  %v1547_v29 = vld [vmem:[#allocation4 + $0x10] sm:$0x77] }
 0x18c   :  { %807 = vst.msk [vmem:[#allocation4 + $0x18] sm:$0x7] %vm6266_vm15, %v802_v62  ;;  %v1551_v30 = vcombine.high %v1547_v29, %v1547_v29  ;;  %v1555_v52 = vpack.c.bf16 %v1547_v29, %v1547_v29  ;;  %vm6279_vm15 = vmmov %vm6254_vm0 }
 0x18d   :  { %879 = vst.msk [vmem:[#allocation4 + $0x1c] sm:$0x7] %vm6267_vm2, %v874_v28  ;;  %vm6280_vm2 = vmmov %vm6254_vm0 }
 0x18e   :  { %3618 = vmatpush3.bf16.msra.mxu1 %v5249_v27  ;;  %v1556_v32 = vpack.c.bf16 %v1551_v30, %v1551_v30 }
 0x18f   :  { %v820_v3 = vpop.permute.xlu0 %819  ;;  %v892_v51 = vpop.permute.xlu1 %891  ;;  %3619 = vmatprep.subr.bf16.mxu1 %v5255_v26 }
 0x190   :  { %825 = vst.msk [vmem:[#allocation4 + $0x18] sm:$0x7] %vm391_vm5, %v820_v3  ;;  %897 = vst.msk [vmem:[#allocation4 + $0x1c] sm:$0x7] %vm391_vm5, %v892_v51  ;;  %1591 = vmatprep.mubr.bf16.mxu0 %v1556_v32 }
 0x191   :  { %1592 = vmatmul.mubr.bf16.vlgmr.msra.gmra.mrb[28].mxu0 %v1555_v52  ;;  %v5429_v52 = vld [vmem:[%s6242_s3 + $0xc0] sm:$0xff]  }
 0x192   :  { %3620 = vmatpush3.bf16.msra.mxu1 %v5263_v2  ;;  %3674 = vmatpush3.bf16.msra.mxu0 %v5277_v38 }
 0x193   :  { %v929_v54 = vpop.permute.xlu0 %928  ;;  %v1001_v46 = vpop.permute.xlu1 %1000  ;;  %3621 = vmatprep.subr.bf16.mxu1 %v5269_v37  ;;  %3675 = vmatprep.subr.bf16.mxu0 %v5289_v35 }
 0x194   :  { %934 = vst.msk [vmem:[#allocation4 + $0x20] sm:$0x7] %vm6254_vm0, %v929_v54  ;;  %vm6281_vm0 = vmmov %vm6269_vm6 }
 0x195   :  { %1006 = vst.msk [vmem:[#allocation4 + $0x24] sm:$0x7] %vm6268_vm1, %v1001_v46  ;;  %vm6282_vm1 = vmmov %vm6281_vm0 }
 0x196   :  { %3622 = vmatpush3.bf16.msra.mxu1 %v5283_v44  ;;  %3676 = vmatpush3.bf16.msra.mxu0 %v5298_v57 }
 0x197   :  { %v947_v7 = vpop.permute.xlu0 %946  ;;  %v1019_v25 = vpop.permute.xlu1 %1018  ;;  %3651 = vmatprep.subr.bf16.mxu1 %v4712_v39  ;;  %3677 = vmatprep.subr.bf16.mxu0 %v5307_v43  ;;  %v5310_v20 = vld [vmem:[#allocation4 + $0x18] sm:$0x77]  ;;  %v5320_v39 = vld [vmem:[%s6242_s3 + $0x10] sm:$0xff]  }
 0x198   :  { %952 = vst.msk [vmem:[#allocation4 + $0x20] sm:$0x7] %vm6269_vm6, %v947_v7  ;;  %v1552_v23 = vcombine.high %v5310_v20, %v5310_v20  ;;  %v1557_v32 = vpack.c.bf16 %v5310_v20, %v5310_v20  ;;  %vm6283_vm6 = vmmov %vm6280_vm2 }
 0x199   :  { %1024 = vst.msk [vmem:[#allocation4 + $0x24] sm:$0x7] %vm6270_vm7, %v1019_v25  ;;  %1536 = vmatmul.mubr.bf16.vlgmr.msra.gmra.mrb[4].mxu1 %v1263_v56  ;;  %vm6284_vm7 = vmmov %vm6280_vm2 }
 0x19a   :  { %3652 = vmatpush3.bf16.msra.mxu1 %v5158_v11  ;;  %3678 = vmatpush3.bf16.msra.mxu0 %v5320_v39  ;;  %v1558_v24 = vpack.c.bf16 %v1552_v23, %v1552_v23 }
 0x19b   :  { %v965_v34 = vpop.permute.xlu0 %964  ;;  %v1037_v63 = vpop.permute.xlu1 %1036  ;;  %3653 = vmatprep.subr.bf16.mxu1 %v5164_v47  ;;  %3679 = vmatprep.subr.bf16.mxu0 %v5327_v31 }
 0x19c   :  { %970 = vst.msk [vmem:[#allocation4 + $0x20] sm:$0x7] %vm391_vm5, %v965_v34  ;;  %1042 = vst.msk [vmem:[#allocation4 + $0x24] sm:$0x7] %vm391_vm5, %v1037_v63  ;;  %1631 = vmatprep.mubr.bf16.mxu1 %v1558_v24 }
 0x19e   :  { %3654 = vmatpush3.bf16.msra.mxu1 %v5183_v36  ;;  %3680 = vmatpush3.bf16.msra.mxu0 %v5336_v53 }
 0x19f   :  { %v1073_v5 = vpop.permute.xlu0 %1072  ;;  %v1145_v49 = vpop.permute.xlu1 %1144  ;;  %3655 = vmatprep.subr.bf16.mxu1 %v5192_v59  ;;  %3681 = vmatprep.subr.bf16.mxu0 %v5343_v9 }
 0x1a0   :  { %1078 = vst.msk [vmem:[#allocation4 + $0x28] sm:$0x7] %vm6271_vm8, %v1073_v5  ;;  %vm6285_vm8 = vmmov %vm6281_vm0 }
 0x1a1   :  { %1150 = vst.msk [vmem:[#allocation4 + $0x2c] sm:$0x7] %vm6272_vm9, %v1145_v49  ;;  %vm6286_vm9 = vmmov %vm6281_vm0 }
 0x1a2   :  { %3656 = vmatpush3.bf16.msra.mxu1 %v5202_v4  ;;  %3682 = vmatpush3.bf16.msra.mxu0 %v5352_v12 }
 0x1a3   :  { %v1091_v58 = vpop.permute.xlu0 %1090  ;;  %v1163_v13 = vpop.permute.xlu1 %1162  ;;  %3657 = vmatprep.subr.bf16.mxu1 %v5209_v17  ;;  %3683 = vmatprep.subr.bf16.mxu0 %v5359_v14  ;;  %v1642_v50 = vld [vmem:[#allocation4 + $0x20] sm:$0x77] }
 0x1a4   :  { %1096 = vst.msk [vmem:[#allocation4 + $0x28] sm:$0x7] %vm6273_vm10, %v1091_v58  ;;  %v1646_v8 = vcombine.high %v1642_v50, %v1642_v50  ;;  %v1650_v42 = vpack.c.bf16 %v1642_v50, %v1642_v50  ;;  %vm6287_vm10 = vmmov %vm6280_vm2 }
 0x1a5   :  { %1168 = vst.msk [vmem:[#allocation4 + $0x2c] sm:$0x7] %vm6274_vm11, %v1163_v13  ;;  %vm6288_vm11 = vmmov %vm6280_vm2 }
 0x1a6   :  { %3658 = vmatpush3.bf16.msra.mxu1 %v5221_v33  ;;  %3684 = vmatpush3.bf16.msra.mxu0 %v5368_v15  ;;  %v1651_v40 = vpack.c.bf16 %v1646_v8, %v1646_v8 }
 0x1a7   :  { %v1109_v41 = vpop.permute.xlu0 %1108  ;;  %v1181_v48 = vpop.permute.xlu1 %1180  ;;  %3659 = vmatprep.subr.bf16.mxu1 %v5227_v55  ;;  %3685 = vmatprep.subr.bf16.mxu0 %v5375_v0 }
 0x1a8   :  { %1114 = vst.msk [vmem:[#allocation4 + $0x28] sm:$0x7] %vm391_vm5, %v1109_v41  ;;  %1186 = vst.msk [vmem:[#allocation4 + $0x2c] sm:$0x7] %vm391_vm5, %v1181_v48  ;;  %1686 = vmatprep.mubr.bf16.mxu0 %v1651_v40 }
 0x1aa   :  { %3660 = vmatpush3.bf16.msra.mxu1 %v5235_v21  ;;  %3686 = vmatpush3.bf16.msra.mxu0 %v5384_v45 }
 0x1ab   :  { %v350_v16 = vpop.permute.xlu0 %349  ;;  %v425_v60 = vpop.permute.xlu1 %424  ;;  %3661 = vmatprep.subr.bf16.mxu1 %v5241_v61  ;;  %3687 = vmatprep.subr.bf16.mxu0 %v5391_v18 }
 0x1ac   :  { %355 = vst.msk [vmem:[#allocation4 + $0x30] sm:$0x7] %vm6275_vm4, %v350_v16  ;;  %vm6289_vm4 = vmmov %vm6281_vm0 }
 0x1ad   :  { %429 = vst.msk [vmem:[#allocation4 + $0x34] sm:$0x7] %vm6276_vm12, %v425_v60  ;;  %vm6290_vm12 = vmmov %vm6281_vm0 }
 0x1ae   :  { %3662 = vmatpush3.bf16.msra.mxu1 %v5249_v27  ;;  %3688 = vmatpush3.bf16.msra.mxu0 %v5400_v19 }
 0x1af   :  { %v369_v10 = vpop.permute.xlu0 %368  ;;  %v443_v6 = vpop.permute.xlu1 %442  ;;  %3663 = vmatprep.subr.bf16.mxu1 %v5255_v26  ;;  %3717 = vmatprep.subr.bf16.mxu0 %v5407_v22  ;;  %v5412_v62 = vld [vmem:[#allocation4 + $0x28] sm:$0x77] }
 0x1b0   :  { %374 = vst.msk [vmem:[#allocation4 + $0x30] sm:$0x7] %vm6277_vm13, %v369_v10  ;;  %v1647_v30 = vcombine.high %v5412_v62, %v5412_v62  ;;  %vm6291_vm13 = vmmov %vm6280_vm2 }
 0x1b1   :  { %447 = vst.msk [vmem:[#allocation4 + $0x34] sm:$0x7] %vm6278_vm14, %v443_v6  ;;  %1687 = vmatmul.mubr.bf16.vlgmr.msra.gmra.mrb[32].mxu0 %v1650_v42  ;;  %vm6292_vm14 = vmmov %vm6280_vm2 }
 0x1b2   :  { %3664 = vmatpush3.bf16.msra.mxu1 %v5263_v2  ;;  %3718 = vmatpush3.bf16.msra.mxu0 %v5277_v38  ;;  %v1653_v54 = vpack.c.bf16 %v1647_v30, %v1647_v30 }
 0x1b3   :  { %v388_v28 = vpop.permute.xlu0 %387  ;;  %v461_v29 = vpop.permute.xlu1 %460  ;;  %3665 = vmatprep.subr.bf16.mxu1 %v5269_v37  ;;  %3719 = vmatprep.subr.bf16.mxu0 %v5289_v35 }
 0x1b4   :  { %393 = vst.msk [vmem:[#allocation4 + $0x30] sm:$0x7] %vm391_vm5, %v388_v28  ;;  %465 = vst.msk [vmem:[#allocation4 + $0x34] sm:$0x7] %vm391_vm5, %v461_v29  ;;  %v1652_v28 = vpack.c.bf16 %v5412_v62, %v5412_v62 }
 0x1b6   :  { %3666 = vmatpush3.bf16.msra.mxu1 %v5283_v44  ;;  %3720 = vmatpush3.bf16.msra.mxu0 %v5298_v57 }
 0x1b7   :  { %v497_v3 = vpop.permute.xlu0 %496  ;;  %v569_v51 = vpop.permute.xlu1 %568  ;;  %3695 = vmatprep.subr.bf16.mxu1 %v5429_v52  ;;  %3721 = vmatprep.subr.bf16.mxu0 %v5307_v43 }
 0x1b8   :  { %501 = vst.msk [vmem:[#allocation4 + $0x38] sm:$0x7] %vm6279_vm15, %v497_v3  ;;  %vm6293_vm15 = vmmov %vm6281_vm0 }
 0x1b9   :  { %573 = vst.msk [vmem:[#allocation4 + $0x3c] sm:$0x7] %vm6280_vm2, %v569_v51  ;;  %1632 = vmatmul.mubr.bf16.vlgmr.msra.gmra.mrb[8].mxu1 %v1557_v32  ;;  %vm6294_vm2 = vmmov %vm6281_vm0 }
 0x1ba   :  { %3696 = vmatpush3.bf16.msra.mxu1 %v5158_v11  ;;  %1726 = vmatprep.mubr.bf16.mxu1 %v1653_v54 }
 0x1bb   :  { %3722 = vmatpush3.bf16.msra.mxu0 %v5320_v39  ;;  %v515_v46 = vpop.permute.xlu0 %514  ;;  %v587_v56 = vpop.permute.xlu1 %586  ;;  %3697 = vmatprep.subr.bf16.mxu1 %v5164_v47  ;;  %v1738_v7 = vld [vmem:[#allocation4 + $0x30] sm:$0x77] }
 0x1bc   :  { %519 = vst.msk [vmem:[#allocation4 + $0x38] sm:$0x7] %vm6281_vm0, %v515_v46  ;;  %3723 = vmatprep.subr.bf16.mxu0 %v5327_v31  ;;  %v1742_v25 = vcombine.high %v1738_v7, %v1738_v7  ;;  %v1746_v40 = vpack.c.bf16 %v1738_v7, %v1738_v7  ;;  %vm6295_vm0 = vmmov %vm6283_vm6 }
 0x1bd   :  { %591 = vst.msk [vmem:[#allocation4 + $0x3c] sm:$0x7] %vm6282_vm1, %v587_v56  ;;  %vm6296_vm1 = vmmov %vm6295_vm0 }
 0x1be   :  { %3698 = vmatpush3.bf16.msra.mxu1 %v5183_v36  ;;  %v1747_v20 = vpack.c.bf16 %v1742_v25, %v1742_v25 }
 0x1bf   :  { %3724 = vmatpush3.bf16.msra.mxu0 %v5336_v53  ;;  %v533_v23 = vpop.permute.xlu0 %532  ;;  %v605_v24 = vpop.permute.xlu1 %604  ;;  %3699 = vmatprep.subr.bf16.mxu1 %v5192_v59 }
 0x1c0   :  { %537 = vst.msk [vmem:[#allocation4 + $0x38] sm:$0x7] %vm391_vm5, %v533_v23  ;;  %609 = vst.msk [vmem:[#allocation4 + $0x3c] sm:$0x7] %vm391_vm5, %v605_v24  ;;  %3725 = vmatprep.subr.bf16.mxu0 %v5343_v9  ;;  %1782 = vmatprep.mubr.bf16.mxu0 %v1747_v20 }
 0x1c2   :  { %3700 = vmatpush3.bf16.msra.mxu1 %v5202_v4 }
 0x1c3   :  { %3726 = vmatpush3.bf16.msra.mxu0 %v5352_v12  ;;  %v642_v34 = vpop.permute.xlu0 %641  ;;  %v714_v63 = vpop.permute.xlu1 %713  ;;  %3701 = vmatprep.subr.bf16.mxu1 %v5209_v17 }
 0x1c4   :  { %646 = vst.msk [vmem:[#allocation4 + $0x40] sm:$0x7] %vm6283_vm6, %v642_v34  ;;  %3727 = vmatprep.subr.bf16.mxu0 %v5359_v14  ;;  %vm6297_vm6 = vmmov %vm6294_vm2 }
 0x1c5   :  { %718 = vst.msk [vmem:[#allocation4 + $0x44] sm:$0x7] %vm6284_vm7, %v714_v63  ;;  %vm306_vm7 = vcmask 520192  }
 0x1c6   :  { %3702 = vmatpush3.bf16.msra.mxu1 %v5221_v33  ;;  %308 = vst.msk [vmem:[#allocation3 + $0x8] sm:$0x1f] %vm306_vm7, %v4431_v1  ;;  %307 = vst.msk [vmem:[#allocation3] sm:$0x1f] %vm306_vm7, %v4431_v1 }
 0x1c7   :  { %3728 = vmatpush3.bf16.msra.mxu0 %v5368_v15  ;;  %v660_v5 = vpop.permute.xlu0 %659  ;;  %v732_v49 = vpop.permute.xlu1 %731  ;;  %3703 = vmatprep.subr.bf16.mxu1 %v5227_v55  ;;  %v5471_v41 = vld [vmem:[#allocation4 + $0x38] sm:$0x77]  ;;  %309 = vst.msk [vmem:[#allocation3 + $0x10] sm:$0x1f] %vm306_vm7, %v4431_v1  ;;  %310 = vst.msk [vmem:[#allocation3 + $0x18] sm:$0x1f] %vm306_vm7, %v4431_v1 }
 0x1c8   :  { %664 = vst.msk [vmem:[#allocation4 + $0x40] sm:$0x7] %vm6285_vm8, %v660_v5  ;;  %3729 = vmatprep.subr.bf16.mxu0 %v5375_v0  ;;  %v1743_v10 = vcombine.high %v5471_v41, %v5471_v41  ;;  %vm6298_vm8 = vmmov %vm6294_vm2 }
 0x1c9   :  { %736 = vst.msk [vmem:[#allocation4 + $0x44] sm:$0x7] %vm6286_vm9, %v732_v49  ;;  %vm2067_vm9 = vcmask 1042944  }
 0x1ca   :  { %3704 = vmatpush3.bf16.msra.mxu1 %v5235_v21  ;;  %v1749_v32 = vpack.c.bf16 %v1743_v10, %v1743_v10  ;;  %311 = vst.msk [vmem:[#allocation3 + $0x20] sm:$0x1f] %vm306_vm7, %v4431_v1  ;;  %312 = vst.msk [vmem:[#allocation3 + $0x28] sm:$0x1f] %vm306_vm7, %v4431_v1 }
 0x1cb   :  { %3730 = vmatpush3.bf16.msra.mxu0 %v5384_v45  ;;  %v678_v58 = vpop.permute.xlu0 %677  ;;  %v750_v13 = vpop.permute.xlu1 %749  ;;  %3705 = vmatprep.subr.bf16.mxu1 %v5241_v61  ;;  %313 = vst.msk [vmem:[#allocation3 + $0x30] sm:$0x1f] %vm306_vm7, %v4431_v1  ;;  %314 = vst.msk [vmem:[#allocation3 + $0x38] sm:$0x1f] %vm306_vm7, %v4431_v1 }
 0x1cc   :  { %682 = vst.msk [vmem:[#allocation4 + $0x40] sm:$0x7] %vm391_vm5, %v678_v58  ;;  %754 = vst.msk [vmem:[#allocation4 + $0x44] sm:$0x7] %vm391_vm5, %v750_v13  ;;  %3731 = vmatprep.subr.bf16.mxu0 %v5391_v18 }
 0x1cd   :  { %315 = vst.msk [vmem:[#allocation3 + $0x40] sm:$0x1f] %vm306_vm7, %v4431_v1  ;;  %316 = vst.msk [vmem:[#allocation3 + $0x48] sm:$0x1f] %vm306_vm7, %v4431_v1  ;;  %v2074_v10 = vld [vmem:[#allocation3 + $0x2] sm:$0x7] }
 0x1ce   :  { %3706 = vmatpush3.bf16.msra.mxu1 %v5249_v27 }
 0x1cf   :  { %3732 = vmatpush3.bf16.msra.mxu0 %v5400_v19  ;;  %3707 = vmatprep.subr.bf16.mxu1 %v5255_v26  ;;  %v786_v50 = vpop.permute.xlu0 %785  ;;  %v858_v8 = vpop.permute.xlu1 %857 }
 0x1d0   :  { %3761 = vmatprep.subr.bf16.mxu0 %v5407_v22  ;;  %790 = vst.msk [vmem:[#allocation4 + $0x48] sm:$0x7] %vm6287_vm10, %v786_v50  ;;  %vm6299_vm10 = vmmov 0  }
 0x1d1   :  { %862 = vst.msk [vmem:[#allocation4 + $0x4c] sm:$0x7] %vm6288_vm11, %v858_v8  ;;  %v2037_v8 = vld [vmem:[#allocation3 + $0x1] sm:$0x7]  ;;  %vm6300_vm11 = vcmask 523264  }
 0x1d2   :  { %1783 = vmatmul.mubr.bf16.vlgmr.msra.gmra.mrb[36].mxu0 %v1746_v40  ;;  %3708 = vmatpush3.bf16.msra.mxu1 %v5263_v2  ;;  %v1748_v40 = vpack.c.bf16 %v5471_v41, %v5471_v41 }
 0x1d3   :  { %3762 = vmatpush3.bf16.msra.mxu0 %v5277_v38  ;;  %3709 = vmatprep.subr.bf16.mxu1 %v5269_v37  ;;  %v5476_v48 = vld [vmem:[#allocation4 + $0x40] sm:$0x77]  ;;  %v804_v16 = vpop.permute.xlu0 %803  ;;  %v876_v60 = vpop.permute.xlu1 %875 }
 0x1d4   :  { %3763 = vmatprep.subr.bf16.mxu0 %v5289_v35  ;;  %v1838_v42 = vcombine.high %v5476_v48, %v5476_v48  ;;  %808 = vst.msk [vmem:[#allocation4 + $0x48] sm:$0x7] %vm6289_vm4, %v804_v16  ;;  %v1842_v49 = vpack.c.bf16 %v5476_v48, %v5476_v48  ;;  %2049 = vrot.lane.b32.xlu0 %v2037_v8, %s4434_s21  ;;  %v5753_v8 = vld [vmem:[%s6244_s5 + $0xd8] sm:$0xff]   ;;  %vm6301_vm4 = vmmov %vm6300_vm11 }
 0x1d5   :  { %880 = vst.msk [vmem:[#allocation4 + $0x4c] sm:$0x7] %vm6290_vm12, %v876_v60  ;;  %vm6302_vm12 = vmmov %vm6301_vm4 }
 0x1d6   :  { %3710 = vmatpush3.bf16.msra.mxu1 %v5283_v44  ;;  %v1843_v6 = vpack.c.bf16 %v1838_v42, %v1838_v42 }
 0x1d7   :  { %3764 = vmatpush3.bf16.msra.mxu0 %v5298_v57  ;;  %3739 = vmatprep.subr.bf16.mxu1 %v5429_v52  ;;  %v822_v29 = vpop.permute.xlu0 %821  ;;  %v894_v30 = vpop.permute.xlu1 %893 }
 0x1d8   :  { %3765 = vmatprep.subr.bf16.mxu0 %v5307_v43  ;;  %1878 = vmatprep.mubr.bf16.mxu0 %v1843_v6  ;;  %826 = vst.msk [vmem:[#allocation4 + $0x48] sm:$0x7] %vm391_vm5, %v822_v29  ;;  %898 = vst.msk [vmem:[#allocation4 + $0x4c] sm:$0x7] %vm391_vm5, %v894_v30  ;;  %v5673_v6 = vld [vmem:[%s6244_s5 + $0x68] sm:$0xff]   ;;  %v5687_v30 = vld [vmem:[%s6244_s5 + $0x70] sm:$0xff]  }
 0x1d9   :  { %1727 = vmatmul.mubr.bf16.vlgmr.msra.gmra.mrb[12].mxu1 %v1652_v28  ;;  %v5679_v28 = vld [vmem:[%s6244_s5 + $0x28] sm:$0xff]  }
 0x1da   :  { %3740 = vmatpush3.bf16.msra.mxu1 %v5158_v11  ;;  %1822 = vmatprep.mubr.bf16.mxu1 %v1749_v32  ;;  %v5692_v32 = vld [vmem:[%s6244_s5 + $0x30] sm:$0xff]  }
 0x1db   :  { %3766 = vmatpush3.bf16.msra.mxu0 %v5320_v39  ;;  %3741 = vmatprep.subr.bf16.mxu1 %v5164_v47  ;;  %v931_v62 = vpop.permute.xlu0 %930  ;;  %v1003_v3 = vpop.permute.xlu1 %1002 }
 0x1dc   :  { %3767 = vmatprep.subr.bf16.mxu0 %v5327_v31  ;;  %935 = vst.msk [vmem:[#allocation4 + $0x50] sm:$0x7] %vm6291_vm13, %v931_v62  ;;  %v5699_v62 = vld [vmem:[%s6244_s5 + $0x78] sm:$0xff]   ;;  %vm6303_vm13 = vmmov %vm6301_vm4 }
 0x1dd   :  { %1007 = vst.msk [vmem:[#allocation4 + $0x54] sm:$0x7] %vm6292_vm14, %v1003_v3  ;;  %v5704_v3 = vld [vmem:[%s6244_s5 + $0x38] sm:$0xff]   ;;  %vm6304_vm14 = vmmov %vm6301_vm4 }
 0x1de   :  { %3742 = vmatpush3.bf16.msra.mxu1 %v5183_v36 }
 0x1df   :  { %3768 = vmatpush3.bf16.msra.mxu0 %v5336_v53  ;;  %3743 = vmatprep.subr.bf16.mxu1 %v5192_v59  ;;  %v949_v51 = vpop.permute.xlu0 %948  ;;  %v1021_v54 = vpop.permute.xlu1 %1020  ;;  %v1835_v63 = vld [vmem:[#allocation4 + $0x48] sm:$0x77] }
 0x1e0   :  { %3769 = vmatprep.subr.bf16.mxu0 %v5343_v9  ;;  %953 = vst.msk [vmem:[#allocation4 + $0x50] sm:$0x7] %vm6293_vm15, %v949_v51  ;;  %v1839_v50 = vcombine.high %v1835_v63, %v1835_v63  ;;  %vm6305_vm15 = vmmov %vm6301_vm4 }
 0x1e1   :  { %1025 = vst.msk [vmem:[#allocation4 + $0x54] sm:$0x7] %vm6294_vm2, %v1021_v54  ;;  %vm6306_vm2 = vmmov %vm6301_vm4 }
 0x1e2   :  { %3744 = vmatpush3.bf16.msra.mxu1 %v5202_v4 }
 0x1e3   :  { %3770 = vmatpush3.bf16.msra.mxu0 %v5352_v12  ;;  %3745 = vmatprep.subr.bf16.mxu1 %v5209_v17  ;;  %v967_v46 = vpop.permute.xlu0 %966  ;;  %v1039_v56 = vpop.permute.xlu1 %1038 }
 0x1e4   :  { %3771 = vmatprep.subr.bf16.mxu0 %v5359_v14  ;;  %971 = vst.msk [vmem:[#allocation4 + $0x50] sm:$0x7] %vm391_vm5, %v967_v46  ;;  %1043 = vst.msk [vmem:[#allocation4 + $0x54] sm:$0x7] %vm391_vm5, %v1039_v56 }
 0x1e6   :  { %3746 = vmatpush3.bf16.msra.mxu1 %v5221_v33 }
 0x1e7   :  { %3772 = vmatpush3.bf16.msra.mxu0 %v5368_v15  ;;  %3747 = vmatprep.subr.bf16.mxu1 %v5227_v55  ;;  %v1075_v7 = vpop.permute.xlu0 %1074  ;;  %v1147_v25 = vpop.permute.xlu1 %1146 }
 0x1e8   :  { %3773 = vmatprep.subr.bf16.mxu0 %v5375_v0  ;;  %1079 = vst.msk [vmem:[#allocation4 + $0x58] sm:$0x7] %vm6295_vm0, %v1075_v7  ;;  %v5713_v7 = vld [vmem:[%s6244_s5 + $0xc0] sm:$0xff]  }
 0x1e9   :  { %1151 = vst.msk [vmem:[#allocation4 + $0x5c] sm:$0x7] %vm6296_vm1, %v1147_v25  ;;  %v5721_v25 = vld [vmem:[%s6244_s5 + $0x80] sm:$0xff]  }
 0x1ea   :  { %3748 = vmatpush3.bf16.msra.mxu1 %v5235_v21 }
 0x1eb   :  { %3774 = vmatpush3.bf16.msra.mxu0 %v5384_v45  ;;  %3749 = vmatprep.subr.bf16.mxu1 %v5241_v61  ;;  %v5520_v20 = vld [vmem:[#allocation4 + $0x50] sm:$0x77]  ;;  %v1093_v23 = vpop.permute.xlu0 %1092 }
 0x1ec   :  { %3775 = vmatprep.subr.bf16.mxu0 %v5391_v18  ;;  %v1934_v24 = vcombine.high %v5520_v20, %v5520_v20  ;;  %1097 = vst.msk [vmem:[#allocation4 + $0x58] sm:$0x7] %vm6297_vm6, %v1093_v23  ;;  %v1165_v34 = vpop.permute.xlu1 %1164  ;;  %v5727_v23 = vld [vmem:[%s6244_s5 + $0xc8] sm:$0xff]  }
 0x1ed   :  { %1169 = vst.msk [vmem:[#allocation4 + $0x5c] sm:$0x7] %vm6298_vm8, %v1165_v34  ;;  %v5734_v34 = vld [vmem:[%s6244_s5 + $0x88] sm:$0xff]  }
 0x1ee   :  { %3750 = vmatpush3.bf16.msra.mxu1 %v5249_v27  ;;  %v1939_v58 = vpack.c.bf16 %v1934_v24, %v1934_v24 }
 0x1ef   :  { %3776 = vmatpush3.bf16.msra.mxu0 %v5400_v19  ;;  %3751 = vmatprep.subr.bf16.mxu1 %v5255_v26  ;;  %v1111_v5 = vpop.permute.xlu0 %1110 }
 0x1f0   :  { %3805 = vmatprep.subr.bf16.mxu0 %v5407_v22  ;;  %1115 = vst.msk [vmem:[#allocation4 + $0x58] sm:$0x7] %vm391_vm5, %v1111_v5  ;;  %v1183_v13 = vpop.permute.xlu1 %1182  ;;  %v1845_v22 = vpack.c.bf16 %v1839_v50, %v1839_v50  ;;  %v5747_v5 = vld [vmem:[%s6244_s5 + $0x90] sm:$0xff]  }
 0x1f1   :  { %1187 = vst.msk [vmem:[#allocation4 + $0x5c] sm:$0x7] %vm391_vm5, %v1183_v13  ;;  %vm1545_vm5 = vcmask 518144  }
 0x1f2   :  { %1879 = vmatmul.mubr.bf16.vlgmr.msra.gmra.mrb[40].mxu0 %v1842_v49  ;;  %3752 = vmatpush3.bf16.msra.mxu1 %v5263_v2  ;;  %2080 = vst.msk [vmem:[#allocation5 + $0x4] sm:$0x7] %vm1545_vm5, %v2074_v10 }
 0x1f3   :  { %3806 = vmatpush3.bf16.msra.mxu0 %v5277_v38  ;;  %3753 = vmatprep.subr.bf16.mxu1 %v5269_v37 }
 0x1f4   :  { %3807 = vmatprep.subr.bf16.mxu0 %v5289_v35  ;;  %1974 = vmatprep.mubr.bf16.mxu0 %v1939_v58  ;;  %v1938_v35 = vpack.c.bf16 %v5520_v20, %v5520_v20 }
 0x1f6   :  { %3754 = vmatpush3.bf16.msra.mxu1 %v5283_v44 }
 0x1f7   :  { %3808 = vmatpush3.bf16.msra.mxu0 %v5298_v57  ;;  %3783 = vmatprep.subr.bf16.mxu1 %v5429_v52 }
 0x1f8   :  { %3809 = vmatprep.subr.bf16.mxu0 %v5307_v43  ;;  %v1931_v38 = vld [vmem:[#allocation4 + $0x58] sm:$0x77] }
 0x1f9   :  { %1823 = vmatmul.mubr.bf16.vlgmr.msra.gmra.mrb[16].mxu1 %v1748_v40  ;;  %v1935_v57 = vcombine.high %v1931_v38, %v1931_v38  ;;  %v5759_v40 = vld [vmem:[%s6244_s5 + $0x98] sm:$0xff]  }
 0x1fa   :  { %3784 = vmatpush3.bf16.msra.mxu1 %v5158_v11  ;;  %1918 = vmatprep.mubr.bf16.mxu1 %v1845_v22 }
 0x1fb   :  { %3810 = vmatpush3.bf16.msra.mxu0 %v5320_v39  ;;  %3785 = vmatprep.subr.bf16.mxu1 %v5164_v47  ;;  %v1941_v43 = vpack.c.bf16 %v1935_v57, %v1935_v57  ;;  %v1844_v39 = vpack.c.bf16 %v1835_v63, %v1835_v63  ;;  %v5741_v63 = vld [vmem:[%s6244_s5 + $0xd0] sm:$0xff]  }
 0x1fc   :  { %3811 = vmatprep.subr.bf16.mxu0 %v5327_v31 }
 0x1fe   :  { %3786 = vmatpush3.bf16.msra.mxu1 %v5183_v36 }
 0x1ff   :  { %3812 = vmatpush3.bf16.msra.mxu0 %v5336_v53  ;;  %3787 = vmatprep.subr.bf16.mxu1 %v5192_v59 }
 0x200   :  { %3813 = vmatprep.subr.bf16.mxu0 %v5343_v9  ;;  %v5641_v9 = vld [vmem:[%s6244_s5 + $0x58] sm:$0xff]  }
 0x202   :  { %3788 = vmatpush3.bf16.msra.mxu1 %v5202_v4 }
 0x203   :  { %3814 = vmatpush3.bf16.msra.mxu0 %v5352_v12  ;;  %3789 = vmatprep.subr.bf16.mxu1 %v5209_v17  ;;  %v5646_v12 = vld [vmem:[%s6244_s5 + $0x18] sm:$0xff]  }
 0x204   :  { %3815 = vmatprep.subr.bf16.mxu0 %v5359_v14  ;;  %v2025_v14 = vld [vmem:[#allocation3] sm:$0x7] }
 0x205   :  { %2031 = vst.msk [vmem:[#allocation5] sm:$0x7] %vm1545_vm5, %v2025_v14 }
 0x206   :  { %3790 = vmatpush3.bf16.msra.mxu1 %v5221_v33 }
 0x207   :  { %3816 = vmatpush3.bf16.msra.mxu0 %v5368_v15  ;;  %3791 = vmatprep.subr.bf16.mxu1 %v5227_v55  ;;  %v5651_v15 = vld [vmem:[%s6244_s5 + $0x60] sm:$0xff]  }
 0x208   :  { %3817 = vmatprep.subr.bf16.mxu0 %v5375_v0 }
 0x20a   :  { %3792 = vmatpush3.bf16.msra.mxu1 %v5235_v21 }
 0x20b   :  { %3818 = vmatpush3.bf16.msra.mxu0 %v5384_v45  ;;  %3793 = vmatprep.subr.bf16.mxu1 %v5241_v61  ;;  %v5658_v45 = vld [vmem:[%s6243_s4] ss:$0 sm:$0xff] }
 0x20c   :  { %3819 = vmatprep.subr.bf16.mxu0 %v5391_v18 }
 0x20e   :  { %3794 = vmatpush3.bf16.msra.mxu1 %v5249_v27 }
 0x20f   :  { %3820 = vmatpush3.bf16.msra.mxu0 %v5400_v19  ;;  %3795 = vmatprep.subr.bf16.mxu1 %v5255_v26  ;;  %v5666_v19 = vld [vmem:[%s6244_s5 + $0x20] sm:$0xff]  }
 0x212   :  { %1975 = vmatmul.mubr.bf16.vlgmr.msra.gmra.mrb[44].mxu0 %v1938_v35  ;;  %3796 = vmatpush3.bf16.msra.mxu1 %v5263_v2 }
 0x213   :  { %3797 = vmatprep.subr.bf16.mxu1 %v5269_v37 }
 0x216   :  { %3798 = vmatpush3.bf16.msra.mxu1 %v5283_v44 }
 0x217   :  { %3827 = vmatprep.subr.bf16.mxu1 %v5429_v52 }
 0x219   :  { %1919 = vmatmul.mubr.bf16.vlgmr.msra.gmra.mrb[20].mxu1 %v1844_v39 }
 0x21a   :  { %3828 = vmatpush3.bf16.msra.mxu1 %v5158_v11  ;;  %2014 = vmatprep.mubr.bf16.mxu1 %v1941_v43  ;;  %v1940_v11 = vpack.c.bf16 %v1931_v38, %v1931_v38  ;;  %v5765_v38 = vld [vmem:[%s6244_s5 + $0xe0] sm:$0xff]  }
 0x21b   :  { %3829 = vmatprep.subr.bf16.mxu1 %v5164_v47  ;;  %v5772_v43 = vld [vmem:[%s6244_s5 + $0xa0] sm:$0xff]  }
 0x21e   :  { %3830 = vmatpush3.bf16.msra.mxu1 %v5183_v36 }
 0x21f   :  { %3831 = vmatprep.subr.bf16.mxu1 %v5192_v59 }
 0x222   :  { %3832 = vmatpush3.bf16.msra.mxu1 %v5202_v4 }
 0x223   :  { %3833 = vmatprep.subr.bf16.mxu1 %v5209_v17 }
 0x226   :  { %3834 = vmatpush3.bf16.msra.mxu1 %v5221_v33  ;;  %v5603_v33 = vld [vmem:[%s6244_s5 + $0x40] sm:$0xff]  }
 0x227   :  { %3835 = vmatprep.subr.bf16.mxu1 %v5227_v55  ;;  %v5608_v55 = vld [vmem:[%s6244_s5] sm:$0xff]   ;;  %3849 = vmatprep.subr.bf16.mxu0 %v5603_v33 }
 0x228   :  { %3850 = vmatpush3.bf16.msra.mxu0 %v5608_v55 }
 0x22a   :  { %3836 = vmatpush3.bf16.msra.mxu1 %v5235_v21  ;;  %v5615_v21 = vld [vmem:[%s6244_s5 + $0x48] sm:$0xff]  }
 0x22b   :  { %3837 = vmatprep.subr.bf16.mxu1 %v5241_v61  ;;  %v5620_v61 = vld [vmem:[%s6244_s5 + $0x8] sm:$0xff]   ;;  %3851 = vmatprep.subr.bf16.mxu0 %v5615_v21 }
 0x22c   :  { %3852 = vmatpush3.bf16.msra.mxu0 %v5620_v61 }
 0x22e   :  { %3838 = vmatpush3.bf16.msra.mxu1 %v5249_v27  ;;  %v5627_v27 = vld [vmem:[%s6244_s5 + $0x50] sm:$0xff]  }
 0x22f   :  { %3839 = vmatprep.subr.bf16.mxu1 %v5255_v26  ;;  %3853 = vmatprep.subr.bf16.mxu0 %v5627_v27 }
 0x232   :  { %3840 = vmatpush3.bf16.msra.mxu1 %v5263_v2 }
 0x233   :  { %3841 = vmatprep.subr.bf16.mxu1 %v5269_v37  ;;  %v5633_v37 = vld [vmem:[%s6244_s5 + $0x10] sm:$0xff]  }
 0x234   :  { %3854 = vmatpush3.bf16.msra.mxu0 %v5633_v37 }
 0x235   :  { %3855 = vmatprep.subr.bf16.mxu0 %v5641_v9 }
 0x236   :  { %3842 = vmatpush3.bf16.msra.mxu1 %v5283_v44 }
 0x237   :  { %3871 = vmatprep.subr.bf16.mxu1 %v5713_v7 }
 0x238   :  { %3856 = vmatpush3.bf16.msra.mxu0 %v5646_v12 }
 0x239   :  { %2015 = vmatmul.mubr.bf16.vlgmr.msra.gmra.mrb[24].mxu1 %v1940_v11  ;;  %3857 = vmatprep.subr.bf16.mxu0 %v5651_v15 }
 0x23a   :  { %3872 = vmatpush3.bf16.msra.mxu1 %v5721_v25 }
 0x23b   :  { %3873 = vmatprep.subr.bf16.mxu1 %v5727_v23 }
 0x23c   :  { %3858 = vmatpush3.bf16.msra.mxu0 %v5666_v19 }
 0x23d   :  { %3859 = vmatprep.subr.bf16.mxu0 %v5673_v6 }
 0x23e   :  { %3874 = vmatpush3.bf16.msra.mxu1 %v5734_v34 }
 0x23f   :  { %3875 = vmatprep.subr.bf16.mxu1 %v5741_v63 }
 0x240   :  { %3860 = vmatpush3.bf16.msra.mxu0 %v5679_v28 }
 0x241   :  { %3861 = vmatprep.subr.bf16.mxu0 %v5687_v30 }
 0x242   :  { %3876 = vmatpush3.bf16.msra.mxu1 %v5747_v5 }
 0x243   :  { %3877 = vmatprep.subr.bf16.mxu1 %v5753_v8 }
 0x244   :  { %3862 = vmatpush3.bf16.msra.mxu0 %v5692_v32 }
 0x245   :  { %3863 = vmatprep.subr.bf16.mxu0 %v5699_v62 }
 0x246   :  { %v2050_v0 = vpop.permute.xlu0 %2049  ;;  %3878 = vmatpush3.bf16.msra.mxu1 %v5759_v40 }
 0x247   :  { %2068 = vst.msk [vmem:[#allocation5] sm:$0x7] %vm2067_vm9, %v2050_v0  ;;  %3879 = vmatprep.subr.bf16.mxu1 %v5765_v38 }
 0x248   :  { %3864 = vmatpush3.bf16.msra.mxu0 %v5704_v3 }
 0x249   :  { %4184 = vmatprep.subr.bf16.mxu0 %v4431_v1 }
 0x24a   :  { %3880 = vmatpush3.bf16.msra.mxu1 %v5772_v43 }
 0x24c   :  { %v3601_v47 = vpop.f32.mrb[0].mxu1 }
 0x24d   :  { %v3602_v36 = vpop.f32.mrb[1].mxu1 }
 0x24e   :  { %v3603_v59 = vadd.f32 %v3602_v36, %v3601_v47  ;;  %v3604_v4 = vpop.f32.mrb[2].mxu1 }
 0x24f   :  { %v3605_v17 = vpop.f32.mrb[3].mxu1  ;;  %v5780_v4 = vld [vmem:[%s6244_s5 + $0xe8] sm:$0xff]  }
 0x250   :  { %v1498_v41 = vadd.f32 %v3603_v59, %v5658_v45  ;;  %v5785_v17 = vld [vmem:[%s6244_s5 + $0xa8] sm:$0xff]   ;;  %3881 = vmatprep.subr.bf16.mxu1 %v5780_v4 }
 0x251   :  { %3882 = vmatpush3.bf16.msra.mxu1 %v5785_v17 }
 0x264   :  { %v3645_v26 = vpop.f32.mrb[28].mxu0 }
 0x265   :  { %v3646_v2 = vpop.f32.mrb[29].mxu0 }
 0x266   :  { %v5635_v44 = vadd.f32 %v3646_v2, %v3645_v26  ;;  %v3648_v31 = vpop.f32.mrb[30].mxu0  ;;  %v5793_v2 = vld [vmem:[%s6244_s5 + $0xf0] sm:$0xff]  }
 0x267   :  { %v3649_v53 = vpop.f32.mrb[31].mxu0  ;;  %3883 = vmatprep.subr.bf16.mxu1 %v5793_v2  ;;  %v5805_v31 = vld [vmem:[%s6244_s5 + $0xf8] sm:$0xff]  }
 0x268   :  { %v1594_v39 = vadd.f32 %v5635_v44, %v5658_v45  ;;  %v5798_v44 = vld [vmem:[%s6244_s5 + $0xb0] sm:$0xff]   ;;  %v5810_v53 = vld [vmem:[%s6244_s5 + $0xb8] sm:$0xff]  }
 0x269   :  { %3884 = vmatpush3.bf16.msra.mxu1 %v5798_v44 }
 0x26a   :  { %3885 = vmatprep.subr.bf16.mxu1 %v5805_v31 }
 0x26c   :  { %v3623_v18 = vpop.f32.mrb[4].mxu1 }
 0x26d   :  { %v3624_v52 = vpop.f32.mrb[5].mxu1  ;;  %3886 = vmatpush3.bf16.msra.mxu1 %v5810_v53 }
 0x26e   :  { %v3625_v48 = vadd.f32 %v3624_v52, %v3623_v18  ;;  %v3626_v16 = vpop.f32.mrb[6].mxu1  ;;  %3920 = vmatprep.subr.bf16.mxu1 %v5713_v7 }
 0x26f   :  { %v3627_v60 = vpop.f32.mrb[7].mxu1 }
 0x270   :  { %v1538_v42 = vadd.f32 %v3625_v48, %v1498_v41 }
 0x272   :  { %v1543_v29 = vmax.f32 %v1538_v42, 0.0 }
 0x274   :  { %1546 = vst.msk [vmem:[#allocation3 + $0x9] sm:$0x7] %vm1545_vm5, %v1543_v29 }
 0x27b   :  { %v2134_v51 = vld [vmem:[#allocation3 + $0xa] sm:$0x7] }
 0x27c   :  { %v2086_v54 = vld [vmem:[#allocation3 + $0x8] sm:$0x7]  ;;  %2146 = vrot.lane.b32.xlu0 %v2134_v51, %s4434_s21 }
 0x27d   :  { %2098 = vrot.lane.b32.xlu1 %v2086_v54, %s4434_s21  ;;  %v2122_v46 = vld [vmem:[#allocation3 + $0x9] sm:$0x7] }
 0x27e   :  { %v2026_v56 = vld [vmem:[#allocation3 + $0x8] sm:$0x7]  ;;  %2128 = vst.msk [vmem:[#allocation5 + $0x8] sm:$0x7] %vm1545_vm5, %v2122_v46 }
 0x27f   :  { %2032 = vst.msk [vmem:[#allocation5 + $0x14] sm:$0x7] %vm1545_vm5, %v2026_v56  ;;  %v2075_v20 = vld [vmem:[#allocation3 + $0xa] sm:$0x7] }
 0x280   :  { %2081 = vst.msk [vmem:[#allocation5 + $0x18] sm:$0x7] %vm1545_vm5, %v2075_v20  ;;  %v2038_v24 = vld [vmem:[#allocation3 + $0x9] sm:$0x7] }
 0x281   :  { %2051 = vrot.lane.b32.xlu0 %v2038_v24, %s4434_s21 }
 0x284   :  { %v3689_v49 = vpop.f32.mrb[32].mxu0 }
 0x285   :  { %v3690_v58 = vpop.f32.mrb[33].mxu0 }
 0x286   :  { %v3691_v13 = vadd.f32 %v3690_v58, %v3689_v49  ;;  %v3692_v50 = vpop.f32.mrb[34].mxu0 }
 0x287   :  { %v3693_v22 = vpop.f32.mrb[35].mxu0 }
 0x288   :  { %v1689_v24 = vadd.f32 %v3691_v13, %v5658_v45 }
 0x28c   :  { %v3667_v35 = vpop.f32.mrb[8].mxu1 }
 0x28d   :  { %v3668_v57 = vpop.f32.mrb[9].mxu1 }
 0x28e   :  { %v3669_v11 = vadd.f32 %v3668_v57, %v3667_v35  ;;  %v3670_v47 = vpop.f32.mrb[10].mxu1  ;;  %v2172_v57 = vld [vmem:[#allocation3 + $0x20] sm:$0x7] }
 0x28f   :  { %v3671_v36 = vpop.f32.mrb[11].mxu1  ;;  %2178 = vst.msk [vmem:[#allocation5 + $0x34] sm:$0x7] %vm1545_vm5, %v2172_v57  ;;  %v2220_v57 = vld [vmem:[#allocation3 + $0x22] sm:$0x7] }
 0x290   :  { %v1634_v59 = vadd.f32 %v3669_v11, %v1594_v39  ;;  %2226 = vst.msk [vmem:[#allocation5 + $0x38] sm:$0x7] %vm1545_vm5, %v2220_v57 }
 0x292   :  { %v1639_v26 = vmax.f32 %v1634_v59, 0.0  ;;  %v2040_v59 = vld [vmem:[#allocation3 + $0x29] sm:$0x7] }
 0x294   :  { %1641 = vst.msk [vmem:[#allocation3 + $0x11] sm:$0x7] %vm1545_vm5, %v1639_v26 }
 0x29b   :  { %v2218_v14 = vld [vmem:[#allocation3 + $0x12] sm:$0x7] }
 0x29c   :  { %v2182_v0 = vld [vmem:[#allocation3 + $0x11] sm:$0x7]  ;;  %2224 = vst.msk [vmem:[#allocation5 + $0x10] sm:$0x7] %vm1545_vm5, %v2218_v14  ;;  %v2184_v14 = vld [vmem:[#allocation3 + $0x21] sm:$0x7] }
 0x29d   :  { %v2135_v18 = vld [vmem:[#allocation3 + $0x12] sm:$0x7]  ;;  %2194 = vrot.lane.b32.xlu1 %v2182_v0, %s4434_s21 }
 0x29e   :  { %2148 = vrot.lane.b32.xlu0 %v2135_v18, %s4434_s21  ;;  %v2170_v52 = vld [vmem:[#allocation3 + $0x10] sm:$0x7] }
 0x29f   :  { %2176 = vst.msk [vmem:[#allocation5 + $0xc] sm:$0x7] %vm1545_vm5, %v2170_v52  ;;  %v2123_v41 = vld [vmem:[#allocation3 + $0x11] sm:$0x7] }
 0x2a0   :  { %v2027_v48 = vld [vmem:[#allocation3 + $0x10] sm:$0x7]  ;;  %2129 = vst.msk [vmem:[#allocation5 + $0x1c] sm:$0x7] %vm1545_vm5, %v2123_v41 }
 0x2a1   :  { %v2076_v16 = vld [vmem:[#allocation3 + $0x12] sm:$0x7]  ;;  %2033 = vst.msk [vmem:[#allocation5 + $0x28] sm:$0x7] %vm1545_vm5, %v2027_v48 }
 0x2a2   :  { %2082 = vst.msk [vmem:[#allocation5 + $0x2c] sm:$0x7] %vm1545_vm5, %v2076_v16  ;;  %v2087_v60 = vld [vmem:[#allocation3 + $0x10] sm:$0x7]  ;;  %v2028_v16 = vld [vmem:[#allocation3 + $0x28] sm:$0x7] }
 0x2a3   :  { %v2039_v42 = vld [vmem:[#allocation3 + $0x11] sm:$0x7]  ;;  %2100 = vrot.lane.b32.xlu1 %v2087_v60, %s4434_s21  ;;  %2034 = vst.msk [vmem:[#allocation5 + $0x3c] sm:$0x7] %vm1545_vm5, %v2028_v16 }
 0x2a4   :  { %2053 = vrot.lane.b32.xlu0 %v2039_v42, %s4434_s21 }
 0x2a5   :  { %v3733_v10 = vpop.f32.mrb[36].mxu0 }
 0x2a6   :  { %v3734_v29 = vpop.f32.mrb[37].mxu0 }
 0x2a7   :  { %v3735_v51 = vadd.f32 %v3734_v29, %v3733_v10  ;;  %v3736_v54 = vpop.f32.mrb[38].mxu0 }
 0x2a8   :  { %v3737_v46 = vpop.f32.mrb[39].mxu0 }
 0x2a9   :  { %v1785_v10 = vadd.f32 %v3735_v51, %v5658_v45  ;;  %v2077_v46 = vld [vmem:[#allocation3 + $0x2a] sm:$0x7] }
 0x2aa   :  { %2083 = vst.msk [vmem:[#allocation5 + $0x40] sm:$0x7] %vm1545_vm5, %v2077_v46 }
 0x2ac   :  { %v3711_v56 = vpop.f32.mrb[12].mxu1 }
 0x2ad   :  { %v3712_v20 = vpop.f32.mrb[13].mxu1 }
 0x2ae   :  { %v3713_v49 = vadd.f32 %v3712_v20, %v3711_v56  ;;  %v3714_v58 = vpop.f32.mrb[14].mxu1 }
 0x2af   :  { %v3715_v50 = vpop.f32.mrb[15].mxu1 }
 0x2b0   :  { %v1729_v22 = vadd.f32 %v3713_v49, %v1689_v24 }
 0x2b2   :  { %v1734_v35 = vmax.f32 %v1729_v22, 0.0 }
 0x2b4   :  { %1736 = vst.msk [vmem:[#allocation3 + $0x19] sm:$0x7] %vm1545_vm5, %v1734_v35 }
 0x2bb   :  { %v2219_v39 = vld [vmem:[#allocation3 + $0x1a] sm:$0x7] }
 0x2bc   :  { %v2183_v11 = vld [vmem:[#allocation3 + $0x19] sm:$0x7]  ;;  %2225 = vst.msk [vmem:[#allocation5 + $0x24] sm:$0x7] %vm1545_vm5, %v2219_v39 }
 0x2bd   :  { %v2136_v47 = vld [vmem:[#allocation3 + $0x1a] sm:$0x7]  ;;  %2196 = vrot.lane.b32.xlu1 %v2183_v11, %s4434_s21 }
 0x2be   :  { %2150 = vrot.lane.b32.xlu0 %v2136_v47, %s4434_s21  ;;  %v2171_v13 = vld [vmem:[#allocation3 + $0x18] sm:$0x7] }
 0x2bf   :  { %v2124_v36 = vld [vmem:[#allocation3 + $0x19] sm:$0x7]  ;;  %2177 = vst.msk [vmem:[#allocation5 + $0x20] sm:$0x7] %vm1545_vm5, %v2171_v13 }
 0x2c0   :  { %2130 = vst.msk [vmem:[#allocation5 + $0x30] sm:$0x7] %vm1545_vm5, %v2124_v36  ;;  %v2088_v26 = vld [vmem:[#allocation3 + $0x18] sm:$0x7] }
 0x2c1   :  { %2102 = vrot.lane.b32.xlu1 %v2088_v26, %s4434_s21 }
 0x2c2   :  { %2055 = vrot.lane.b32.xlu0 %v2040_v59, %s4434_s21 }
 0x2c5   :  { %2198 = vrot.lane.b32.xlu1 %v2184_v14, %s4434_s21  ;;  %v3777_v0 = vpop.f32.mrb[40].mxu0 }
 0x2c6   :  { %v3778_v18 = vpop.f32.mrb[41].mxu0 }
 0x2c7   :  { %v3779_v52 = vadd.f32 %v3778_v18, %v3777_v0  ;;  %v3780_v41 = vpop.f32.mrb[42].mxu0 }
 0x2c8   :  { %v3781_v48 = vpop.f32.mrb[43].mxu0 }
 0x2c9   :  { %v1881_v14 = vadd.f32 %v3779_v52, %v5658_v45  ;;  %v5854_v52 = vld [vmem:[%s6244_s5 + $0x100] sm:$0xff]  }
 0x2cc   :  { %v3755_v60 = vpop.f32.mrb[16].mxu1 }
 0x2cd   :  { %v3756_v42 = vpop.f32.mrb[17].mxu1 }
 0x2ce   :  { %v3757_v29 = vadd.f32 %v3756_v42, %v3755_v60  ;;  %v3758_v54 = vpop.f32.mrb[18].mxu1 }
 0x2cf   :  { %v3759_v56 = vpop.f32.mrb[19].mxu1 }
 0x2d0   :  { %v1825_v20 = vadd.f32 %v3757_v29, %v1785_v10 }
 0x2d2   :  { %v1830_v24 = vmax.f32 %v1825_v20, 0.0 }
 0x2d4   :  { %1832 = vst.msk [vmem:[#allocation3 + $0x31] sm:$0x7] %vm1545_vm5, %v1830_v24 }
 0x2db   :  { %v2089_v49 = vld [vmem:[#allocation3 + $0x30] sm:$0x7] }
 0x2dc   :  { %v2137_v58 = vld [vmem:[#allocation3 + $0x32] sm:$0x7]  ;;  %2104 = vrot.lane.b32.xlu1 %v2089_v49, %s4434_s21 }
 0x2dd   :  { %2152 = vrot.lane.b32.xlu0 %v2137_v58, %s4434_s21  ;;  %v2125_v50 = vld [vmem:[#allocation3 + $0x31] sm:$0x7] }
 0x2de   :  { %v2029_v22 = vld [vmem:[#allocation3 + $0x30] sm:$0x7]  ;;  %2131 = vst.msk [vmem:[#allocation5 + $0x44] sm:$0x7] %vm1545_vm5, %v2125_v50 }
 0x2df   :  { %v2078_v35 = vld [vmem:[#allocation3 + $0x32] sm:$0x7]  ;;  %2035 = vst.msk [vmem:[#allocation5 + $0x50] sm:$0x7] %vm1545_vm5, %v2029_v22 }
 0x2e0   :  { %2084 = vst.msk [vmem:[#allocation5 + $0x54] sm:$0x7] %vm1545_vm5, %v2078_v35  ;;  %v2041_v51 = vld [vmem:[#allocation3 + $0x31] sm:$0x7] }
 0x2e1   :  { %2057 = vrot.lane.b32.xlu0 %v2041_v51, %s4434_s21  ;;  %v5864_v51 = vld [vmem:[%s6244_s5 + $0x108] sm:$0xff]  }
 0x2e5   :  { %v3821_v39 = vpop.f32.mrb[44].mxu0 }
 0x2e6   :  { %v3822_v11 = vpop.f32.mrb[45].mxu0 }
 0x2e7   :  { %v3823_v47 = vadd.f32 %v3822_v11, %v3821_v39  ;;  %v3824_v13 = vpop.f32.mrb[46].mxu0  ;;  %v5878_v11 = vld [vmem:[%s6244_s5 + $0x110] sm:$0xff]  }
 0x2e8   :  { %v3825_v36 = vpop.f32.mrb[47].mxu0  ;;  %v5885_v13 = vld [vmem:[%s6244_s5 + $0x118] sm:$0xff]  }
 0x2e9   :  { %v2305_v36 = vld [vmem:[#allocation5 + $0x10] sm:$0x7] }
 0x2ec   :  { %v3799_v59 = vpop.f32.mrb[20].mxu1 }
 0x2ed   :  { %v3800_v26 = vpop.f32.mrb[21].mxu1 }
 0x2ee   :  { %v3801_v0 = vadd.f32 %v3800_v26, %v3799_v59  ;;  %v3802_v18 = vpop.f32.mrb[22].mxu1  ;;  %v2147_v41 = vpop.permute.xlu0 %2146  ;;  %v2316_v59 = vpack.c.bf16 %v2305_v36, %v2305_v36 }
 0x2ef   :  { %2164 = vst.msk [vmem:[#allocation5 + $0x8] sm:$0x7] %vm2067_vm9, %v2147_v41  ;;  %v2099_v48 = vpop.permute.xlu1 %2098  ;;  %v3803_v16 = vpop.f32.mrb[23].mxu1 }
 0x2f0   :  { %v1921_v60 = vadd.f32 %v3801_v0, %v1881_v14  ;;  %2116 = vst.msk [vmem:[#allocation5 + $0x4] sm:$0x7] %vm2067_vm9, %v2099_v48  ;;  %v1977_v0 = vadd.f32 %v3823_v47, %v5658_v45 }
 0x2f2   :  { %v1926_v42 = vmax.f32 %v1921_v60, 0.0 }
 0x2f3   :  { %v2052_v10 = vpop.permute.xlu0 %2051 }
 0x2f4   :  { %2069 = vst.msk [vmem:[#allocation5 + $0x14] sm:$0x7] %vm2067_vm9, %v2052_v10 }
 0x2f5   :  { %1928 = vst.msk [vmem:[#allocation3 + $0x39] sm:$0x7] %vm1545_vm5, %v1926_v42 }
 0x2f7   :  { %v2303_v29 = vld [vmem:[#allocation5] sm:$0x77] }
 0x2f8   :  { %v2308_v54 = vcombine.high %v2303_v29, %v2303_v29  ;;  %v2312_v20 = vpack.c.bf16 %v2303_v29, %v2303_v29 }
 0x2fa   :  { %v2313_v46 = vpack.c.bf16 %v2308_v54, %v2308_v54  ;;  %v2175_v54 = vld [vmem:[#allocation3 + $0x48] sm:$0x7] }
 0x2fb   :  { %2181 = vst.msk [vmem:[#allocation5 + $0x70] sm:$0x7] %vm1545_vm5, %v2175_v54 }
 0x2fc   :  { %v2221_v56 = vld [vmem:[#allocation3 + $0x3a] sm:$0x7]  ;;  %2574 = vmatprep.mubr.bf16.mxu0 %v2313_v46 }
 0x2fd   :  { %v2185_v24 = vld [vmem:[#allocation3 + $0x39] sm:$0x7]  ;;  %2227 = vst.msk [vmem:[#allocation5 + $0x4c] sm:$0x7] %vm1545_vm5, %v2221_v56  ;;  %2575 = vmatmul.mubr.bf16.vlgmr.msra.gmra.mrb[48].mxu0 %v2312_v20 }
 0x2fe   :  { %v2138_v49 = vld [vmem:[#allocation3 + $0x3a] sm:$0x7]  ;;  %2200 = vrot.lane.b32.xlu1 %v2185_v24, %s4434_s21  ;;  %4185 = vmatpush3.bf16.msra.mxu0 %v5854_v52 }
 0x2ff   :  { %v2173_v58 = vld [vmem:[#allocation3 + $0x38] sm:$0x7]  ;;  %2154 = vrot.lane.b32.xlu0 %v2138_v49, %s4434_s21  ;;  %4192 = vmatprep.mubr.msk.bf16.mxu0 %vm6299_vm10, %v4431_v1 }
 0x300   :  { %2179 = vst.msk [vmem:[#allocation5 + $0x48] sm:$0x7] %vm1545_vm5, %v2173_v58  ;;  %v2126_v50 = vld [vmem:[#allocation3 + $0x39] sm:$0x7]  ;;  %4186 = vmatprep.subr.bf16.mxu0 %v4431_v1 }
 0x301   :  { %v2030_v22 = vld [vmem:[#allocation3 + $0x38] sm:$0x7]  ;;  %2132 = vst.msk [vmem:[#allocation5 + $0x58] sm:$0x7] %vm1545_vm5, %v2126_v50 }
 0x302   :  { %v2079_v35 = vld [vmem:[#allocation3 + $0x3a] sm:$0x7]  ;;  %2036 = vst.msk [vmem:[#allocation5 + $0x64] sm:$0x7] %vm1545_vm5, %v2030_v22  ;;  %4187 = vmatpush3.bf16.msra.mxu0 %v5864_v51 }
 0x303   :  { %2085 = vst.msk [vmem:[#allocation5 + $0x68] sm:$0x7] %vm1545_vm5, %v2079_v35  ;;  %v2090_v57 = vld [vmem:[#allocation3 + $0x38] sm:$0x7]  ;;  %4188 = vmatprep.subr.bf16.mxu0 %v4431_v1 }
 0x304   :  { %2106 = vrot.lane.b32.xlu1 %v2090_v57, %s4434_s21  ;;  %v2042_v39 = vld [vmem:[#allocation3 + $0x39] sm:$0x7] }
 0x305   :  { %2059 = vrot.lane.b32.xlu0 %v2042_v39, %s4434_s21 }
 0x306   :  { %4189 = vmatpush3.bf16.msra.mxu0 %v5878_v11 }
 0x307   :  { %4190 = vmatprep.subr.bf16.mxu0 %v4431_v1 }
 0x30a   :  { %4191 = vmatpush3.bf16.msra.mxu0 %v5885_v13 }
 0x30b   :  { %3898 = vmatprep.subr.bf16.mxu0 %v5603_v33 }
 0x30c   :  { %v3843_v26 = vpop.f32.mrb[24].mxu1 }
 0x30d   :  { %4193 = vmatmul.mubr.msk.bf16.vlgmr.msra.gmra.mrb[52].mxu0 %vm6300_vm11, %v2316_v59  ;;  %v3844_v14 = vpop.f32.mrb[25].mxu1  ;;  %v2187_v59 = vld [vmem:[#allocation3 + $0x49] sm:$0x7] }
 0x30e   :  { %3899 = vmatpush3.bf16.msra.mxu0 %v5608_v55  ;;  %v3845_v18 = vadd.f32 %v3844_v14, %v3843_v26  ;;  %v3846_v41 = vpop.f32.mrb[26].mxu1 }
 0x30f   :  { %v2195_v48 = vpop.permute.xlu1 %2194  ;;  %v3847_v60 = vpop.f32.mrb[27].mxu1  ;;  %3900 = vmatprep.subr.bf16.mxu0 %v5615_v21 }
 0x310   :  { %2212 = vst.msk [vmem:[#allocation5 + $0xc] sm:$0x7] %vm2067_vm9, %v2195_v48  ;;  %v2149_v16 = vpop.permute.xlu0 %2148  ;;  %v2017_v42 = vadd.f32 %v3845_v18, %v1977_v0 }
 0x311   :  { %2165 = vst.msk [vmem:[#allocation5 + $0x1c] sm:$0x7] %vm2067_vm9, %v2149_v16 }
 0x312   :  { %v2022_v10 = vmax.f32 %v2017_v42, 0.0  ;;  %3901 = vmatpush3.bf16.msra.mxu0 %v5620_v61  ;;  %v2667_v42 = vld [vmem:[#allocation5 + $0x24] sm:$0x7] }
 0x313   :  { %3902 = vmatprep.subr.bf16.mxu0 %v5627_v27 }
 0x314   :  { %2024 = vst.msk [vmem:[#allocation3 + $0x41] sm:$0x7] %vm1545_vm5, %v2022_v10 }
 0x315   :  { %v2101_v29 = vpop.permute.xlu1 %2100 }
 0x316   :  { %2117 = vst.msk [vmem:[#allocation5 + $0x18] sm:$0x7] %vm2067_vm9, %v2101_v29  ;;  %v2054_v45 = vpop.permute.xlu0 %2053  ;;  %3903 = vmatpush3.bf16.msra.mxu0 %v5633_v37 }
 0x317   :  { %2070 = vst.msk [vmem:[#allocation5 + $0x28] sm:$0x7] %vm2067_vm9, %v2054_v45  ;;  %v2304_v47 = vld [vmem:[#allocation5 + $0x8] sm:$0x77]  ;;  %3904 = vmatprep.subr.bf16.mxu0 %v5641_v9 }
 0x318   :  { %v2309_v46 = vcombine.high %v2304_v47, %v2304_v47  ;;  %v2314_v20 = vpack.c.bf16 %v2304_v47, %v2304_v47  ;;  %v2678_v47 = vpack.c.bf16 %v2667_v42, %v2667_v42 }
 0x31a   :  { %v2315_v56 = vpack.c.bf16 %v2309_v46, %v2309_v46  ;;  %3905 = vmatpush3.bf16.msra.mxu0 %v5646_v12 }
 0x31b   :  { %v2222_v49 = vld [vmem:[#allocation3 + $0x42] sm:$0x7]  ;;  %3906 = vmatprep.subr.bf16.mxu0 %v5651_v15 }
 0x31c   :  { %2614 = vmatprep.mubr.bf16.mxu1 %v2315_v56  ;;  %v2186_v58 = vld [vmem:[#allocation3 + $0x41] sm:$0x7]  ;;  %2228 = vst.msk [vmem:[#allocation5 + $0x60] sm:$0x7] %vm1545_vm5, %v2222_v49 }
 0x31d   :  { %v2665_v24 = vld [vmem:[#allocation5 + $0x14] sm:$0x77]  ;;  %2615 = vmatmul.mubr.bf16.vlgmr.msra.gmra.mrb[28].mxu1 %v2314_v20  ;;  %2202 = vrot.lane.b32.xlu1 %v2186_v58, %s4434_s21  ;;  %v2174_v35 = vld [vmem:[#allocation3 + $0x40] sm:$0x7] }
 0x31e   :  { %v2139_v50 = vld [vmem:[#allocation3 + $0x42] sm:$0x7]  ;;  %v2670_v22 = vcombine.high %v2665_v24, %v2665_v24  ;;  %3921 = vmatpush3.bf16.msra.mxu1 %v5721_v25  ;;  %2180 = vst.msk [vmem:[#allocation5 + $0x5c] sm:$0x7] %vm1545_vm5, %v2174_v35  ;;  %3907 = vmatpush3.bf16.msra.mxu0 %v5666_v19  ;;  %v2674_v26 = vpack.c.bf16 %v2665_v24, %v2665_v24 }
 0x31f   :  { %v2127_v57 = vld [vmem:[#allocation3 + $0x41] sm:$0x7]  ;;  %2156 = vrot.lane.b32.xlu0 %v2139_v50, %s4434_s21  ;;  %3922 = vmatprep.subr.bf16.mxu1 %v5727_v23 }
 0x320   :  { %v2675_v39 = vpack.c.bf16 %v2670_v22, %v2670_v22  ;;  %2133 = vst.msk [vmem:[#allocation5 + $0x6c] sm:$0x7] %vm1545_vm5, %v2127_v57  ;;  %3908 = vmatprep.subr.bf16.mxu0 %v5673_v6  ;;  %v2091_v36 = vld [vmem:[#allocation3 + $0x40] sm:$0x7]  ;;  %v2223_v22 = vld [vmem:[#allocation3 + $0x4a] sm:$0x7] }
 0x321   :  { %2108 = vrot.lane.b32.xlu1 %v2091_v36, %s4434_s21  ;;  %2229 = vst.msk [vmem:[#allocation5 + $0x74] sm:$0x7] %vm1545_vm5, %v2223_v22 }
 0x322   :  { %2714 = vmatprep.mubr.bf16.mxu0 %v2675_v39  ;;  %3923 = vmatpush3.bf16.msra.mxu1 %v5734_v34 }
 0x323   :  { %3909 = vmatpush3.bf16.msra.mxu0 %v5679_v28  ;;  %3924 = vmatprep.subr.bf16.mxu1 %v5741_v63 }
 0x324   :  { %3910 = vmatprep.subr.bf16.mxu0 %v5687_v30 }
 0x325   :  { %2204 = vrot.lane.b32.xlu1 %v2187_v59, %s4434_s21 }
 0x326   :  { %3925 = vmatpush3.bf16.msra.mxu1 %v5747_v5 }
 0x327   :  { %3911 = vmatpush3.bf16.msra.mxu0 %v5692_v32  ;;  %3926 = vmatprep.subr.bf16.mxu1 %v5753_v8 }
 0x328   :  { %3912 = vmatprep.subr.bf16.mxu0 %v5699_v62 }
 0x32a   :  { %3927 = vmatpush3.bf16.msra.mxu1 %v5759_v40 }
 0x32b   :  { %3913 = vmatpush3.bf16.msra.mxu0 %v5704_v3  ;;  %3928 = vmatprep.subr.bf16.mxu1 %v5765_v38 }
 0x32c   :  { %4196 = vmatprep.subr.bf16.mxu0 %v4431_v1 }
 0x32e   :  { %2715 = vmatmul.mubr.bf16.vlgmr.msra.gmra.mrb[56].mxu0 %v2674_v26  ;;  %3929 = vmatpush3.bf16.msra.mxu1 %v5772_v43  ;;  %v2807_v26 = vld [vmem:[#allocation5 + $0x38] sm:$0x7] }
 0x32f   :  { %4197 = vmatpush3.bf16.msra.mxu0 %v5854_v52  ;;  %v2197_v14 = vpop.permute.xlu1 %2196  ;;  %3930 = vmatprep.subr.bf16.mxu1 %v5780_v4 }
 0x330   :  { %v2151_v0 = vpop.permute.xlu0 %2150  ;;  %2213 = vst.msk [vmem:[#allocation5 + $0x20] sm:$0x7] %vm2067_vm9, %v2197_v14  ;;  %4198 = vmatprep.subr.bf16.mxu0 %v4431_v1  ;;  %4204 = vmatprep.mubr.msk.bf16.mxu0 %vm6299_vm10, %v4431_v1  ;;  %v2818_v14 = vpack.c.bf16 %v2807_v26, %v2807_v26  ;;  %v4402_v26 = vld [vmem:[%s6244_s5 + $0x28] sm:$0xff]  }
 0x331   :  { %2166 = vst.msk [vmem:[#allocation5 + $0x30] sm:$0x7] %vm2067_vm9, %v2151_v0 }
 0x332   :  { %3931 = vmatpush3.bf16.msra.mxu1 %v5785_v17 }
 0x333   :  { %4199 = vmatpush3.bf16.msra.mxu0 %v5864_v51  ;;  %v2103_v18 = vpop.permute.xlu1 %2102  ;;  %3932 = vmatprep.subr.bf16.mxu1 %v5793_v2 }
 0x334   :  { %v2056_v41 = vpop.permute.xlu0 %2055  ;;  %2118 = vst.msk [vmem:[#allocation5 + $0x2c] sm:$0x7] %vm2067_vm9, %v2103_v18  ;;  %4200 = vmatprep.subr.bf16.mxu0 %v4431_v1 }
 0x335   :  { %2071 = vst.msk [vmem:[#allocation5 + $0x3c] sm:$0x7] %vm2067_vm9, %v2056_v41 }
 0x336   :  { %3933 = vmatpush3.bf16.msra.mxu1 %v5798_v44 }
 0x337   :  { %4201 = vmatpush3.bf16.msra.mxu0 %v5878_v11  ;;  %v2199_v48 = vpop.permute.xlu1 %2198  ;;  %3934 = vmatprep.subr.bf16.mxu1 %v5805_v31  ;;  %v2666_v16 = vld [vmem:[#allocation5 + $0x1c] sm:$0x77] }
 0x338   :  { %2214 = vst.msk [vmem:[#allocation5 + $0x34] sm:$0x7] %vm2067_vm9, %v2199_v48  ;;  %4202 = vmatprep.subr.bf16.mxu0 %v4431_v1  ;;  %v2671_v60 = vcombine.high %v2666_v16, %v2666_v16  ;;  %v2676_v29 = vpack.c.bf16 %v2666_v16, %v2666_v16 }
 0x33a   :  { %3935 = vmatpush3.bf16.msra.mxu1 %v5810_v53  ;;  %v2677_v10 = vpack.c.bf16 %v2671_v60, %v2671_v60 }
 0x33b   :  { %4203 = vmatpush3.bf16.msra.mxu0 %v5885_v13  ;;  %3947 = vmatprep.subr.bf16.mxu1 %v5603_v33  ;;  %v2805_v45 = vld [vmem:[#allocation5 + $0x28] sm:$0x77] }
 0x33c   :  { %2754 = vmatprep.mubr.bf16.mxu1 %v2677_v10  ;;  %3969 = vmatprep.subr.bf16.mxu0 %v5713_v7  ;;  %v2810_v54 = vcombine.high %v2805_v45, %v2805_v45  ;;  %v2814_v39 = vpack.c.bf16 %v2805_v45, %v2805_v45  ;;  %v2955_v45 = vld [vmem:[#allocation5 + $0x4c] sm:$0x7] }
 0x33d   :  { %2755 = vmatmul.mubr.bf16.vlgmr.msra.gmra.mrb[32].mxu1 %v2676_v29 }
 0x33e   :  { %4205 = vmatmul.mubr.msk.bf16.vlgmr.msra.gmra.mrb[60].mxu0 %vm6301_vm4, %v2678_v47  ;;  %3948 = vmatpush3.bf16.msra.mxu1 %v5608_v55  ;;  %v2815_v46 = vpack.c.bf16 %v2810_v54, %v2810_v54 }
 0x33f   :  { %3970 = vmatpush3.bf16.msra.mxu0 %v5721_v25  ;;  %3949 = vmatprep.subr.bf16.mxu1 %v5615_v21  ;;  %v2806_v56 = vld [vmem:[#allocation5 + $0x30] sm:$0x77] }
 0x340   :  { %2854 = vmatprep.mubr.bf16.mxu1 %v2815_v46  ;;  %3971 = vmatprep.subr.bf16.mxu0 %v5727_v23  ;;  %v2811_v20 = vcombine.high %v2806_v56, %v2806_v56  ;;  %v2816_v59 = vpack.c.bf16 %v2806_v56, %v2806_v56  ;;  %v2966_v46 = vpack.c.bf16 %v2955_v45, %v2955_v45 }
 0x342   :  { %3950 = vmatpush3.bf16.msra.mxu1 %v5620_v61  ;;  %v2817_v24 = vpack.c.bf16 %v2811_v20, %v2811_v20 }
 0x343   :  { %3972 = vmatpush3.bf16.msra.mxu0 %v5734_v34  ;;  %3951 = vmatprep.subr.bf16.mxu1 %v5627_v27 }
 0x344   :  { %3973 = vmatprep.subr.bf16.mxu0 %v5741_v63  ;;  %2894 = vmatprep.mubr.bf16.mxu0 %v2817_v24 }
 0x346   :  { %3952 = vmatpush3.bf16.msra.mxu1 %v5633_v37 }
 0x347   :  { %3974 = vmatpush3.bf16.msra.mxu0 %v5747_v5  ;;  %3953 = vmatprep.subr.bf16.mxu1 %v5641_v9 }
 0x348   :  { %3975 = vmatprep.subr.bf16.mxu0 %v5753_v8 }
 0x34a   :  { %3954 = vmatpush3.bf16.msra.mxu1 %v5646_v12 }
 0x34b   :  { %3976 = vmatpush3.bf16.msra.mxu0 %v5759_v40  ;;  %3955 = vmatprep.subr.bf16.mxu1 %v5651_v15 }
 0x34c   :  { %3977 = vmatprep.subr.bf16.mxu0 %v5765_v38 }
 0x34e   :  { %3956 = vmatpush3.bf16.msra.mxu1 %v5666_v19  ;;  %v2105_v49 = vpop.permute.xlu1 %2104 }
 0x34f   :  { %3978 = vmatpush3.bf16.msra.mxu0 %v5772_v43  ;;  %v2153_v58 = vpop.permute.xlu0 %2152  ;;  %3957 = vmatprep.subr.bf16.mxu1 %v5673_v6  ;;  %2119 = vst.msk [vmem:[#allocation5 + $0x40] sm:$0x7] %vm2067_vm9, %v2105_v49  ;;  %v4396_v49 = vld [vmem:[%s6244_s5 + $0x10] sm:$0xff]  }
 0x350   :  { %2167 = vst.msk [vmem:[#allocation5 + $0x44] sm:$0x7] %vm2067_vm9, %v2153_v58  ;;  %3979 = vmatprep.subr.bf16.mxu0 %v5780_v4  ;;  %v4397_v58 = vld [vmem:[%s6244_s5 + $0x58] sm:$0xff]  }
 0x352   :  { %3958 = vmatpush3.bf16.msra.mxu1 %v5679_v28 }
 0x353   :  { %3980 = vmatpush3.bf16.msra.mxu0 %v5785_v17  ;;  %v2058_v50 = vpop.permute.xlu0 %2057  ;;  %3959 = vmatprep.subr.bf16.mxu1 %v5687_v30 }
 0x354   :  { %2072 = vst.msk [vmem:[#allocation5 + $0x50] sm:$0x7] %vm2067_vm9, %v2058_v50  ;;  %3981 = vmatprep.subr.bf16.mxu0 %v5793_v2  ;;  %v3095_v50 = vld [vmem:[#allocation5 + $0x60] sm:$0x7] }
 0x356   :  { %3960 = vmatpush3.bf16.msra.mxu1 %v5692_v32  ;;  %v5983_v35 = vld [vmem:[#allocation5 + $0x3c] sm:$0x77] }
 0x357   :  { %3982 = vmatpush3.bf16.msra.mxu0 %v5798_v44  ;;  %3961 = vmatprep.subr.bf16.mxu1 %v5699_v62  ;;  %v2958_v57 = vcombine.high %v5983_v35, %v5983_v35  ;;  %v2962_v10 = vpack.c.bf16 %v5983_v35, %v5983_v35  ;;  %v4398_v35 = vld [vmem:[%s6244_s5 + $0x18] sm:$0xff]  }
 0x358   :  { %3983 = vmatprep.subr.bf16.mxu0 %v5805_v31 }
 0x359   :  { %v2963_v36 = vpack.c.bf16 %v2958_v57, %v2958_v57  ;;  %v3106_v57 = vpack.c.bf16 %v3095_v50, %v3095_v50 }
 0x35a   :  { %3962 = vmatpush3.bf16.msra.mxu1 %v5704_v3 }
 0x35b   :  { %3984 = vmatpush3.bf16.msra.mxu0 %v5810_v53  ;;  %4208 = vmatprep.subr.bf16.mxu1 %v4431_v1 }
 0x35c   :  { %3996 = vmatprep.subr.bf16.mxu0 %v5603_v33 }
 0x35d   :  { %2855 = vmatmul.mubr.bf16.vlgmr.msra.gmra.mrb[36].mxu1 %v2814_v39  ;;  %v4399_v39 = vld [vmem:[%s6244_s5 + $0x60] sm:$0xff]  }
 0x35e   :  { %2895 = vmatmul.mubr.bf16.vlgmr.msra.gmra.mrb[64].mxu0 %v2816_v59  ;;  %4209 = vmatpush3.bf16.msra.mxu1 %v5854_v52  ;;  %v4400_v59 = vld [vmem:[%s6244_s5 + $0x20] sm:$0xff]  }
 0x35f   :  { %3997 = vmatpush3.bf16.msra.mxu0 %v5608_v55  ;;  %3002 = vmatprep.mubr.bf16.mxu0 %v2963_v36 }
 0x360   :  { %4210 = vmatprep.subr.bf16.mxu1 %v4431_v1  ;;  %3998 = vmatprep.subr.bf16.mxu0 %v5615_v21 }
 0x361   :  { %4216 = vmatprep.mubr.msk.bf16.mxu1 %vm6299_vm10, %v4431_v1 }
 0x362   :  { %4211 = vmatpush3.bf16.msra.mxu1 %v5864_v51 }
 0x363   :  { %3999 = vmatpush3.bf16.msra.mxu0 %v5620_v61  ;;  %4212 = vmatprep.subr.bf16.mxu1 %v4431_v1 }
 0x364   :  { %4000 = vmatprep.subr.bf16.mxu0 %v5627_v27 }
 0x366   :  { %4213 = vmatpush3.bf16.msra.mxu1 %v5878_v11 }
 0x367   :  { %4001 = vmatpush3.bf16.msra.mxu0 %v5633_v37  ;;  %4214 = vmatprep.subr.bf16.mxu1 %v4431_v1 }
 0x368   :  { %4002 = vmatprep.subr.bf16.mxu0 %v5641_v9 }
 0x36a   :  { %4215 = vmatpush3.bf16.msra.mxu1 %v5885_v13 }
 0x36b   :  { %4003 = vmatpush3.bf16.msra.mxu0 %v5646_v12  ;;  %4018 = vmatprep.subr.bf16.mxu1 %v5713_v7 }
 0x36c   :  { %4004 = vmatprep.subr.bf16.mxu0 %v5651_v15 }
 0x36d   :  { %4217 = vmatmul.mubr.msk.bf16.vlgmr.msra.gmra.mrb[40].mxu1 %vm6302_vm12, %v2818_v14 }
 0x36e   :  { %4019 = vmatpush3.bf16.msra.mxu1 %v5721_v25 }
 0x36f   :  { %4005 = vmatpush3.bf16.msra.mxu0 %v5666_v19  ;;  %4020 = vmatprep.subr.bf16.mxu1 %v5727_v23 }
 0x370   :  { %v2201_v0 = vpop.permute.xlu1 %2200  ;;  %4006 = vmatprep.subr.bf16.mxu0 %v5673_v6 }
 0x371   :  { %2215 = vst.msk [vmem:[#allocation5 + $0x48] sm:$0x7] %vm2067_vm9, %v2201_v0  ;;  %v2155_v18 = vpop.permute.xlu0 %2154 }
 0x372   :  { %2168 = vst.msk [vmem:[#allocation5 + $0x58] sm:$0x7] %vm2067_vm9, %v2155_v18  ;;  %4021 = vmatpush3.bf16.msra.mxu1 %v5734_v34 }
 0x373   :  { %4007 = vmatpush3.bf16.msra.mxu0 %v5679_v28  ;;  %4022 = vmatprep.subr.bf16.mxu1 %v5741_v63 }
 0x374   :  { %4008 = vmatprep.subr.bf16.mxu0 %v5687_v30 }
 0x376   :  { %v2107_v41 = vpop.permute.xlu1 %2106  ;;  %4023 = vmatpush3.bf16.msra.mxu1 %v5747_v5 }
 0x377   :  { %2120 = vst.msk [vmem:[#allocation5 + $0x54] sm:$0x7] %vm2067_vm9, %v2107_v41  ;;  %v2060_v48 = vpop.permute.xlu0 %2059  ;;  %4009 = vmatpush3.bf16.msra.mxu0 %v5692_v32  ;;  %4024 = vmatprep.subr.bf16.mxu1 %v5753_v8 }
 0x378   :  { %2073 = vst.msk [vmem:[#allocation5 + $0x64] sm:$0x7] %vm2067_vm9, %v2060_v48  ;;  %v2954_v16 = vld [vmem:[#allocation5 + $0x44] sm:$0x77]  ;;  %4010 = vmatprep.subr.bf16.mxu0 %v5699_v62 }
 0x379   :  { %v2959_v60 = vcombine.high %v2954_v16, %v2954_v16  ;;  %v2964_v54 = vpack.c.bf16 %v2954_v16, %v2954_v16 }
 0x37a   :  { %4025 = vmatpush3.bf16.msra.mxu1 %v5759_v40 }
 0x37b   :  { %v2965_v42 = vpack.c.bf16 %v2959_v60, %v2959_v60  ;;  %4011 = vmatpush3.bf16.msra.mxu0 %v5704_v3  ;;  %4026 = vmatprep.subr.bf16.mxu1 %v5765_v38 }
 0x37c   :  { %4220 = vmatprep.subr.bf16.mxu0 %v4431_v1 }
 0x37d   :  { %3042 = vmatprep.mubr.bf16.mxu1 %v2965_v42 }
 0x37e   :  { %3003 = vmatmul.mubr.bf16.vlgmr.msra.gmra.mrb[68].mxu0 %v2962_v10  ;;  %4027 = vmatpush3.bf16.msra.mxu1 %v5772_v43  ;;  %v6045_v29 = vld [vmem:[#allocation5 + $0x50] sm:$0x77] }
 0x37f   :  { %4221 = vmatpush3.bf16.msra.mxu0 %v5854_v52  ;;  %4028 = vmatprep.subr.bf16.mxu1 %v5780_v4  ;;  %v3098_v47 = vcombine.high %v6045_v29, %v6045_v29 }
 0x380   :  { %4222 = vmatprep.subr.bf16.mxu0 %v4431_v1  ;;  %4228 = vmatprep.mubr.msk.bf16.mxu0 %vm6299_vm10, %v4431_v1 }
 0x381   :  { %v3103_v56 = vpack.c.bf16 %v3098_v47, %v3098_v47 }
 0x382   :  { %4029 = vmatpush3.bf16.msra.mxu1 %v5785_v17 }
 0x383   :  { %4223 = vmatpush3.bf16.msra.mxu0 %v5864_v51  ;;  %4030 = vmatprep.subr.bf16.mxu1 %v5793_v2 }
 0x384   :  { %4224 = vmatprep.subr.bf16.mxu0 %v4431_v1 }
 0x386   :  { %4031 = vmatpush3.bf16.msra.mxu1 %v5798_v44 }
 0x387   :  { %4225 = vmatpush3.bf16.msra.mxu0 %v5878_v11  ;;  %4032 = vmatprep.subr.bf16.mxu1 %v5805_v31 }
 0x388   :  { %4226 = vmatprep.subr.bf16.mxu0 %v4431_v1 }
 0x38a   :  { %4033 = vmatpush3.bf16.msra.mxu1 %v5810_v53 }
 0x38b   :  { %4227 = vmatpush3.bf16.msra.mxu0 %v5885_v13  ;;  %4045 = vmatprep.subr.bf16.mxu1 %v5603_v33 }
 0x38c   :  { %4067 = vmatprep.subr.bf16.mxu0 %v5713_v7 }
 0x38d   :  { %3043 = vmatmul.mubr.bf16.vlgmr.msra.gmra.mrb[44].mxu1 %v2964_v54 }
 0x38e   :  { %4229 = vmatmul.mubr.msk.bf16.vlgmr.msra.gmra.mrb[72].mxu0 %vm6303_vm13, %v2966_v46  ;;  %4046 = vmatpush3.bf16.msra.mxu1 %v5608_v55 }
 0x38f   :  { %3142 = vmatprep.mubr.bf16.mxu1 %v3103_v56  ;;  %4068 = vmatpush3.bf16.msra.mxu0 %v5721_v25  ;;  %v2203_v20 = vpop.permute.xlu1 %2202 }
 0x390   :  { %2216 = vst.msk [vmem:[#allocation5 + $0x5c] sm:$0x7] %vm2067_vm9, %v2203_v20  ;;  %4047 = vmatprep.subr.bf16.mxu1 %v5615_v21  ;;  %4069 = vmatprep.subr.bf16.mxu0 %v5727_v23 }
 0x391   :  { %v2157_v24 = vpop.permute.xlu0 %2156 }
 0x392   :  { %2169 = vst.msk [vmem:[#allocation5 + $0x6c] sm:$0x7] %vm2067_vm9, %v2157_v24  ;;  %4048 = vmatpush3.bf16.msra.mxu1 %v5620_v61 }
 0x393   :  { %4070 = vmatpush3.bf16.msra.mxu0 %v5734_v34  ;;  %v2109_v33 = vpop.permute.xlu1 %2108  ;;  %4049 = vmatprep.subr.bf16.mxu1 %v5627_v27 }
 0x394   :  { %2121 = vst.msk [vmem:[#allocation5 + $0x68] sm:$0x7] %vm2067_vm9, %v2109_v33  ;;  %4071 = vmatprep.subr.bf16.mxu0 %v5741_v63 }
 0x396   :  { %4050 = vmatpush3.bf16.msra.mxu1 %v5633_v37 }
 0x397   :  { %4072 = vmatpush3.bf16.msra.mxu0 %v5747_v5  ;;  %v2205_v55 = vpop.permute.xlu1 %2204  ;;  %4051 = vmatprep.subr.bf16.mxu1 %v5641_v9  ;;  %v3094_v21 = vld [vmem:[#allocation5 + $0x58] sm:$0x77] }
 0x398   :  { %2217 = vst.msk [vmem:[#allocation5 + $0x70] sm:$0x7] %vm2067_vm9, %v2205_v55  ;;  %4073 = vmatprep.subr.bf16.mxu0 %v5753_v8  ;;  %v3099_v61 = vcombine.high %v3094_v21, %v3094_v21 }
 0x39a   :  { %4052 = vmatpush3.bf16.msra.mxu1 %v5646_v12  ;;  %v3105_v27 = vpack.c.bf16 %v3099_v61, %v3099_v61  ;;  %v3102_v12 = vpack.c.bf16 %v6045_v29, %v6045_v29 }
 0x39b   :  { %4074 = vmatpush3.bf16.msra.mxu0 %v5759_v40  ;;  %4053 = vmatprep.subr.bf16.mxu1 %v5651_v15  ;;  %v6086_v37 = vld [vmem:[#allocation5 + $0x64] sm:$0x77]  ;;  %v3104_v15 = vpack.c.bf16 %v3094_v21, %v3094_v21 }
 0x39c   :  { %4075 = vmatprep.subr.bf16.mxu0 %v5765_v38  ;;  %3182 = vmatprep.mubr.bf16.mxu0 %v3105_v27  ;;  %v3238_v9 = vcombine.high %v6086_v37, %v6086_v37 }
 0x39e   :  { %4054 = vmatpush3.bf16.msra.mxu1 %v5666_v19  ;;  %v4391_v19 = vld [vmem:[%s6244_s5 + $0x40] sm:$0xff]  }
 0x39f   :  { %4076 = vmatpush3.bf16.msra.mxu0 %v5772_v43  ;;  %4055 = vmatprep.subr.bf16.mxu1 %v5673_v6  ;;  %v3243_v6 = vpack.c.bf16 %v3238_v9, %v3238_v9 }
 0x3a0   :  { %4077 = vmatprep.subr.bf16.mxu0 %v5780_v4 }
 0x3a2   :  { %4056 = vmatpush3.bf16.msra.mxu1 %v5679_v28  ;;  %v4392_v28 = vld [vmem:[%s6244_s5] sm:$0xff]  }
 0x3a3   :  { %4078 = vmatpush3.bf16.msra.mxu0 %v5785_v17  ;;  %4057 = vmatprep.subr.bf16.mxu1 %v5687_v30  ;;  %v4393_v30 = vld [vmem:[%s6244_s5 + $0x48] sm:$0xff]  }
 0x3a4   :  { %4079 = vmatprep.subr.bf16.mxu0 %v5793_v2 }
 0x3a6   :  { %4058 = vmatpush3.bf16.msra.mxu1 %v5692_v32  ;;  %v4394_v32 = vld [vmem:[%s6244_s5 + $0x8] sm:$0xff]  }
 0x3a7   :  { %4080 = vmatpush3.bf16.msra.mxu0 %v5798_v44  ;;  %4059 = vmatprep.subr.bf16.mxu1 %v5699_v62  ;;  %v4395_v62 = vld [vmem:[%s6244_s5 + $0x50] sm:$0xff]  }
 0x3a8   :  { %4081 = vmatprep.subr.bf16.mxu0 %v5805_v31 }
 0x3aa   :  { %4060 = vmatpush3.bf16.msra.mxu1 %v5704_v3  ;;  %v6119_v3 = vld [vmem:[#allocation5 + $0x6c] sm:$0x77] }
 0x3ab   :  { %4082 = vmatpush3.bf16.msra.mxu0 %v5810_v53  ;;  %4232 = vmatprep.subr.bf16.mxu1 %v4431_v1  ;;  %v3239_v22 = vcombine.high %v6119_v3, %v6119_v3 }
 0x3ac   :  { %4094 = vmatprep.subr.bf16.mxu0 %v4391_v19 }
 0x3ad   :  { %3143 = vmatmul.mubr.bf16.vlgmr.msra.gmra.mrb[48].mxu1 %v3102_v12  ;;  %v3245_v36 = vpack.c.bf16 %v3239_v22, %v3239_v22 }
 0x3ae   :  { %3183 = vmatmul.mubr.bf16.vlgmr.msra.gmra.mrb[76].mxu0 %v3104_v15  ;;  %4233 = vmatpush3.bf16.msra.mxu1 %v5854_v52 }
 0x3af   :  { %4095 = vmatpush3.bf16.msra.mxu0 %v4392_v28  ;;  %3282 = vmatprep.mubr.bf16.mxu0 %v3243_v6 }
 0x3b0   :  { %4234 = vmatprep.subr.bf16.mxu1 %v4431_v1  ;;  %4096 = vmatprep.subr.bf16.mxu0 %v4393_v30 }
 0x3b1   :  { %4240 = vmatprep.mubr.msk.bf16.mxu1 %vm6299_vm10, %v4431_v1 }
 0x3b2   :  { %4235 = vmatpush3.bf16.msra.mxu1 %v5864_v51 }
 0x3b3   :  { %4097 = vmatpush3.bf16.msra.mxu0 %v4394_v32  ;;  %4236 = vmatprep.subr.bf16.mxu1 %v4431_v1 }
 0x3b4   :  { %4098 = vmatprep.subr.bf16.mxu0 %v4395_v62 }
 0x3b6   :  { %4237 = vmatpush3.bf16.msra.mxu1 %v5878_v11 }
 0x3b7   :  { %4099 = vmatpush3.bf16.msra.mxu0 %v4396_v49  ;;  %4238 = vmatprep.subr.bf16.mxu1 %v4431_v1 }
 0x3b8   :  { %4100 = vmatprep.subr.bf16.mxu0 %v4397_v58 }
 0x3ba   :  { %4239 = vmatpush3.bf16.msra.mxu1 %v5885_v13 }
 0x3bb   :  { %4101 = vmatpush3.bf16.msra.mxu0 %v4398_v35  ;;  %4116 = vmatprep.subr.bf16.mxu1 %v5713_v7  ;;  %v4401_v7 = vld [vmem:[%s6244_s5 + $0x68] sm:$0xff]  }
 0x3bc   :  { %4102 = vmatprep.subr.bf16.mxu0 %v4399_v39  ;;  %v4370_v39 = vld [vmem:[%s6246_s7] sm:$0xff]  }
 0x3bd   :  { %4241 = vmatmul.mubr.msk.bf16.vlgmr.msra.gmra.mrb[52].mxu1 %vm6304_vm14, %v3106_v57 }
 0x3be   :  { %4117 = vmatpush3.bf16.msra.mxu1 %v5721_v25  ;;  %3322 = vmatprep.mubr.bf16.mxu1 %v3245_v36  ;;  %v4403_v25 = vld [vmem:[%s6244_s5 + $0x70] sm:$0xff]  }
 0x3bf   :  { %4103 = vmatpush3.bf16.msra.mxu0 %v4400_v59  ;;  %4118 = vmatprep.subr.bf16.mxu1 %v5727_v23  ;;  %v4404_v23 = vld [vmem:[%s6244_s5 + $0x30] sm:$0xff]  }
 0x3c0   :  { %4104 = vmatprep.subr.bf16.mxu0 %v4401_v7 }
 0x3c2   :  { %4119 = vmatpush3.bf16.msra.mxu1 %v5734_v34  ;;  %v4405_v34 = vld [vmem:[%s6244_s5 + $0x78] sm:$0xff]  }
 0x3c3   :  { %4105 = vmatpush3.bf16.msra.mxu0 %v4402_v26  ;;  %4120 = vmatprep.subr.bf16.mxu1 %v5741_v63  ;;  %v4406_v63 = vld [vmem:[%s6244_s5 + $0x38] sm:$0xff]  }
 0x3c4   :  { %4106 = vmatprep.subr.bf16.mxu0 %v4403_v25 }
 0x3c6   :  { %4121 = vmatpush3.bf16.msra.mxu1 %v5747_v5  ;;  %v3242_v5 = vpack.c.bf16 %v6086_v37, %v6086_v37 }
 0x3c7   :  { %4107 = vmatpush3.bf16.msra.mxu0 %v4404_v23  ;;  %4122 = vmatprep.subr.bf16.mxu1 %v5753_v8 }
 0x3c8   :  { %4108 = vmatprep.subr.bf16.mxu0 %v4405_v34  ;;  %v4371_v34 = vld [vmem:[%s6246_s7 + $0x8] sm:$0xff]  }
 0x3ca   :  { %4123 = vmatpush3.bf16.msra.mxu1 %v5759_v40 }
 0x3cb   :  { %4109 = vmatpush3.bf16.msra.mxu0 %v4406_v63  ;;  %4124 = vmatprep.subr.bf16.mxu1 %v5765_v38 }
 0x3cc   :  { %4244 = vmatprep.subr.bf16.mxu0 %v4431_v1 }
 0x3ce   :  { %3283 = vmatmul.mubr.bf16.vlgmr.msra.gmra.mrb[80].mxu0 %v3242_v5  ;;  %4125 = vmatpush3.bf16.msra.mxu1 %v5772_v43  ;;  %v4372_v5 = vld [vmem:[%s6246_s7 + $0x10] sm:$0xff]  }
 0x3cf   :  { %4245 = vmatpush3.bf16.msra.mxu0 %v5854_v52  ;;  %4126 = vmatprep.subr.bf16.mxu1 %v5780_v4  ;;  %v3235_v4 = vld [vmem:[#allocation5 + $0x74] sm:$0x7]  ;;  %v3244_v52 = vpack.c.bf16 %v6119_v3, %v6119_v3 }
 0x3d0   :  { %4246 = vmatprep.subr.bf16.mxu0 %v4431_v1  ;;  %4252 = vmatprep.mubr.msk.bf16.mxu0 %vm6299_vm10, %v4431_v1  ;;  %v3865_v8 = vpop.f32.mrb[48].mxu0 }
 0x3d1   :  { %v3866_v40 = vpop.f32.mrb[49].mxu0 }
 0x3d2   :  { %4127 = vmatpush3.bf16.msra.mxu1 %v5785_v17  ;;  %v3867_v38 = vadd.f32 %v3866_v40, %v3865_v8  ;;  %v3868_v14 = vpop.f32.mrb[50].mxu0  ;;  %v3246_v17 = vpack.c.bf16 %v3235_v4, %v3235_v4  ;;  %v4373_v8 = vld [vmem:[%s6246_s7 + $0x18] sm:$0xff]  }
 0x3d3   :  { %4247 = vmatpush3.bf16.msra.mxu0 %v5864_v51  ;;  %4128 = vmatprep.subr.bf16.mxu1 %v5793_v2  ;;  %v3869_v43 = vpop.f32.mrb[51].mxu0 }
 0x3d4   :  { %4248 = vmatprep.subr.bf16.mxu0 %v4431_v1 }
 0x3d6   :  { %4129 = vmatpush3.bf16.msra.mxu1 %v5798_v44 }
 0x3d7   :  { %4249 = vmatpush3.bf16.msra.mxu0 %v5878_v11  ;;  %4130 = vmatprep.subr.bf16.mxu1 %v5805_v31 }
 0x3d8   :  { %4250 = vmatprep.subr.bf16.mxu0 %v4431_v1 }
 0x3da   :  { %4131 = vmatpush3.bf16.msra.mxu1 %v5810_v53  ;;  %v6197_v53 = vld [vmem:[%s6245_s6] ss:$0 sm:$0xff] }
 0x3db   :  { %4251 = vmatpush3.bf16.msra.mxu0 %v5885_v13  ;;  %4256 = vmatprep.subr.bf16.mxu1 %v4431_v1  ;;  %v2577_v13 = vadd.f32 %v3867_v38, %v6197_v53 }
 0x3dd   :  { %3323 = vmatmul.mubr.bf16.vlgmr.msra.gmra.mrb[56].mxu1 %v3244_v52 }
 0x3de   :  { %4253 = vmatmul.mubr.msk.bf16.vlgmr.msra.gmra.mrb[84].mxu0 %vm6305_vm15, %v3246_v17  ;;  %4264 = vmatprep.mubr.msk.bf16.mxu1 %vm6299_vm10, %v4431_v1 }
 0x3df   :  { %4257 = vmatpush3.bf16.msra.mxu1 %v4370_v39 }
 0x3e0   :  { %v2656_v2 = vpop.f32.mrb[52].mxu0  ;;  %4258 = vmatprep.subr.bf16.mxu1 %v4431_v1 }
 0x3e1   :  { %v4194_v44 = vpop.f32.mrb[53].mxu0 }
 0x3e2   :  { %v2659_v31 = vpop.f32.mrb[54].mxu0 }
 0x3e3   :  { %v4195_v51 = vpop.f32.mrb[55].mxu0  ;;  %4259 = vmatpush3.bf16.msra.mxu1 %v4371_v34 }
 0x3e4   :  { %4260 = vmatprep.subr.bf16.mxu1 %v4431_v1 }
 0x3e7   :  { %4261 = vmatpush3.bf16.msra.mxu1 %v4372_v5 }
 0x3e8   :  { %4262 = vmatprep.subr.bf16.mxu1 %v4431_v1 }
 0x3eb   :  { %4263 = vmatpush3.bf16.msra.mxu1 %v4373_v8 }
 0x3f0   :  { %v3887_v11 = vpop.f32.mrb[28].mxu1 }
 0x3f1   :  { %v3888_v0 = vpop.f32.mrb[29].mxu1 }
 0x3f2   :  { %v3889_v18 = vadd.f32 %v3888_v0, %v3887_v11  ;;  %v3890_v41 = vpop.f32.mrb[30].mxu1 }
 0x3f3   :  { %v3891_v48 = vpop.f32.mrb[31].mxu1 }
 0x3f4   :  { %v2617_v16 = vadd.f32 %v3889_v18, %v2577_v13 }
 0x3f6   :  { %v2657_v60 = vadd.f32 %v2656_v2, %v2617_v16 }
 0x3f8   :  { %v2662_v12 = vmax.f32 %v2657_v60, 0.0 }
 0x401   :  { %v3914_v42 = vpop.f32.mrb[56].mxu0 }
 0x402   :  { %v3915_v10 = vpop.f32.mrb[57].mxu0 }
 0x403   :  { %v3916_v29 = vadd.f32 %v3915_v10, %v3914_v42  ;;  %v3917_v45 = vpop.f32.mrb[58].mxu0 }
 0x404   :  { %v3918_v47 = vpop.f32.mrb[59].mxu0 }
 0x405   :  { %v2717_v20 = vadd.f32 %v3916_v29, %v6197_v53 }
 0x410   :  { %v3936_v54 = vpop.f32.mrb[32].mxu1 }
 0x411   :  { %v2796_v46 = vpop.f32.mrb[60].mxu0  ;;  %v3937_v56 = vpop.f32.mrb[33].mxu1 }
 0x412   :  { %v4206_v24 = vpop.f32.mrb[61].mxu0  ;;  %v3938_v33 = vadd.f32 %v3937_v56, %v3936_v54  ;;  %v3939_v55 = vpop.f32.mrb[34].mxu1 }
 0x413   :  { %v2799_v21 = vpop.f32.mrb[62].mxu0  ;;  %v3940_v61 = vpop.f32.mrb[35].mxu1 }
 0x414   :  { %v2757_v27 = vadd.f32 %v3938_v33, %v2717_v20  ;;  %v4207_v37 = vpop.f32.mrb[63].mxu0 }
 0x416   :  { %v2797_v9 = vadd.f32 %v2796_v46, %v2757_v27 }
 0x418   :  { %v2802_v15 = vmax.f32 %v2797_v9, 0.0 }
 0x41a   :  { %v2803_v19 = vadd.f32 %v2802_v15, %v2662_v12 }
 0x430   :  { %v3963_v6 = vpop.f32.mrb[36].mxu1 }
 0x431   :  { %v3985_v28 = vpop.f32.mrb[64].mxu0  ;;  %v3964_v30 = vpop.f32.mrb[37].mxu1 }
 0x432   :  { %v3965_v32 = vadd.f32 %v3964_v30, %v3963_v6  ;;  %v3986_v62 = vpop.f32.mrb[65].mxu0  ;;  %v3966_v3 = vpop.f32.mrb[38].mxu1 }
 0x433   :  { %v3987_v49 = vadd.f32 %v3986_v62, %v3985_v28  ;;  %v3988_v58 = vpop.f32.mrb[66].mxu0  ;;  %v3967_v50 = vpop.f32.mrb[39].mxu1 }
 0x434   :  { %v2857_v22 = vadd.f32 %v3965_v32, %v6197_v53  ;;  %v3989_v35 = vpop.f32.mrb[67].mxu0 }
 0x436   :  { %v2897_v57 = vadd.f32 %v3987_v49, %v2857_v22 }
 0x440   :  { %v2936_v36 = vpop.f32.mrb[40].mxu1 }
 0x441   :  { %v2937_v59 = vadd.f32 %v2936_v36, %v2897_v57  ;;  %v4218_v7 = vpop.f32.mrb[41].mxu1 }
 0x442   :  { %v2939_v26 = vpop.f32.mrb[42].mxu1 }
 0x443   :  { %v2942_v25 = vmax.f32 %v2937_v59, 0.0  ;;  %v4219_v23 = vpop.f32.mrb[43].mxu1 }
 0x445   :  { %v2943_v63 = vadd.f32 %v2942_v25, %v2803_v19 }
 0x447   :  { %v2944_v30 = vsel %vm1545_vm5, %v2943_v63, 0.0 }
 0x448   :  { %v2945_v62 = vrot.slane %v2944_v30, 4 }
 0x44a   :  { %v2946_v7 = vadd.f32 %v2945_v62, %v2944_v30 }
 0x44c   :  { %v2947_v23 = vrot.slane %v2946_v7, 2 }
 0x44e   :  { %v2948_v5 = vadd.f32 %v2947_v23, %v2946_v7 }
 0x451   :  { %v4012_v40 = vpop.f32.mrb[68].mxu0 }
 0x452   :  { %v4013_v38 = vpop.f32.mrb[69].mxu0 }
 0x453   :  { %v4014_v14 = vadd.f32 %v4013_v38, %v4012_v40  ;;  %v4015_v43 = vpop.f32.mrb[70].mxu0  ;;  %v2949_v38 = vrot.slane %v2948_v5, 1 }
 0x454   :  { %v4016_v4 = vpop.f32.mrb[71].mxu0 }
 0x455   :  { %v3005_v44 = vadd.f32 %v4014_v14, %v6197_v53  ;;  %v2950_v43 = vadd.f32 %v2949_v38, %v2948_v5 }
 0x460   :  { %v4034_v17 = vpop.f32.mrb[44].mxu1 }
 0x461   :  { %v3084_v52 = vpop.f32.mrb[72].mxu0  ;;  %v4035_v2 = vpop.f32.mrb[45].mxu1 }
 0x462   :  { %v4036_v31 = vadd.f32 %v4035_v2, %v4034_v17  ;;  %v4230_v51 = vpop.f32.mrb[73].mxu0  ;;  %v4037_v11 = vpop.f32.mrb[46].mxu1 }
 0x463   :  { %v3087_v0 = vpop.f32.mrb[74].mxu0  ;;  %v4038_v13 = vpop.f32.mrb[47].mxu1  ;;  %v3568_v51 = vld [vmem:[%s6247_s8] ss:$0 sm:$0xff] }
 0x464   :  { %v3045_v18 = vadd.f32 %v4036_v31, %v3005_v44  ;;  %v4231_v41 = vpop.f32.mrb[75].mxu0 }
 0x466   :  { %v3085_v48 = vadd.f32 %v3084_v52, %v3045_v18  ;;  %v2951_v52 = vmul.f32 0.11111111, %v2950_v43 }
 0x468   :  { %v3090_v61 = vmax.f32 %v3085_v48, 0.0 }
 0x480   :  { %v4061_v1 = vpop.f32.mrb[48].mxu1 }
 0x481   :  { %v4083_v16 = vpop.f32.mrb[76].mxu0  ;;  %v4062_v60 = vpop.f32.mrb[49].mxu1 }
 0x482   :  { %v4063_v42 = vadd.f32 %v4062_v60, %v4061_v1  ;;  %v4084_v10 = vpop.f32.mrb[77].mxu0  ;;  %v4064_v29 = vpop.f32.mrb[50].mxu1 }
 0x483   :  { %v4085_v45 = vadd.f32 %v4084_v10, %v4083_v16  ;;  %v4086_v47 = vpop.f32.mrb[78].mxu0  ;;  %v4065_v54 = vpop.f32.mrb[51].mxu1 }
 0x484   :  { %v3145_v46 = vadd.f32 %v4063_v42, %v6197_v53  ;;  %v4087_v56 = vpop.f32.mrb[79].mxu0 }
 0x486   :  { %v3185_v20 = vadd.f32 %v4085_v45, %v3145_v46 }
 0x490   :  { %v3224_v24 = vpop.f32.mrb[52].mxu1 }
 0x491   :  { %v3225_v33 = vadd.f32 %v3224_v24, %v3185_v20  ;;  %v4242_v55 = vpop.f32.mrb[53].mxu1 }
 0x492   :  { %v3227_v21 = vpop.f32.mrb[54].mxu1 }
 0x493   :  { %v3230_v27 = vmax.f32 %v3225_v33, 0.0  ;;  %v4243_v37 = vpop.f32.mrb[55].mxu1 }
 0x495   :  { %v3231_v9 = vadd.f32 %v3230_v27, %v3090_v61 }
 0x4a1   :  { %v4110_v12 = vpop.f32.mrb[80].mxu0 }
 0x4a2   :  { %v4111_v15 = vpop.f32.mrb[81].mxu0 }
 0x4a3   :  { %v4112_v19 = vadd.f32 %v4111_v15, %v4110_v12  ;;  %v4113_v6 = vpop.f32.mrb[82].mxu0 }
 0x4a4   :  { %v4114_v28 = vpop.f32.mrb[83].mxu0 }
 0x4a5   :  { %v3285_v58 = vadd.f32 %v4112_v19, %v6197_v53 }
 0x4b0   :  { %v4132_v32 = vpop.f32.mrb[56].mxu1 }
 0x4b1   :  { %v4133_v3 = vpop.f32.mrb[57].mxu1  ;;  %v3364_v49 = vpop.f32.mrb[84].mxu0 }
 0x4b2   :  { %v4134_v50 = vadd.f32 %v4133_v3, %v4132_v32  ;;  %v4135_v22 = vpop.f32.mrb[58].mxu1  ;;  %v4254_v35 = vpop.f32.mrb[85].mxu0 }
 0x4b3   :  { %v4136_v57 = vpop.f32.mrb[59].mxu1  ;;  %v3367_v39 = vpop.f32.mrb[86].mxu0 }
 0x4b4   :  { %v3325_v36 = vadd.f32 %v4134_v50, %v3285_v58  ;;  %v4255_v59 = vpop.f32.mrb[87].mxu0 }
 0x4b6   :  { %v3365_v26 = vadd.f32 %v3364_v49, %v3325_v36 }
 0x4b8   :  { %v3370_v25 = vmax.f32 %v3365_v26, 0.0 }
 0x4ba   :  { %v3371_v34 = vadd.f32 %v3370_v25, %v3231_v9 }
 0x4bc   :  { %v3372_v63 = vsel %vm1545_vm5, %v3371_v34, 0.0 }
 0x4bd   :  { %v3373_v8 = vrot.slane %v3372_v63, 4 }
 0x4bf   :  { %v3374_v40 = vadd.f32 %v3373_v8, %v3372_v63 }
 0x4c1   :  { %v3375_v14 = vrot.slane %v3374_v40, 2 }
 0x4c3   :  { %v3376_v53 = vadd.f32 %v3375_v14, %v3374_v40 }
 0x4c5   :  { %v3377_v4 = vrot.slane %v3376_v53, 1 }
 0x4c7   :  { %v3378_v17 = vadd.f32 %v3377_v4, %v3376_v53 }
 0x4c9   :  { %v3379_v2 = vmul.f32 0.11111111, %v3378_v17 }
 0x4cb   :  { %v3380_v44 = vsel %vm329_vm3, %v2951_v52, %v3379_v2 }
 0x4cc   :  { %v3381_v31 = vpack.c.bf16 %v3380_v44, %v3380_v44 }
 0x4ce   :  { %4265 = vmatmul.mubr.msk.bf16.vlgmr.msra.gmra.mrb[60].mxu1 %vm6306_vm2, %v3381_v31 }
 0x5a1   :  { %v3458_v11 = vpop.f32.mrb[60].mxu1 }
 0x5a2   :  { %v3459_v0 = vadd.f32 %v3568_v51, %v3458_v11  ;;  %v4266_v13 = vpop.f32.mrb[61].mxu1 }
 0x5a3   :  { %v3461_v18 = vpop.f32.mrb[62].mxu1 }
 0x5a4   :  { %v3464_v41 = vmax.f32 %v3459_v0, 0.0  ;;  %v4267_v48 = vpop.f32.mrb[63].mxu1 }
 0x5a6   :  { %3465 = vst [vmem:[#allocation6] sm:$0x3] %v3464_v41 }
 0x5a7   :  { %4418 = shalt.err (!%p4415_p4)
}
 0x5a8   :  { %s4419_s8 = scalar_lea.hbm %s6248_s9, 32 }
 0x5a9   :  { %p4420_p5 = scmp.ne.s32.totalorder %s6248_s9, %s4419_s8  ;;  %p4423_p6 = scmp.lt.u32.totalorder %s4419_s8, %s6248_s9 }
 0x5ab   :  { %p4425_p7 = pnand %p4423_p6, %p4420_p5 }
 0x5ad   :  { %4428 = shalt.err (!%p4425_p7)
}
 0x5ae   :  { %3475 = dma.vmem_to_hbm [thread:$0]  %s3473_s22, 32, %s6248_s9, [#allocation7]  }
 0x5af   :  { %4429 = dma.done.wait [#allocation7], 32  }
 0x5b0   :  { %4430 = vsyncadd [#allocation7], 4294967264 }
 0x5b1   :  { %3479 = vsyncpa [#allocation7], 1 }

</bundles_post_ra>
